<compile_context>
chip_gen: v6e
topology: v6e:2x2x1
jax: 0.10.0
libtpu: 0.0.40
codegen_flags: <defaults>
</compile_context>

<pallas_src>
import functools

import jax
import jax.numpy as jnp
from jax import lax
from jax.experimental import pallas as pl
from jax.experimental.pallas import tpu as pltpu

KERNEL_SIZE = 5
PADDING = 2
STRIDE = 2
BN_EPS = 1e-5

LANE = 128
SUBLANE = 8
TILE_M_MAX = 2048
VMEM_BUDGET = 20 * 1024 * 1024      # conservative working-set target
VMEM_LIMIT = 32 * 1024 * 1024       # explicit scoped-VMEM limit (safe on v5e/v6e/v7x)


def _round_up(x, m):
    return (x + m - 1) // m * m


def _out_size(in_size):
    return (in_size - 1) * STRIDE - 2 * PADDING + KERNEL_SIZE


# ---------------------------------------------------------------------------
# Sub-pixel (phase) decomposition of the transposed conv.
# ---------------------------------------------------------------------------
def _phase_taps(phase, in_size):
    """Taps of one output-parity phase along one spatial dim.

    Output positions o = STRIDE*i + phase pull input rows i + dh with weight
    index kh, for every kh with (phase + PADDING - kh) % STRIDE == 0 and
    dh = (phase + PADDING - kh) // STRIDE.  Returns (taps, n_out, pad_lo, pad_hi)
    where taps = [(dh, kh), ...] and pad_* is the zero padding needed on x.
    """
    out_size = _out_size(in_size)
    taps = [((phase + PADDING - kh) // STRIDE, kh)
            for kh in range(KERNEL_SIZE)
            if (phase + PADDING - kh) % STRIDE == 0]
    n_out = (out_size - phase + STRIDE - 1) // STRIDE
    offs = [d for d, _ in taps]
    pad_lo = max(0, -min(offs))
    pad_hi = max(0, (n_out - 1) + max(offs) - (in_size - 1))
    return taps, n_out, pad_lo, pad_hi


def _build_phase(x_nhwc, weight_iohw, a, b):
    """Transposed patches (kd, M) and weight (Cout, kd) for output phase (a, b)."""
    n, h, w, cin = x_nhwc.shape
    taps_h, n_h, lo_h, hi_h = _phase_taps(a, h)
    taps_w, n_w, lo_w, hi_w = _phase_taps(b, w)
    xp = jnp.pad(x_nhwc, ((0, 0), (lo_h, hi_h), (lo_w, hi_w), (0, 0)))
    cols, wrows = [], []
    for dh, kh in taps_h:
        for dw, kw in taps_w:
            cols.append(xp[:, dh + lo_h: dh + lo_h + n_h,
                             dw + lo_w: dw + lo_w + n_w, :])   # (N, n_h, n_w, Cin)
            wrows.append(weight_iohw[:, :, kh, kw])            # (Cin, Cout)
    m_p = n * n_h * n_w
    pt = jnp.stack(cols, axis=0)                               # (T, N, n_h, n_w, Cin)
    pt = jnp.moveaxis(pt, -1, 1).reshape(len(cols) * cin, m_p)  # (T*Cin, M) = (kd, M)
    wt = jnp.concatenate(wrows, axis=0).T                      # (Cout, kd)
    return pt, wt, n_h, n_w


# ---------------------------------------------------------------------------
# Fused kernel: matmul + BN statistics (sweep 0), matmul + BN + ReLU (sweep 1).
# ---------------------------------------------------------------------------
def _fused_kernel(m_inv, tile_inv, pad_rows,
                  patches_ref, w_ref, gamma_ref, beta_ref, out_ref,
                  sum_sc, sq_sc, shift_k_sc, scale_sc, bias_sc):
    """One (sweep, phase, m-tile) grid step.

    patches_ref: (kd_pad, TM) bf16     w_ref:   (Cout_sub, kd_pad) bf16
    gamma/beta:  (Cout_sub, 1) f32     out_ref: (Cout_sub, TM) f32
    scratch:     five (Cout_sub, 1) f32 accumulators (persist across the grid).
    """
    s = pl.program_id(0)
    first = (pl.program_id(1) == 0) & (pl.program_id(2) == 0)

    conv = jnp.dot(w_ref[...], patches_ref[...],
                   preferred_element_type=jnp.float32)          # (Cout_sub, TM)

    @pl.when(s == 0)
    def _accumulate_stats():
        row_sum = jnp.sum(conv, axis=1, keepdims=True)

        @pl.when(first)
        def _init():
            # Shift for the second moment ~ mean of the first tile (any value is
            # mathematically exact; a good one avoids cancellation).
            shift_k_sc[...] = row_sum * tile_inv
            sum_sc[...] = jnp.zeros_like(sum_sc)
            sq_sc[...] = jnp.zeros_like(sq_sc)

        centered = conv - shift_k_sc[...]
        sum_sc[...] += row_sum
        sq_sc[...] += jnp.sum(centered * centered, axis=1, keepdims=True)

    @pl.when(s == 1)
    def _emit_output():
        @pl.when(first)
        def _finalize_stats():
            k = shift_k_sc[...]
            mean = sum_sc[...] * m_inv
            # Zero-padded rows contributed (0 - k)^2 each to sq_sc; remove them.
            ssq = sq_sc[...] - pad_rows * (k * k)
            d = mean - k
            var = jnp.maximum(ssq * m_inv - d * d, 0.0)
            scale = gamma_ref[...] * lax.rsqrt(var + BN_EPS)
            scale_sc[...] = scale
            bias_sc[...] = beta_ref[...] - mean * scale

        y = conv * scale_sc[...] + bias_sc[...]
        out_ref[...] = jnp.maximum(y, 0.0).astype(out_ref.dtype)


# ---------------------------------------------------------------------------
# Wrapper: DecoderBlock.forward (out=False path, BN in training mode).
# ---------------------------------------------------------------------------
@jax.jit
def decoder_block_forward(x_nchw, weight_iohw, gamma, beta):
    """x:(N,Cin,H,W)  weight:(Cin,Cout,K,K) [PyTorch ConvTranspose2d layout]
       gamma,beta:(Cout,)  ->  (N,Cout,Ho,Wo) with Ho=(H-1)*2-4+5."""
    n, cin, h, w = x_nchw.shape
    cin2, cout, k, _ = weight_iohw.shape
    assert cin2 == cin and k == KERNEL_SIZE

    ho, wo = _out_size(h), _out_size(w)
    m_true = n * ho * wo
    n_phases = STRIDE * STRIDE

    x_nhwc = jnp.transpose(x_nchw, (0, 2, 3, 1)).astype(jnp.bfloat16)
    w_bf = weight_iohw.astype(jnp.bfloat16)

    pts, wts, metas = [], [], []
    for a in range(STRIDE):
        for b in range(STRIDE):
            pt, wt, n_h, n_w = _build_phase(x_nhwc, w_bf, a, b)
            pts.append(pt)
            wts.append(wt)
            metas.append((a, b, n_h, n_w))

    kd_pad = _round_up(max(pt.shape[0] for pt in pts), LANE)
    cout_sub = _round_up(cout, SUBLANE)
    max_m = max(pt.shape[1] for pt in pts)

    # Tile-size selection under an explicit VMEM budget (v7x-safe).
    n_tiles = max(1, -(-max_m // TILE_M_MAX))
    while True:
        tm = _round_up(-(-max_m // n_tiles), LANE)
        vmem_est = (2 * tm * kd_pad * 2            # double-buffered bf16 patches
                    + 2 * cout_sub * tm * 4        # double-buffered f32 out tile
                    + 2 * cout_sub * kd_pad * 2    # weights
                    + 16 * cout_sub * LANE * 4)    # small operands + scratch slack
        if vmem_est <= VMEM_BUDGET or tm == LANE:
            break
        n_tiles += 1
    m_pad = tm * n_tiles

    patches = jnp.stack(
        [jnp.pad(pt, ((0, kd_pad - pt.shape[0]), (0, m_pad - pt.shape[1])))
         for pt in pts])                                        # (4, kd_pad, m_pad) bf16
    wmat = jnp.stack(
        [jnp.pad(wt, ((0, cout_sub - cout), (0, kd_pad - wt.shape[1])))
         for wt in wts])                                        # (4, cout_sub, kd_pad) bf16
    gamma_c = jnp.pad(gamma.astype(jnp.float32),
                      (0, cout_sub - cout)).reshape(cout_sub, 1)
    beta_c = jnp.pad(beta.astype(jnp.float32),
                     (0, cout_sub - cout)).reshape(cout_sub, 1)

    kernel = functools.partial(
        _fused_kernel,
        float(1.0 / m_true),                    # 1 / (N*Ho*Wo)
        float(1.0 / tm),                        # first-tile mean scale
        float(n_phases * m_pad - m_true))       # total zero-padded row count

    flops = 2 * n_phases * n_tiles * 2 * cout_sub * kd_pad * tm   # two sweeps
    bytes_accessed = (2 * patches.size * 2 + 2 * wmat.size * 2
                      + n_phases * cout_sub * m_pad * 4
                      + 4 * cout_sub * 4)
    cost = pl.CostEstimate(flops=flops, transcendentals=0,
                           bytes_accessed=bytes_accessed)

    out_pad = pl.pallas_call(
        kernel,
        out_shape=jax.ShapeDtypeStruct((n_phases, cout_sub, m_pad), jnp.float32),
        grid_spec=pltpu.PrefetchScalarGridSpec(
            num_scalar_prefetch=0,
            grid=(2, n_phases, n_tiles),
            in_specs=[
                pl.BlockSpec((None, kd_pad, tm), lambda s, p, i: (p, 0, i)),
                pl.BlockSpec((None, cout_sub, kd_pad), lambda s, p, i: (p, 0, 0)),
                pl.BlockSpec((cout_sub, 1), lambda s, p, i: (0, 0)),
                pl.BlockSpec((cout_sub, 1), lambda s, p, i: (0, 0)),
            ],
            # Sweep 0 never writes the output: every step maps to block (0,0,0),
            # which stays resident and is only DMA'd out after sweep 1 fills it.
            out_specs=pl.BlockSpec((None, cout_sub, tm),
                                   lambda s, p, i: (s * p, 0, s * i)),
            scratch_shapes=[pltpu.VMEM((cout_sub, 1), jnp.float32)] * 5,
        ),
        compiler_params=pltpu.CompilerParams(
            dimension_semantics=("arbitrary", "arbitrary", "arbitrary"),
            vmem_limit_bytes=VMEM_LIMIT),
        cost_estimate=cost,
    )(patches, wmat, gamma_c, beta_c)

    # Interleave the four phases back into the NCHW output.
    out_nchw = jnp.zeros((n, cout, ho, wo), jnp.float32)
    for idx, (a, b, n_h, n_w) in enumerate(metas):
        m_p = n * n_h * n_w
        ph = out_pad[idx, :cout, :m_p].reshape(cout, n, n_h, n_w)
        out_nchw = out_nchw.at[:, :, a::STRIDE, b::STRIDE].set(
            jnp.transpose(ph, (1, 0, 2, 3)))
    return out_nchw


# ---------------------------------------------------------------------------
# Pure-JAX reference (exact PyTorch ConvTranspose2d + train-mode BN + ReLU).
# ---------------------------------------------------------------------------
def _reference(x_nchw, weight_iohw, gamma, beta):
    k = weight_iohw.shape[2]
    # (Cin,Cout,K,K) -> (Cout,Cin,K,K), spatially flipped.
    w_flip = jnp.transpose(weight_iohw, (1, 0, 2, 3))[:, :, ::-1, ::-1]
    pad = k - 1 - PADDING
    conv = lax.conv_general_dilated(
        x_nchw.astype(jnp.float32), w_flip.astype(jnp.float32),
        window_strides=(1, 1),
        padding=((pad, pad), (pad, pad)),
        lhs_dilation=(STRIDE, STRIDE),
        dimension_numbers=("NCHW", "OIHW", "NCHW"))
    mean = jnp.mean(conv, axis=(0, 2, 3), keepdims=True)
    var = jnp.mean((conv - mean) ** 2, axis=(0, 2, 3), keepdims=True)
    y = (conv - mean) * lax.rsqrt(var + BN_EPS)
    y = y * gamma.reshape(1, -1, 1, 1) + beta.reshape(1, -1, 1, 1)
    return jnp.maximum(y, 0.0)


if __name__ == "__main__":
    key = jax.random.PRNGKey(0)
    k_x, k_w, k_g, k_b = jax.random.split(key, 4)

    N, C_IN, H, W = 2, 4, 16, 16
    C_OUT = 8

    x = jax.random.normal(k_x, (N, C_IN, H, W), dtype=jnp.float32)
    # PyTorch ConvTranspose2d weight layout: (Cin, Cout, K, K)
    weight = 0.1 * jax.random.normal(
        k_w, (C_IN, C_OUT, KERNEL_SIZE, KERNEL_SIZE), dtype=jnp.float32)
    gamma = 1.0 + 0.1 * jax.random.normal(k_g, (C_OUT,), dtype=jnp.float32)
    beta = 0.1 * jax.random.normal(k_b, (C_OUT,), dtype=jnp.float32)

    out = jax.block_until_ready(decoder_block_forward(x, weight, gamma, beta))

    HO = _out_size(H)
    assert out.shape == (N, C_OUT, HO, HO), out.shape

    ref = jax.block_until_ready(_reference(x, weight, gamma, beta))
    # bf16 MXU inputs (f32 accumulation) set the comparison tolerance.
    err = float(jnp.max(jnp.abs(out - ref)))
    assert err < 5e-2, f"mismatch vs reference: max abs err = {err}"

    print("KERNEL_OK")
</pallas_src>

<mosaic_0001>
module attributes {stable_mosaic.version = 11 : i64} {
  func.func @_fused_kernel(%arg0: i32, %arg1: i32, %arg2: i32, %arg3: memref<1x128x512xbf16, #tpu.memory_space<vmem>>, %arg4: memref<1x8x128xbf16, #tpu.memory_space<vmem>>, %arg5: memref<8x1xf32, #tpu.memory_space<vmem>>, %arg6: memref<8x1xf32, #tpu.memory_space<vmem>>, %arg7: memref<1x8x512xf32, #tpu.memory_space<vmem>>, %arg8: memref<8x1xf32, #tpu.memory_space<vmem>>, %arg9: memref<8x1xf32, #tpu.memory_space<vmem>>, %arg10: memref<8x1xf32, #tpu.memory_space<vmem>>, %arg11: memref<8x1xf32, #tpu.memory_space<vmem>>, %arg12: memref<8x1xf32, #tpu.memory_space<vmem>>) attributes {dimension_semantics = [#tpu.dimension_semantics<arbitrary>, #tpu.dimension_semantics<arbitrary>, #tpu.dimension_semantics<arbitrary>], iteration_bounds = array<i64: 2, 4, 1>, scalar_prefetch = 0 : i64, scratch_operands = 5 : i64, tpu.core_type = #tpu.core_type<tc>, window_params = [{transform_indices = @transform_0, window_bounds = array<i64: 1, 128, 512>}, {transform_indices = @transform_1, window_bounds = array<i64: 1, 8, 128>}, {pipeline_mode = #tpu.pipeline_mode<synchronous>, transform_indices = @transform_2, window_bounds = array<i64: 8, 1>}, {pipeline_mode = #tpu.pipeline_mode<synchronous>, transform_indices = @transform_3, window_bounds = array<i64: 8, 1>}, {transform_indices = @transform_4, window_bounds = array<i64: 1, 8, 512>}]} {
    %c0_i32 = arith.constant 0 : i32
    %0 = arith.cmpi eq, %arg1, %c0_i32 : i32
    %c0_i32_0 = arith.constant 0 : i32
    %1 = arith.cmpi eq, %arg2, %c0_i32_0 : i32
    %2 = arith.andi %0, %1 : i1
    %c0 = arith.constant 0 : index
    %c0_1 = arith.constant 0 : index
    %c0_2 = arith.constant 0 : index
    %3 = vector.load %arg4[%c0, %c0_1, %c0_2] : memref<1x8x128xbf16, #tpu.memory_space<vmem>>, vector<1x8x128xbf16>
    %4 = vector.shape_cast %3 : vector<1x8x128xbf16> to vector<8x128xbf16>
    %c0_3 = arith.constant 0 : index
    %c0_4 = arith.constant 0 : index
    %c0_5 = arith.constant 0 : index
    %5 = vector.load %arg3[%c0_3, %c0_4, %c0_5] : memref<1x128x512xbf16, #tpu.memory_space<vmem>>, vector<1x128x512xbf16>
    %6 = vector.shape_cast %5 : vector<1x128x512xbf16> to vector<128x512xbf16>
    %cst = arith.constant dense<0.000000e+00> : vector<8x512xf32>
    %7 = tpu.matmul %4, %6, %cst {dimension_numbers = #tpu.dot_dimension_numbers<[1], [0], [0], [1], [0, 0, 1, 1], [], []>} : vector<8x128xbf16>, vector<128x512xbf16>, vector<8x512xf32> -> vector<8x512xf32>
    %c0_i32_6 = arith.constant 0 : i32
    %8 = arith.cmpi eq, %arg0, %c0_i32_6 : i32
    %9 = arith.extui %8 : i1 to i32
    %c0_i32_7 = arith.constant 0 : i32
    %10 = arith.cmpi ne, %9, %c0_i32_7 : i32
    scf.if %10 {
      %cst_9 = arith.constant dense<0.000000e+00> : vector<8xf32>
      %14 = vector.multi_reduction <add>, %7, %cst_9 [1] : vector<8x512xf32> to vector<8xf32>
      %15 = vector.shape_cast %14 : vector<8xf32> to vector<8x1xf32>
      %16 = arith.extui %2 : i1 to i32
      %c0_i32_10 = arith.constant 0 : i32
      %17 = arith.cmpi ne, %16, %c0_i32_10 : i32
      scf.if %17 {
        %cst_22 = arith.constant 0.001953125 : f32
        %30 = vector.broadcast %cst_22 : f32 to vector<8x1xf32>
        %31 = arith.mulf %15, %30 : vector<8x1xf32>
        %c0_23 = arith.constant 0 : index
        %c0_24 = arith.constant 0 : index
        %32 = vector.load %arg10[%c0_23, %c0_24] : memref<8x1xf32, #tpu.memory_space<vmem>>, vector<8x1xf32>
        tpu.vector_store %arg10[%c0_23, %c0_24], %31 {strides = array<i32>} : memref<8x1xf32, #tpu.memory_space<vmem>>, vector<8x1xf32>,
        %cst_25 = arith.constant 0.000000e+00 : f32
        %33 = vector.broadcast %cst_25 : f32 to vector<8x1xf32>
        %c0_26 = arith.constant 0 : index
        %c0_27 = arith.constant 0 : index
        %34 = vector.load %arg8[%c0_26, %c0_27] : memref<8x1xf32, #tpu.memory_space<vmem>>, vector<8x1xf32>
        tpu.vector_store %arg8[%c0_26, %c0_27], %33 {strides = array<i32>} : memref<8x1xf32, #tpu.memory_space<vmem>>, vector<8x1xf32>,
        %cst_28 = arith.constant 0.000000e+00 : f32
        %35 = vector.broadcast %cst_28 : f32 to vector<8x1xf32>
        %c0_29 = arith.constant 0 : index
        %c0_30 = arith.constant 0 : index
        %36 = vector.load %arg9[%c0_29, %c0_30] : memref<8x1xf32, #tpu.memory_space<vmem>>, vector<8x1xf32>
        tpu.vector_store %arg9[%c0_29, %c0_30], %35 {strides = array<i32>} : memref<8x1xf32, #tpu.memory_space<vmem>>, vector<8x1xf32>,
      } else {
      }
      %c0_11 = arith.constant 0 : index
      %c0_12 = arith.constant 0 : index
      %18 = vector.load %arg10[%c0_11, %c0_12] : memref<8x1xf32, #tpu.memory_space<vmem>>, vector<8x1xf32>
      %19 = vector.broadcast %18 : vector<8x1xf32> to vector<8x512xf32>
      %20 = arith.subf %7, %19 : vector<8x512xf32>
      %c0_13 = arith.constant 0 : index
      %c0_14 = arith.constant 0 : index
      %21 = vector.load %arg8[%c0_13, %c0_14] : memref<8x1xf32, #tpu.memory_space<vmem>>, vector<8x1xf32>
      %22 = arith.addf %21, %15 : vector<8x1xf32>
      %c0_15 = arith.constant 0 : index
      %c0_16 = arith.constant 0 : index
      %23 = vector.load %arg8[%c0_15, %c0_16] : memref<8x1xf32, #tpu.memory_space<vmem>>, vector<8x1xf32>
      tpu.vector_store %arg8[%c0_15, %c0_16], %22 {strides = array<i32>} : memref<8x1xf32, #tpu.memory_space<vmem>>, vector<8x1xf32>,
      %c0_17 = arith.constant 0 : index
      %c0_18 = arith.constant 0 : index
      %24 = vector.load %arg9[%c0_17, %c0_18] : memref<8x1xf32, #tpu.memory_space<vmem>>, vector<8x1xf32>
      %25 = arith.mulf %20, %20 : vector<8x512xf32>
      %cst_19 = arith.constant dense<0.000000e+00> : vector<8xf32>
      %26 = vector.multi_reduction <add>, %25, %cst_19 [1] : vector<8x512xf32> to vector<8xf32>
      %27 = vector.shape_cast %26 : vector<8xf32> to vector<8x1xf32>
      %28 = arith.addf %24, %27 : vector<8x1xf32>
      %c0_20 = arith.constant 0 : index
      %c0_21 = arith.constant 0 : index
      %29 = vector.load %arg9[%c0_20, %c0_21] : memref<8x1xf32, #tpu.memory_space<vmem>>, vector<8x1xf32>
      tpu.vector_store %arg9[%c0_20, %c0_21], %28 {strides = array<i32>} : memref<8x1xf32, #tpu.memory_space<vmem>>, vector<8x1xf32>,
    } else {
    }
    %c1_i32 = arith.constant 1 : i32
    %11 = arith.cmpi eq, %arg0, %c1_i32 : i32
    %12 = arith.extui %11 : i1 to i32
    %c0_i32_8 = arith.constant 0 : i32
    %13 = arith.cmpi ne, %12, %c0_i32_8 : i32
    scf.if %13 {
      %14 = arith.extui %2 : i1 to i32
      %c0_i32_9 = arith.constant 0 : i32
      %15 = arith.cmpi ne, %14, %c0_i32_9 : i32
      scf.if %15 {
        %c0_18 = arith.constant 0 : index
        %c0_19 = arith.constant 0 : index
        %27 = vector.load %arg10[%c0_18, %c0_19] : memref<8x1xf32, #tpu.memory_space<vmem>>, vector<8x1xf32>
        %c0_20 = arith.constant 0 : index
        %c0_21 = arith.constant 0 : index
        %28 = vector.load %arg8[%c0_20, %c0_21] : memref<8x1xf32, #tpu.memory_space<vmem>>, vector<8x1xf32>
        %cst_22 = arith.constant 5.20291389E-4 : f32
        %29 = vector.broadcast %cst_22 : f32 to vector<8x1xf32>
        %30 = arith.mulf %28, %29 : vector<8x1xf32>
        %c0_23 = arith.constant 0 : index
        %c0_24 = arith.constant 0 : index
        %31 = vector.load %arg9[%c0_23, %c0_24] : memref<8x1xf32, #tpu.memory_space<vmem>>, vector<8x1xf32>
        %32 = arith.mulf %27, %27 : vector<8x1xf32>
        %cst_25 = arith.constant 1.260000e+02 : f32
        %33 = vector.broadcast %cst_25 : f32 to vector<8x1xf32>
        %34 = arith.mulf %33, %32 : vector<8x1xf32>
        %35 = arith.subf %31, %34 : vector<8x1xf32>
        %36 = arith.subf %30, %27 : vector<8x1xf32>
        %cst_26 = arith.constant 5.20291389E-4 : f32
        %37 = vector.broadcast %cst_26 : f32 to vector<8x1xf32>
        %38 = arith.mulf %35, %37 : vector<8x1xf32>
        %39 = arith.mulf %36, %36 : vector<8x1xf32>
        %40 = arith.subf %38, %39 : vector<8x1xf32>
        %cst_27 = arith.constant 0.000000e+00 : f32
        %41 = vector.broadcast %cst_27 : f32 to vector<8x1xf32>
        %42 = arith.maximumf %40, %41 : vector<8x1xf32>
        %c0_28 = arith.constant 0 : index
        %c0_29 = arith.constant 0 : index
        %43 = vector.load %arg5[%c0_28, %c0_29] : memref<8x1xf32, #tpu.memory_space<vmem>>, vector<8x1xf32>
        %cst_30 = arith.constant 9.99999974E-6 : f32
        %44 = vector.broadcast %cst_30 : f32 to vector<8x1xf32>
        %45 = arith.addf %42, %44 : vector<8x1xf32>
        %46 = math.rsqrt %45 : vector<8x1xf32>
        %47 = arith.mulf %43, %46 : vector<8x1xf32>
        %c0_31 = arith.constant 0 : index
        %c0_32 = arith.constant 0 : index
        %48 = vector.load %arg11[%c0_31, %c0_32] : memref<8x1xf32, #tpu.memory_space<vmem>>, vector<8x1xf32>
        tpu.vector_store %arg11[%c0_31, %c0_32], %47 {strides = array<i32>} : memref<8x1xf32, #tpu.memory_space<vmem>>, vector<8x1xf32>,
        %c0_33 = arith.constant 0 : index
        %c0_34 = arith.constant 0 : index
        %49 = vector.load %arg6[%c0_33, %c0_34] : memref<8x1xf32, #tpu.memory_space<vmem>>, vector<8x1xf32>
        %50 = arith.mulf %30, %47 : vector<8x1xf32>
        %51 = arith.subf %49, %50 : vector<8x1xf32>
        %c0_35 = arith.constant 0 : index
        %c0_36 = arith.constant 0 : index
        %52 = vector.load %arg12[%c0_35, %c0_36] : memref<8x1xf32, #tpu.memory_space<vmem>>, vector<8x1xf32>
        tpu.vector_store %arg12[%c0_35, %c0_36], %51 {strides = array<i32>} : memref<8x1xf32, #tpu.memory_space<vmem>>, vector<8x1xf32>,
      } else {
      }
      %c0_10 = arith.constant 0 : index
      %c0_11 = arith.constant 0 : index
      %16 = vector.load %arg11[%c0_10, %c0_11] : memref<8x1xf32, #tpu.memory_space<vmem>>, vector<8x1xf32>
      %17 = vector.broadcast %16 : vector<8x1xf32> to vector<8x512xf32>
      %18 = arith.mulf %7, %17 : vector<8x512xf32>
      %c0_12 = arith.constant 0 : index
      %c0_13 = arith.constant 0 : index
      %19 = vector.load %arg12[%c0_12, %c0_13] : memref<8x1xf32, #tpu.memory_space<vmem>>, vector<8x1xf32>
      %20 = vector.broadcast %19 : vector<8x1xf32> to vector<8x512xf32>
      %21 = arith.addf %18, %20 : vector<8x512xf32>
      %cst_14 = arith.constant 0.000000e+00 : f32
      %22 = vector.broadcast %cst_14 : f32 to vector<8x512xf32>
      %23 = arith.maximumf %21, %22 : vector<8x512xf32>
      %c0_15 = arith.constant 0 : index
      %c0_16 = arith.constant 0 : index
      %c0_17 = arith.constant 0 : index
      %24 = vector.load %arg7[%c0_15, %c0_16, %c0_17] : memref<1x8x512xf32, #tpu.memory_space<vmem>>, vector<1x8x512xf32>
      %25 = vector.shape_cast %24 : vector<1x8x512xf32> to vector<8x512xf32>
      %26 = vector.shape_cast %23 : vector<8x512xf32> to vector<1x8x512xf32>
      tpu.vector_store %arg7[%c0_15, %c0_16, %c0_17], %26 {strides = array<i32>} : memref<1x8x512xf32, #tpu.memory_space<vmem>>, vector<1x8x512xf32>,
    } else {
    }
    return
  }
  func.func @transform_0(%arg0: i32, %arg1: i32, %arg2: i32) -> (i32, i32, i32) {
    %c0_i32 = arith.constant 0 : i32
    %c0_i32_0 = arith.constant 0 : i32
    return %arg1, %c0_i32, %arg2 : i32, i32, i32
  }
  func.func @transform_1(%arg0: i32, %arg1: i32, %arg2: i32) -> (i32, i32, i32) {
    %c0_i32 = arith.constant 0 : i32
    %c0_i32_0 = arith.constant 0 : i32
    %c0_i32_1 = arith.constant 0 : i32
    return %arg1, %c0_i32, %c0_i32_0 : i32, i32, i32
  }
  func.func @transform_2(%arg0: i32, %arg1: i32, %arg2: i32) -> (i32, i32) {
    %c0_i32 = arith.constant 0 : i32
    %c0_i32_0 = arith.constant 0 : i32
    %c0_i32_1 = arith.constant 0 : i32
    return %c0_i32, %c0_i32_0 : i32, i32
  }
  func.func @transform_3(%arg0: i32, %arg1: i32, %arg2: i32) -> (i32, i32) {
    %c0_i32 = arith.constant 0 : i32
    %c0_i32_0 = arith.constant 0 : i32
    %c0_i32_1 = arith.constant 0 : i32
    return %c0_i32, %c0_i32_0 : i32, i32
  }
  func.func @transform_4(%arg0: i32, %arg1: i32, %arg2: i32) -> (i32, i32, i32) {
    %0 = arith.muli %arg0, %arg1 : i32
    %1 = arith.muli %arg0, %arg2 : i32
    %c0_i32 = arith.constant 0 : i32
    %c0_i32_0 = arith.constant 0 : i32
    return %0, %c0_i32, %1 : i32, i32, i32
  }
}

</mosaic_0001>

<bundles_post_ra>
// kernel: squeeze.54
= control target key start
LH: loop header
LB: loop body
LE: loop exit
PB: predicated region body
PF: predicated region fallthrough
CT: control target
= control target key end

     0   :  { %vm79_vm0 = vcmask 1047556   ;;  %s579_s14 = smov 112   ;;  %s580_s10 = smov 96   ;;  %vm3_vm1 = vcmask 130048   ;;  %s1160_s0 = inlined_call_operand.vmem [shape: f32[1,8,512], index: 0, kind: input, shape index: {}]   ;;  %s1161_s1 = inlined_call_operand.vmem [shape: f32[8,2,16,16], index: 1, kind: output, shape index: {}]  }
   0x1   :  { %v474_v0 = vld [vmem:[%s1160_s0 + $0x4] ss:$8 sm:$0xf]   ;;  %v475_v1 = vld [vmem:[%s1160_s0 - $0x1b] ss:$8 sm:$0xf0]  }
   0x2   :  { %v106_v2 = vsel %vm79_vm0, %v475_v1, %v474_v0  ;;  %v76_v3 = vld [vmem:[%s1160_s0] ss:$8 sm:$0xf]   ;;  %v467_v4 = vld [vmem:[%s1160_s0 - $0x1f] ss:$8 sm:$0xf0]  }
   0x3   :  { %107 = vrot.lane.b32.xlu1 %v106_v2, %s579_s14  ;;  %v80_v5 = vsel %vm79_vm0, %v467_v4, %v76_v3  ;;  %v478_v6 = vld [vmem:[%s1160_s0 + $0x6] ss:$8 sm:$0xf]   ;;  %v479_v7 = vld [vmem:[%s1160_s0 - $0x19] ss:$8 sm:$0xf0]  }
   0x4   :  { %81 = vrot.lane.b32.xlu0 %v80_v5, %s579_s14  ;;  %v119_v8 = vsel %vm79_vm0, %v479_v7, %v478_v6  ;;  %v470_v9 = vld [vmem:[%s1160_s0 + $0x2] ss:$8 sm:$0xf]   ;;  %v471_v10 = vld [vmem:[%s1160_s0 - $0x1d] ss:$8 sm:$0xf0]  }
   0x5   :  { %v93_v11 = vsel %vm79_vm0, %v471_v10, %v470_v9  ;;  %v485_v12 = vld [vmem:[%s1160_s0 + $0x2] ss:$8 sm:$0xf]   ;;  %v486_v13 = vld [vmem:[%s1160_s0 - $0x1d] ss:$8 sm:$0xf0]  }
   0x6   :  { %v127_v14 = vld [vmem:[%s1160_s0] ss:$8 sm:$0xf]   ;;  %v482_v15 = vld [vmem:[%s1160_s0 - $0x1f] ss:$8 sm:$0xf0]   ;;  %v144_v16 = vsel %vm79_vm0, %v486_v13, %v485_v12 }
   0x7   :  { %120 = vrot.lane.b32.xlu1 %v119_v8, %s579_s14  ;;  %v131_v17 = vsel %vm79_vm0, %v482_v15, %v127_v14  ;;  %v493_v18 = vld [vmem:[%s1160_s0 + $0x6] ss:$8 sm:$0xf]   ;;  %v494_v19 = vld [vmem:[%s1160_s0 - $0x19] ss:$8 sm:$0xf0]  }
   0x8   :  { %94 = vrot.lane.b32.xlu0 %v93_v11, %s579_s14  ;;  %v489_v20 = vld [vmem:[%s1160_s0 + $0x4] ss:$8 sm:$0xf]   ;;  %v490_v21 = vld [vmem:[%s1160_s0 - $0x1b] ss:$8 sm:$0xf0]   ;;  %v170_v22 = vsel %vm79_vm0, %v494_v19, %v493_v18 }
   0x9   :  { %v157_v23 = vsel %vm79_vm0, %v490_v21, %v489_v20  ;;  %v500_v24 = vld [vmem:[%s1160_s0 + $0x2] ss:$8 sm:$0xf]   ;;  %v501_v25 = vld [vmem:[%s1160_s0 - $0x1d] ss:$8 sm:$0xf0]  }
   0xa   :  { %v178_v26 = vld [vmem:[%s1160_s0] ss:$8 sm:$0xf]   ;;  %v497_v27 = vld [vmem:[%s1160_s0 - $0x1f] ss:$8 sm:$0xf0]   ;;  %v195_v28 = vsel %vm79_vm0, %v501_v25, %v500_v24 }
   0xb   :  { %145 = vrot.lane.b32.xlu1 %v144_v16, %s580_s10  ;;  %v182_v29 = vsel %vm79_vm0, %v497_v27, %v178_v26  ;;  %v508_v30 = vld [vmem:[%s1160_s0 + $0x6] ss:$8 sm:$0xf]   ;;  %v509_v31 = vld [vmem:[%s1160_s0 - $0x19] ss:$8 sm:$0xf0]  }
   0xc   :  { %132 = vrot.lane.b32.xlu0 %v131_v17, %s580_s10  ;;  %v504_v32 = vld [vmem:[%s1160_s0 + $0x4] ss:$8 sm:$0xf]   ;;  %v505_v33 = vld [vmem:[%s1160_s0 - $0x1b] ss:$8 sm:$0xf0]   ;;  %v221_v34 = vsel %vm79_vm0, %v509_v31, %v508_v30 }
   0xd   :  { %s581_s27 = smov 80   ;;  %v208_v35 = vsel %vm79_vm0, %v505_v33, %v504_v32  ;;  %v515_v36 = vld [vmem:[%s1160_s0 + $0x2] ss:$8 sm:$0xf]   ;;  %s582_s15 = smov 64  }
   0xe   :  { %v516_v37 = vld [vmem:[%s1160_s0 - $0x1d] ss:$8 sm:$0xf0]   ;;  %v229_v38 = vld [vmem:[%s1160_s0] ss:$8 sm:$0xf]  }
   0xf   :  { %171 = vrot.lane.b32.xlu1 %v170_v22, %s580_s10  ;;  %v512_v39 = vld [vmem:[%s1160_s0 - $0x1f] ss:$8 sm:$0xf0]   ;;  %v246_v40 = vsel %vm79_vm0, %v516_v37, %v515_v36  ;;  %v523_v42 = vld [vmem:[%s1160_s0 + $0x6] ss:$8 sm:$0xf]  }
  0x10   :  { %158 = vrot.lane.b32.xlu0 %v157_v23, %s580_s10  ;;  %v233_v41 = vsel %vm79_vm0, %v512_v39, %v229_v38  ;;  %v524_v43 = vld [vmem:[%s1160_s0 - $0x19] ss:$8 sm:$0xf0]   ;;  %v519_v44 = vld [vmem:[%s1160_s0 + $0x4] ss:$8 sm:$0xf]  }
  0x11   :  { %v520_v45 = vld [vmem:[%s1160_s0 - $0x1b] ss:$8 sm:$0xf0]   ;;  %v272_v46 = vsel %vm79_vm0, %v524_v43, %v523_v42  ;;  %v530_v48 = vld [vmem:[%s1160_s0 + $0x2] ss:$8 sm:$0xf]  }
  0x12   :  { %v259_v47 = vsel %vm79_vm0, %v520_v45, %v519_v44  ;;  %v531_v49 = vld [vmem:[%s1160_s0 - $0x1d] ss:$8 sm:$0xf0]   ;;  %v280_v50 = vld [vmem:[%s1160_s0] ss:$8 sm:$0xf]  }
  0x13   :  { %196 = vrot.lane.b32.xlu1 %v195_v28, %s581_s27  ;;  %v527_v51 = vld [vmem:[%s1160_s0 - $0x1f] ss:$8 sm:$0xf0]   ;;  %v297_v52 = vsel %vm79_vm0, %v531_v49, %v530_v48  ;;  %v538_v54 = vld [vmem:[%s1160_s0 + $0x6] ss:$8 sm:$0xf]  }
  0x14   :  { %183 = vrot.lane.b32.xlu0 %v182_v29, %s581_s27  ;;  %v284_v53 = vsel %vm79_vm0, %v527_v51, %v280_v50  ;;  %v539_v55 = vld [vmem:[%s1160_s0 - $0x19] ss:$8 sm:$0xf0]   ;;  %v534_v56 = vld [vmem:[%s1160_s0 + $0x4] ss:$8 sm:$0xf]  }
  0x15   :  { %v535_v57 = vld [vmem:[%s1160_s0 - $0x1b] ss:$8 sm:$0xf0]   ;;  %s583_s3 = smov 48   ;;  %v323_v58 = vsel %vm79_vm0, %v539_v55, %v538_v54  ;;  %s584_s26 = smov 32  }
  0x16   :  { %v310_v59 = vsel %vm79_vm0, %v535_v57, %v534_v56  ;;  %v545_v60 = vld [vmem:[%s1160_s0 + $0x2] ss:$8 sm:$0xf]   ;;  %v546_v61 = vld [vmem:[%s1160_s0 - $0x1d] ss:$8 sm:$0xf0]  }
  0x17   :  { %222 = vrot.lane.b32.xlu1 %v221_v34, %s581_s27  ;;  %v331_v62 = vld [vmem:[%s1160_s0] ss:$8 sm:$0xf]   ;;  %v542_v63 = vld [vmem:[%s1160_s0 - $0x1f] ss:$8 sm:$0xf0]   ;;  %v348_v0 = vsel %vm79_vm0, %v546_v61, %v545_v60 }
  0x18   :  { %209 = vrot.lane.b32.xlu0 %v208_v35, %s581_s27  ;;  %v553_v1 = vld [vmem:[%s1160_s0 + $0x6] ss:$8 sm:$0xf]   ;;  %v554_v2 = vld [vmem:[%s1160_s0 - $0x19] ss:$8 sm:$0xf0]   ;;  %v335_v3 = vsel %vm79_vm0, %v542_v63, %v331_v62 }
  0x19   :  { %v549_v4 = vld [vmem:[%s1160_s0 + $0x4] ss:$8 sm:$0xf]   ;;  %v550_v5 = vld [vmem:[%s1160_s0 - $0x1b] ss:$8 sm:$0xf0]   ;;  %v374_v10 = vsel %vm79_vm0, %v554_v2, %v553_v1 }
  0x1a   :  { %v2_v6 = vld [vmem:[%s1160_s0] sm:$0xff]   ;;  %v440_v7 = vld [vmem:[%s1160_s0 + $0x8] sm:$0xff]   ;;  %v449_v8 = vld [vmem:[%s1160_s0 + $0x10] sm:$0xff]   ;;  %v361_v11 = vsel %vm79_vm0, %v550_v5, %v549_v4 }
  0x1b   :  { %247 = vrot.lane.b32.xlu1 %v246_v40, %s582_s15  ;;  %4 = vst.msk [vmem:[%s1161_s1] sm:$0x1] %vm3_vm1, %v2_v6   ;;  %433 = vst.msk [vmem:[%s1161_s1 + $0x1f] sm:$0x2] %vm3_vm1, %v2_v6   ;;  %v458_v9 = vld [vmem:[%s1160_s0 + $0x18] sm:$0xff]  }
  0x1c   :  { %234 = vrot.lane.b32.xlu0 %v233_v41, %s582_s15  ;;  %434 = vst.msk [vmem:[%s1161_s1 + $0x3e] sm:$0x4] %vm3_vm1, %v2_v6   ;;  %435 = vst.msk [vmem:[%s1161_s1 + $0x5d] sm:$0x8] %vm3_vm1, %v2_v6  }
  0x1d   :  { %436 = vst.msk [vmem:[%s1161_s1 + $0x7c] sm:$0x10] %vm3_vm1, %v2_v6   ;;  %437 = vst.msk [vmem:[%s1161_s1 + $0x9b] sm:$0x20] %vm3_vm1, %v2_v6  }
  0x1e   :  { %438 = vst.msk [vmem:[%s1161_s1 + $0xba] sm:$0x40] %vm3_vm1, %v2_v6   ;;  %439 = vst.msk [vmem:[%s1161_s1 + $0xd9] sm:$0x80] %vm3_vm1, %v2_v6  }
  0x1f   :  { %273 = vrot.lane.b32.xlu1 %v272_v46, %s582_s15  ;;  %441 = vst.msk [vmem:[%s1161_s1 + $0x8] sm:$0x1] %vm3_vm1, %v440_v7   ;;  %442 = vst.msk [vmem:[%s1161_s1 + $0x27] sm:$0x2] %vm3_vm1, %v440_v7  }
  0x20   :  { %260 = vrot.lane.b32.xlu0 %v259_v47, %s582_s15  ;;  %443 = vst.msk [vmem:[%s1161_s1 + $0x46] sm:$0x4] %vm3_vm1, %v440_v7   ;;  %444 = vst.msk [vmem:[%s1161_s1 + $0x65] sm:$0x8] %vm3_vm1, %v440_v7  }
  0x21   :  { %445 = vst.msk [vmem:[%s1161_s1 + $0x84] sm:$0x10] %vm3_vm1, %v440_v7   ;;  %446 = vst.msk [vmem:[%s1161_s1 + $0xa3] sm:$0x20] %vm3_vm1, %v440_v7  }
  0x22   :  { %447 = vst.msk [vmem:[%s1161_s1 + $0xc2] sm:$0x40] %vm3_vm1, %v440_v7   ;;  %448 = vst.msk [vmem:[%s1161_s1 + $0xe1] sm:$0x80] %vm3_vm1, %v440_v7  }
  0x23   :  { %298 = vrot.lane.b32.xlu1 %v297_v52, %s583_s3  ;;  %450 = vst.msk [vmem:[%s1161_s1 + $0x10] sm:$0x1] %vm3_vm1, %v449_v8   ;;  %451 = vst.msk [vmem:[%s1161_s1 + $0x2f] sm:$0x2] %vm3_vm1, %v449_v8  }
  0x24   :  { %285 = vrot.lane.b32.xlu0 %v284_v53, %s583_s3  ;;  %452 = vst.msk [vmem:[%s1161_s1 + $0x4e] sm:$0x4] %vm3_vm1, %v449_v8   ;;  %453 = vst.msk [vmem:[%s1161_s1 + $0x6d] sm:$0x8] %vm3_vm1, %v449_v8  }
  0x25   :  { %454 = vst.msk [vmem:[%s1161_s1 + $0x8c] sm:$0x10] %vm3_vm1, %v449_v8   ;;  %455 = vst.msk [vmem:[%s1161_s1 + $0xab] sm:$0x20] %vm3_vm1, %v449_v8  }
  0x26   :  { %456 = vst.msk [vmem:[%s1161_s1 + $0xca] sm:$0x40] %vm3_vm1, %v449_v8   ;;  %457 = vst.msk [vmem:[%s1161_s1 + $0xe9] sm:$0x80] %vm3_vm1, %v449_v8  }
  0x27   :  { %324 = vrot.lane.b32.xlu1 %v323_v58, %s583_s3  ;;  %459 = vst.msk [vmem:[%s1161_s1 + $0x18] sm:$0x1] %vm3_vm1, %v458_v9   ;;  %460 = vst.msk [vmem:[%s1161_s1 + $0x37] sm:$0x2] %vm3_vm1, %v458_v9  }
  0x28   :  { %311 = vrot.lane.b32.xlu0 %v310_v59, %s583_s3  ;;  %461 = vst.msk [vmem:[%s1161_s1 + $0x56] sm:$0x4] %vm3_vm1, %v458_v9   ;;  %462 = vst.msk [vmem:[%s1161_s1 + $0x75] sm:$0x8] %vm3_vm1, %v458_v9  }
  0x29   :  { %463 = vst.msk [vmem:[%s1161_s1 + $0x94] sm:$0x10] %vm3_vm1, %v458_v9   ;;  %464 = vst.msk [vmem:[%s1161_s1 + $0xb3] sm:$0x20] %vm3_vm1, %v458_v9  }
  0x2a   :  { %465 = vst.msk [vmem:[%s1161_s1 + $0xd2] sm:$0x40] %vm3_vm1, %v458_v9   ;;  %466 = vst.msk [vmem:[%s1161_s1 + $0xf1] sm:$0x80] %vm3_vm1, %v458_v9  }
  0x2b   :  { %349 = vrot.lane.b32.xlu1 %v348_v0, %s584_s26  ;;  %v560_v12 = vld [vmem:[%s1160_s0 + $0x2] ss:$8 sm:$0xf]   ;;  %v561_v13 = vld [vmem:[%s1160_s0 - $0x1d] ss:$8 sm:$0xf0]  }
  0x2c   :  { %336 = vrot.lane.b32.xlu0 %v335_v3, %s584_s26  ;;  %v382_v14 = vld [vmem:[%s1160_s0] ss:$8 sm:$0xf]   ;;  %v557_v15 = vld [vmem:[%s1160_s0 - $0x1f] ss:$8 sm:$0xf0]   ;;  %v399_v16 = vsel %vm79_vm0, %v561_v13, %v560_v12 }
  0x2d   :  { %v386_v17 = vsel %vm79_vm0, %v557_v15, %v382_v14  ;;  %v568_v18 = vld [vmem:[%s1160_s0 + $0x6] ss:$8 sm:$0xf]   ;;  %v569_v19 = vld [vmem:[%s1160_s0 - $0x19] ss:$8 sm:$0xf0]  }
  0x2e   :  { %v564_v20 = vld [vmem:[%s1160_s0 + $0x4] ss:$8 sm:$0xf]   ;;  %v565_v21 = vld [vmem:[%s1160_s0 - $0x1b] ss:$8 sm:$0xf0]   ;;  %v425_v22 = vsel %vm79_vm0, %v569_v19, %v568_v18 }
  0x2f   :  { %375 = vrot.lane.b32.xlu1 %v374_v10, %s584_s26  ;;  %s585_s0 = smov 16   ;;  %v412_v23 = vsel %vm79_vm0, %v565_v21, %v564_v20 }
  0x30   :  { %362 = vrot.lane.b32.xlu0 %v361_v11, %s584_s26 }
  0x33   :  { %400 = vrot.lane.b32.xlu1 %v399_v16, %s585_s0 }
  0x34   :  { %387 = vrot.lane.b32.xlu0 %v386_v17, %s585_s0 }
  0x37   :  { %426 = vrot.lane.b32.xlu1 %v425_v22, %s585_s0 }
  0x38   :  { %413 = vrot.lane.b32.xlu0 %v412_v23, %s585_s0 }
  0x75   :  { %v108_v24 = vpop.permute.xlu1 %107  }
  0x76   :  { %476 = vst.msk [vmem:[%s1161_s1 + $0x81] ss:$8 sm:$0xf] %vm3_vm1, %v108_v24   ;;  %477 = vst.msk [vmem:[%s1161_s1 + $0x81] ss:$8 sm:$0xf0] %vm3_vm1, %v108_v24   ;;  %v82_v25 = vpop.permute.xlu0 %81  }
  0x77   :  { %468 = vst.msk [vmem:[%s1161_s1 + $0x1] ss:$8 sm:$0xf] %vm3_vm1, %v82_v25   ;;  %469 = vst.msk [vmem:[%s1161_s1 + $0x1] ss:$8 sm:$0xf0] %vm3_vm1, %v82_v25  }
  0x79   :  { %v121_v26 = vpop.permute.xlu1 %120  }
  0x7a   :  { %480 = vst.msk [vmem:[%s1161_s1 + $0xc1] ss:$8 sm:$0xf] %vm3_vm1, %v121_v26   ;;  %481 = vst.msk [vmem:[%s1161_s1 + $0xc1] ss:$8 sm:$0xf0] %vm3_vm1, %v121_v26   ;;  %v95_v27 = vpop.permute.xlu0 %94  }
  0x7b   :  { %472 = vst.msk [vmem:[%s1161_s1 + $0x41] ss:$8 sm:$0xf] %vm3_vm1, %v95_v27   ;;  %473 = vst.msk [vmem:[%s1161_s1 + $0x41] ss:$8 sm:$0xf0] %vm3_vm1, %v95_v27  }
  0x7d   :  { %v146_v28 = vpop.permute.xlu1 %145  }
  0x7e   :  { %487 = vst.msk [vmem:[%s1161_s1 + $0x42] ss:$8 sm:$0xf] %vm3_vm1, %v146_v28   ;;  %488 = vst.msk [vmem:[%s1161_s1 + $0x42] ss:$8 sm:$0xf0] %vm3_vm1, %v146_v28   ;;  %v133_v29 = vpop.permute.xlu0 %132  }
  0x7f   :  { %483 = vst.msk [vmem:[%s1161_s1 + $0x2] ss:$8 sm:$0xf] %vm3_vm1, %v133_v29   ;;  %484 = vst.msk [vmem:[%s1161_s1 + $0x2] ss:$8 sm:$0xf0] %vm3_vm1, %v133_v29  }
  0x81   :  { %v172_v30 = vpop.permute.xlu1 %171  }
  0x82   :  { %495 = vst.msk [vmem:[%s1161_s1 + $0xc2] ss:$8 sm:$0xf] %vm3_vm1, %v172_v30   ;;  %496 = vst.msk [vmem:[%s1161_s1 + $0xc2] ss:$8 sm:$0xf0] %vm3_vm1, %v172_v30   ;;  %v159_v31 = vpop.permute.xlu0 %158  }
  0x83   :  { %491 = vst.msk [vmem:[%s1161_s1 + $0x82] ss:$8 sm:$0xf] %vm3_vm1, %v159_v31   ;;  %492 = vst.msk [vmem:[%s1161_s1 + $0x82] ss:$8 sm:$0xf0] %vm3_vm1, %v159_v31  }
  0x85   :  { %v197_v32 = vpop.permute.xlu1 %196  }
  0x86   :  { %502 = vst.msk [vmem:[%s1161_s1 + $0x43] ss:$8 sm:$0xf] %vm3_vm1, %v197_v32   ;;  %503 = vst.msk [vmem:[%s1161_s1 + $0x43] ss:$8 sm:$0xf0] %vm3_vm1, %v197_v32   ;;  %v184_v33 = vpop.permute.xlu0 %183  }
  0x87   :  { %498 = vst.msk [vmem:[%s1161_s1 + $0x3] ss:$8 sm:$0xf] %vm3_vm1, %v184_v33   ;;  %499 = vst.msk [vmem:[%s1161_s1 + $0x3] ss:$8 sm:$0xf0] %vm3_vm1, %v184_v33  }
  0x89   :  { %v223_v34 = vpop.permute.xlu1 %222  }
  0x8a   :  { %510 = vst.msk [vmem:[%s1161_s1 + $0xc3] ss:$8 sm:$0xf] %vm3_vm1, %v223_v34   ;;  %511 = vst.msk [vmem:[%s1161_s1 + $0xc3] ss:$8 sm:$0xf0] %vm3_vm1, %v223_v34   ;;  %v210_v35 = vpop.permute.xlu0 %209  }
  0x8b   :  { %506 = vst.msk [vmem:[%s1161_s1 + $0x83] ss:$8 sm:$0xf] %vm3_vm1, %v210_v35   ;;  %507 = vst.msk [vmem:[%s1161_s1 + $0x83] ss:$8 sm:$0xf0] %vm3_vm1, %v210_v35  }
  0x8d   :  { %v248_v36 = vpop.permute.xlu1 %247  }
  0x8e   :  { %517 = vst.msk [vmem:[%s1161_s1 + $0x44] ss:$8 sm:$0xf] %vm3_vm1, %v248_v36   ;;  %518 = vst.msk [vmem:[%s1161_s1 + $0x44] ss:$8 sm:$0xf0] %vm3_vm1, %v248_v36   ;;  %v235_v37 = vpop.permute.xlu0 %234  }
  0x8f   :  { %513 = vst.msk [vmem:[%s1161_s1 + $0x4] ss:$8 sm:$0xf] %vm3_vm1, %v235_v37   ;;  %514 = vst.msk [vmem:[%s1161_s1 + $0x4] ss:$8 sm:$0xf0] %vm3_vm1, %v235_v37  }
  0x91   :  { %v274_v38 = vpop.permute.xlu1 %273  }
  0x92   :  { %525 = vst.msk [vmem:[%s1161_s1 + $0xc4] ss:$8 sm:$0xf] %vm3_vm1, %v274_v38   ;;  %526 = vst.msk [vmem:[%s1161_s1 + $0xc4] ss:$8 sm:$0xf0] %vm3_vm1, %v274_v38   ;;  %v261_v39 = vpop.permute.xlu0 %260  }
  0x93   :  { %521 = vst.msk [vmem:[%s1161_s1 + $0x84] ss:$8 sm:$0xf] %vm3_vm1, %v261_v39   ;;  %522 = vst.msk [vmem:[%s1161_s1 + $0x84] ss:$8 sm:$0xf0] %vm3_vm1, %v261_v39  }
  0x95   :  { %v299_v40 = vpop.permute.xlu1 %298  }
  0x96   :  { %532 = vst.msk [vmem:[%s1161_s1 + $0x45] ss:$8 sm:$0xf] %vm3_vm1, %v299_v40   ;;  %533 = vst.msk [vmem:[%s1161_s1 + $0x45] ss:$8 sm:$0xf0] %vm3_vm1, %v299_v40   ;;  %v286_v41 = vpop.permute.xlu0 %285  }
  0x97   :  { %528 = vst.msk [vmem:[%s1161_s1 + $0x5] ss:$8 sm:$0xf] %vm3_vm1, %v286_v41   ;;  %529 = vst.msk [vmem:[%s1161_s1 + $0x5] ss:$8 sm:$0xf0] %vm3_vm1, %v286_v41  }
  0x99   :  { %v325_v42 = vpop.permute.xlu1 %324  }
  0x9a   :  { %540 = vst.msk [vmem:[%s1161_s1 + $0xc5] ss:$8 sm:$0xf] %vm3_vm1, %v325_v42   ;;  %541 = vst.msk [vmem:[%s1161_s1 + $0xc5] ss:$8 sm:$0xf0] %vm3_vm1, %v325_v42   ;;  %v312_v43 = vpop.permute.xlu0 %311  }
  0x9b   :  { %536 = vst.msk [vmem:[%s1161_s1 + $0x85] ss:$8 sm:$0xf] %vm3_vm1, %v312_v43   ;;  %537 = vst.msk [vmem:[%s1161_s1 + $0x85] ss:$8 sm:$0xf0] %vm3_vm1, %v312_v43  }
  0x9d   :  { %v350_v44 = vpop.permute.xlu1 %349  }
  0x9e   :  { %547 = vst.msk [vmem:[%s1161_s1 + $0x46] ss:$8 sm:$0xf] %vm3_vm1, %v350_v44   ;;  %548 = vst.msk [vmem:[%s1161_s1 + $0x46] ss:$8 sm:$0xf0] %vm3_vm1, %v350_v44   ;;  %v337_v45 = vpop.permute.xlu0 %336  }
  0x9f   :  { %543 = vst.msk [vmem:[%s1161_s1 + $0x6] ss:$8 sm:$0xf] %vm3_vm1, %v337_v45   ;;  %544 = vst.msk [vmem:[%s1161_s1 + $0x6] ss:$8 sm:$0xf0] %vm3_vm1, %v337_v45  }
  0xa1   :  { %v376_v46 = vpop.permute.xlu1 %375  }
  0xa2   :  { %555 = vst.msk [vmem:[%s1161_s1 + $0xc6] ss:$8 sm:$0xf] %vm3_vm1, %v376_v46   ;;  %556 = vst.msk [vmem:[%s1161_s1 + $0xc6] ss:$8 sm:$0xf0] %vm3_vm1, %v376_v46   ;;  %v363_v47 = vpop.permute.xlu0 %362  }
  0xa3   :  { %551 = vst.msk [vmem:[%s1161_s1 + $0x86] ss:$8 sm:$0xf] %vm3_vm1, %v363_v47   ;;  %552 = vst.msk [vmem:[%s1161_s1 + $0x86] ss:$8 sm:$0xf0] %vm3_vm1, %v363_v47  }
  0xa5   :  { %v401_v48 = vpop.permute.xlu1 %400  }
  0xa6   :  { %562 = vst.msk [vmem:[%s1161_s1 + $0x47] ss:$8 sm:$0xf] %vm3_vm1, %v401_v48   ;;  %563 = vst.msk [vmem:[%s1161_s1 + $0x47] ss:$8 sm:$0xf0] %vm3_vm1, %v401_v48   ;;  %v388_v49 = vpop.permute.xlu0 %387  }
  0xa7   :  { %558 = vst.msk [vmem:[%s1161_s1 + $0x7] ss:$8 sm:$0xf] %vm3_vm1, %v388_v49   ;;  %559 = vst.msk [vmem:[%s1161_s1 + $0x7] ss:$8 sm:$0xf0] %vm3_vm1, %v388_v49  }
  0xa9   :  { %v427_v50 = vpop.permute.xlu1 %426  }
  0xaa   :  { %570 = vst.msk [vmem:[%s1161_s1 + $0xc7] ss:$8 sm:$0xf] %vm3_vm1, %v427_v50   ;;  %571 = vst.msk [vmem:[%s1161_s1 + $0xc7] ss:$8 sm:$0xf0] %vm3_vm1, %v427_v50   ;;  %v414_v51 = vpop.permute.xlu0 %413  }
  0xab   :  { %566 = vst.msk [vmem:[%s1161_s1 + $0x87] ss:$8 sm:$0xf] %vm3_vm1, %v414_v51   ;;  %567 = vst.msk [vmem:[%s1161_s1 + $0x87] ss:$8 sm:$0xf0] %vm3_vm1, %v414_v51  }

// kernel: squeeze.55
= control target key start
LH: loop header
LB: loop body
LE: loop exit
PB: predicated region body
PF: predicated region fallthrough
CT: control target
= control target key end

     0   :  { %vm604_vm0 = vcmask 973824   ;;  %vm645_vm1 = vcmask 982016   ;;  %s1061_s10 = smov 122   ;;  %vm3_vm2 = vcmask 121856   ;;  %s1062_s13 = smov 9   ;;  %vm687_vm3 = vcmask 1039360   ;;  %s2285_s0 = inlined_call_operand.vmem [shape: f32[1,8,480], index: 0, kind: input, shape index: {}]   ;;  %s2286_s1 = inlined_call_operand.vmem [shape: f32[8,2,16,15], index: 1, kind: output, shape index: {}]  }
   0x1   :  { %v1105_v0 = vld [vmem:[%s2285_s0 + $0x18] sm:$0xff]   ;;  %v1110_v1 = vld [vmem:[%s2285_s0 + $0x10] sm:$0xff]   ;;  %v1118_v3 = vld [vmem:[%s2285_s0] sm:$0xff]   ;;  %s1063_s2 = smov 121   ;;  %s1064_s3 = smov 8   ;;  %vm608_vm4 = vcmask 72704  }
   0x2   :  { %21 = vrot.lane.b32.xlu0 %v1105_v0, %s1061_s10  ;;  %v605_v2 = vsel %vm604_vm0, %v1105_v0, %v1110_v1  ;;  %v1123_v4 = vld [vmem:[%s2285_s0 + $0x8] sm:$0xff]   ;;  %4 = vst.msk [vmem:[%s2286_s1] sm:$0x1] %vm3_vm2, %v1118_v3   ;;  %725 = vst.msk [vmem:[%s2286_s1 + $0x1f] sm:$0x2] %vm3_vm2, %v1118_v3   ;;  %s1065_s4 = smov 1  }
   0x3   :  { %606 = vrot.lane.b32.xlu1 %v605_v2, %s1062_s13  ;;  %726 = vst.msk [vmem:[%s2286_s1 + $0x3e] sm:$0x4] %vm3_vm2, %v1118_v3   ;;  %727 = vst.msk [vmem:[%s2286_s1 + $0x5d] sm:$0x8] %vm3_vm2, %v1118_v3   ;;  %v646_v5 = vsel %vm645_vm1, %v1123_v4, %v1118_v3  ;;  %v688_v6 = vsel %vm687_vm3, %v1110_v1, %v1123_v4  ;;  %s1066_s5 = smov 114   ;;  %s1067_s6 = smov 113  }
   0x4   :  { %728 = vst.msk [vmem:[%s2286_s1 + $0x7c] sm:$0x10] %vm3_vm2, %v1118_v3   ;;  %729 = vst.msk [vmem:[%s2286_s1 + $0x9b] sm:$0x20] %vm3_vm2, %v1118_v3   ;;  %s1068_s7 = smov 107   ;;  %s1069_s8 = smov 106  }
   0x5   :  { %730 = vst.msk [vmem:[%s2286_s1 + $0xba] sm:$0x40] %vm3_vm2, %v1118_v3   ;;  %731 = vst.msk [vmem:[%s2286_s1 + $0xd9] sm:$0x80] %vm3_vm2, %v1118_v3   ;;  %s1070_s9 = smov 99   ;;  %s1071_s10 = smov 98  }
   0x6   :  { %42 = vrot.lane.b32.xlu0 %v1123_v4, %s1063_s2  ;;  %s1072_s11 = smov 92   ;;  %s1073_s12 = smov 91   ;;  %vm625_vm5 = vcmask 121928   ;;  %vm649_vm6 = vcmask 64512   ;;  %vm666_vm7 = vcmask 121920   ;;  %vm691_vm8 = vcmask 7168  }
   0x7   :  { %647 = vrot.lane.b32.xlu1 %v646_v5, %s1064_s3  ;;  %s1074_s13 = smov 84   ;;  %s1075_s14 = smov 83   ;;  %vm708_vm9 = vcmask 121864  }
   0x8   :  { %s1076_s15 = smov 77   ;;  %s1077_s0 = smov 76  }
   0x9   :  { %s1078_s16 = smov 69   ;;  %s1079_s17 = smov 68  }
   0xa   :  { %689 = vrot.lane.b32.xlu0 %v688_v6, %s1065_s4  ;;  %s1080_s18 = smov 62   ;;  %s1081_s19 = smov 61  }
   0xb   :  { %63 = vrot.lane.b32.xlu1 %v1110_v1, %s1066_s5  ;;  %s1082_s20 = smov 54   ;;  %s1083_s21 = smov 53  }
   0xc   :  { %s1084_s22 = smov 47   ;;  %s1085_s23 = smov 46  }
   0xd   :  { %s1086_s24 = smov 39   ;;  %s1087_s25 = smov 38  }
   0xe   :  { %83 = vrot.lane.b32.xlu0 %v1118_v3, %s1067_s6  ;;  %s1088_s26 = smov 31   ;;  %s1089_s27 = smov 24  }
   0xf   :  { %104 = vrot.lane.b32.xlu1 %v1105_v0, %s1068_s7  ;;  %s1090_s28 = smov 23   ;;  %s1091_s29 = smov 16  }
  0x12   :  { %125 = vrot.lane.b32.xlu0 %v1123_v4, %s1069_s8 }
  0x13   :  { %146 = vrot.lane.b32.xlu1 %v1110_v1, %s1070_s9 }
  0x16   :  { %166 = vrot.lane.b32.xlu0 %v1118_v3, %s1071_s10 }
  0x17   :  { %187 = vrot.lane.b32.xlu1 %v1105_v0, %s1072_s11 }
  0x1a   :  { %208 = vrot.lane.b32.xlu0 %v1123_v4, %s1073_s12 }
  0x1b   :  { %229 = vrot.lane.b32.xlu1 %v1110_v1, %s1074_s13 }
  0x1e   :  { %249 = vrot.lane.b32.xlu0 %v1118_v3, %s1075_s14 }
  0x1f   :  { %270 = vrot.lane.b32.xlu1 %v1105_v0, %s1076_s15 }
  0x22   :  { %291 = vrot.lane.b32.xlu0 %v1123_v4, %s1077_s0 }
  0x23   :  { %312 = vrot.lane.b32.xlu1 %v1110_v1, %s1078_s16 }
  0x26   :  { %332 = vrot.lane.b32.xlu0 %v1118_v3, %s1079_s17 }
  0x27   :  { %353 = vrot.lane.b32.xlu1 %v1105_v0, %s1080_s18 }
  0x2a   :  { %374 = vrot.lane.b32.xlu0 %v1123_v4, %s1081_s19 }
  0x2b   :  { %395 = vrot.lane.b32.xlu1 %v1110_v1, %s1082_s20 }
  0x2e   :  { %415 = vrot.lane.b32.xlu0 %v1118_v3, %s1083_s21 }
  0x2f   :  { %436 = vrot.lane.b32.xlu1 %v1105_v0, %s1084_s22 }
  0x32   :  { %457 = vrot.lane.b32.xlu0 %v1123_v4, %s1085_s23 }
  0x33   :  { %478 = vrot.lane.b32.xlu1 %v1110_v1, %s1086_s24 }
  0x36   :  { %498 = vrot.lane.b32.xlu0 %v1118_v3, %s1087_s25 }
  0x37   :  { %519 = vrot.lane.b32.xlu1 %v1123_v4, %s1088_s26 }
  0x3a   :  { %540 = vrot.lane.b32.xlu0 %v1110_v1, %s1089_s27 }
  0x3b   :  { %560 = vrot.lane.b32.xlu1 %v1118_v3, %s1090_s28 }
  0x3e   :  { %581 = vrot.lane.b32.xlu0 %v1123_v4, %s1091_s29 }
  0x74   :  { %v22_v7 = vpop.permute.xlu0 %21  }
  0x75   :  { %733 = vst.msk [vmem:[%s2286_s1 + $0x1a] sm:$0x1] %vm3_vm2, %v22_v7   ;;  %734 = vst.msk [vmem:[%s2286_s1 + $0x39] sm:$0x2] %vm3_vm2, %v22_v7   ;;  %v607_v8 = vpop.permute.xlu1 %606  }
  0x76   :  { %735 = vst.msk [vmem:[%s2286_s1 + $0x58] sm:$0x4] %vm3_vm2, %v22_v7   ;;  %736 = vst.msk [vmem:[%s2286_s1 + $0x77] sm:$0x8] %vm3_vm2, %v22_v7  }
  0x77   :  { %737 = vst.msk [vmem:[%s2286_s1 + $0x96] sm:$0x10] %vm3_vm2, %v22_v7   ;;  %738 = vst.msk [vmem:[%s2286_s1 + $0xb5] sm:$0x20] %vm3_vm2, %v22_v7  }
  0x78   :  { %739 = vst.msk [vmem:[%s2286_s1 + $0xd4] sm:$0x40] %vm3_vm2, %v22_v7   ;;  %740 = vst.msk [vmem:[%s2286_s1 + $0xf3] sm:$0x80] %vm3_vm2, %v22_v7   ;;  %v43_v9 = vpop.permute.xlu0 %42  }
  0x79   :  { %979 = vst.msk [vmem:[%s2286_s1 + $0x19] sm:$0x1] %vm608_vm4, %v607_v8   ;;  %980 = vst.msk [vmem:[%s2286_s1 + $0x38] sm:$0x2] %vm608_vm4, %v607_v8   ;;  %v648_v10 = vpop.permute.xlu1 %647  }
  0x7a   :  { %981 = vst.msk [vmem:[%s2286_s1 + $0x57] sm:$0x4] %vm608_vm4, %v607_v8   ;;  %982 = vst.msk [vmem:[%s2286_s1 + $0x76] sm:$0x8] %vm608_vm4, %v607_v8  }
  0x7b   :  { %983 = vst.msk [vmem:[%s2286_s1 + $0x95] sm:$0x10] %vm608_vm4, %v607_v8   ;;  %984 = vst.msk [vmem:[%s2286_s1 + $0xb4] sm:$0x20] %vm608_vm4, %v607_v8  }
  0x7c   :  { %985 = vst.msk [vmem:[%s2286_s1 + $0xd3] sm:$0x40] %vm608_vm4, %v607_v8   ;;  %986 = vst.msk [vmem:[%s2286_s1 + $0xf2] sm:$0x80] %vm608_vm4, %v607_v8   ;;  %v690_v11 = vpop.permute.xlu0 %689  }
  0x7d   :  { %987 = vst.msk [vmem:[%s2286_s1 + $0x19] sm:$0x1] %vm625_vm5, %v607_v8   ;;  %988 = vst.msk [vmem:[%s2286_s1 + $0x38] sm:$0x2] %vm625_vm5, %v607_v8   ;;  %v64_v12 = vpop.permute.xlu1 %63  }
  0x7e   :  { %989 = vst.msk [vmem:[%s2286_s1 + $0x57] sm:$0x4] %vm625_vm5, %v607_v8   ;;  %990 = vst.msk [vmem:[%s2286_s1 + $0x76] sm:$0x8] %vm625_vm5, %v607_v8  }
  0x7f   :  { %991 = vst.msk [vmem:[%s2286_s1 + $0x95] sm:$0x10] %vm625_vm5, %v607_v8   ;;  %992 = vst.msk [vmem:[%s2286_s1 + $0xb4] sm:$0x20] %vm625_vm5, %v607_v8  }
  0x80   :  { %993 = vst.msk [vmem:[%s2286_s1 + $0xd3] sm:$0x40] %vm625_vm5, %v607_v8   ;;  %994 = vst.msk [vmem:[%s2286_s1 + $0xf2] sm:$0x80] %vm625_vm5, %v607_v8   ;;  %v84_v13 = vpop.permute.xlu0 %83  }
  0x81   :  { %742 = vst.msk [vmem:[%s2286_s1 + $0x9] sm:$0x1] %vm3_vm2, %v43_v9   ;;  %743 = vst.msk [vmem:[%s2286_s1 + $0x28] sm:$0x2] %vm3_vm2, %v43_v9   ;;  %v105_v14 = vpop.permute.xlu1 %104  }
  0x82   :  { %744 = vst.msk [vmem:[%s2286_s1 + $0x47] sm:$0x4] %vm3_vm2, %v43_v9   ;;  %745 = vst.msk [vmem:[%s2286_s1 + $0x66] sm:$0x8] %vm3_vm2, %v43_v9  }
  0x83   :  { %746 = vst.msk [vmem:[%s2286_s1 + $0x85] sm:$0x10] %vm3_vm2, %v43_v9   ;;  %747 = vst.msk [vmem:[%s2286_s1 + $0xa4] sm:$0x20] %vm3_vm2, %v43_v9  }
  0x84   :  { %748 = vst.msk [vmem:[%s2286_s1 + $0xc3] sm:$0x40] %vm3_vm2, %v43_v9   ;;  %749 = vst.msk [vmem:[%s2286_s1 + $0xe2] sm:$0x80] %vm3_vm2, %v43_v9   ;;  %v126_v15 = vpop.permute.xlu0 %125  }
  0x85   :  { %996 = vst.msk [vmem:[%s2286_s1 + $0x8] sm:$0x1] %vm649_vm6, %v648_v10   ;;  %997 = vst.msk [vmem:[%s2286_s1 + $0x27] sm:$0x2] %vm649_vm6, %v648_v10   ;;  %v147_v16 = vpop.permute.xlu1 %146  }
  0x86   :  { %998 = vst.msk [vmem:[%s2286_s1 + $0x46] sm:$0x4] %vm649_vm6, %v648_v10   ;;  %999 = vst.msk [vmem:[%s2286_s1 + $0x65] sm:$0x8] %vm649_vm6, %v648_v10  }
  0x87   :  { %1000 = vst.msk [vmem:[%s2286_s1 + $0x84] sm:$0x10] %vm649_vm6, %v648_v10   ;;  %1001 = vst.msk [vmem:[%s2286_s1 + $0xa3] sm:$0x20] %vm649_vm6, %v648_v10  }
  0x88   :  { %1002 = vst.msk [vmem:[%s2286_s1 + $0xc2] sm:$0x40] %vm649_vm6, %v648_v10   ;;  %1003 = vst.msk [vmem:[%s2286_s1 + $0xe1] sm:$0x80] %vm649_vm6, %v648_v10   ;;  %v167_v17 = vpop.permute.xlu0 %166  }
  0x89   :  { %1004 = vst.msk [vmem:[%s2286_s1 + $0x8] sm:$0x1] %vm666_vm7, %v648_v10   ;;  %1005 = vst.msk [vmem:[%s2286_s1 + $0x27] sm:$0x2] %vm666_vm7, %v648_v10   ;;  %v188_v18 = vpop.permute.xlu1 %187  }
  0x8a   :  { %1006 = vst.msk [vmem:[%s2286_s1 + $0x46] sm:$0x4] %vm666_vm7, %v648_v10   ;;  %1007 = vst.msk [vmem:[%s2286_s1 + $0x65] sm:$0x8] %vm666_vm7, %v648_v10  }
  0x8b   :  { %1008 = vst.msk [vmem:[%s2286_s1 + $0x84] sm:$0x10] %vm666_vm7, %v648_v10   ;;  %1009 = vst.msk [vmem:[%s2286_s1 + $0xa3] sm:$0x20] %vm666_vm7, %v648_v10  }
  0x8c   :  { %1010 = vst.msk [vmem:[%s2286_s1 + $0xc2] sm:$0x40] %vm666_vm7, %v648_v10   ;;  %1011 = vst.msk [vmem:[%s2286_s1 + $0xe1] sm:$0x80] %vm666_vm7, %v648_v10   ;;  %v209_v19 = vpop.permute.xlu0 %208  }
  0x8d   :  { %1014 = vst.msk [vmem:[%s2286_s1 + $0x11] sm:$0x1] %vm691_vm8, %v690_v11   ;;  %1015 = vst.msk [vmem:[%s2286_s1 + $0x30] sm:$0x2] %vm691_vm8, %v690_v11   ;;  %v230_v20 = vpop.permute.xlu1 %229  }
  0x8e   :  { %1016 = vst.msk [vmem:[%s2286_s1 + $0x4f] sm:$0x4] %vm691_vm8, %v690_v11   ;;  %1017 = vst.msk [vmem:[%s2286_s1 + $0x6e] sm:$0x8] %vm691_vm8, %v690_v11  }
  0x8f   :  { %1018 = vst.msk [vmem:[%s2286_s1 + $0x8d] sm:$0x10] %vm691_vm8, %v690_v11   ;;  %1019 = vst.msk [vmem:[%s2286_s1 + $0xac] sm:$0x20] %vm691_vm8, %v690_v11  }
  0x90   :  { %1020 = vst.msk [vmem:[%s2286_s1 + $0xcb] sm:$0x40] %vm691_vm8, %v690_v11   ;;  %1021 = vst.msk [vmem:[%s2286_s1 + $0xea] sm:$0x80] %vm691_vm8, %v690_v11   ;;  %v250_v21 = vpop.permute.xlu0 %249  }
  0x91   :  { %1022 = vst.msk [vmem:[%s2286_s1 + $0x11] sm:$0x1] %vm708_vm9, %v690_v11   ;;  %1023 = vst.msk [vmem:[%s2286_s1 + $0x30] sm:$0x2] %vm708_vm9, %v690_v11   ;;  %v271_v22 = vpop.permute.xlu1 %270  }
  0x92   :  { %1024 = vst.msk [vmem:[%s2286_s1 + $0x4f] sm:$0x4] %vm708_vm9, %v690_v11   ;;  %1025 = vst.msk [vmem:[%s2286_s1 + $0x6e] sm:$0x8] %vm708_vm9, %v690_v11  }
  0x93   :  { %1026 = vst.msk [vmem:[%s2286_s1 + $0x8d] sm:$0x10] %vm708_vm9, %v690_v11   ;;  %1027 = vst.msk [vmem:[%s2286_s1 + $0xac] sm:$0x20] %vm708_vm9, %v690_v11  }
  0x94   :  { %1028 = vst.msk [vmem:[%s2286_s1 + $0xcb] sm:$0x40] %vm708_vm9, %v690_v11   ;;  %1029 = vst.msk [vmem:[%s2286_s1 + $0xea] sm:$0x80] %vm708_vm9, %v690_v11   ;;  %v292_v23 = vpop.permute.xlu0 %291  }
  0x95   :  { %751 = vst.msk [vmem:[%s2286_s1 + $0x12] sm:$0x1] %vm3_vm2, %v64_v12   ;;  %752 = vst.msk [vmem:[%s2286_s1 + $0x31] sm:$0x2] %vm3_vm2, %v64_v12   ;;  %v313_v24 = vpop.permute.xlu1 %312  }
  0x96   :  { %753 = vst.msk [vmem:[%s2286_s1 + $0x50] sm:$0x4] %vm3_vm2, %v64_v12   ;;  %754 = vst.msk [vmem:[%s2286_s1 + $0x6f] sm:$0x8] %vm3_vm2, %v64_v12  }
  0x97   :  { %755 = vst.msk [vmem:[%s2286_s1 + $0x8e] sm:$0x10] %vm3_vm2, %v64_v12   ;;  %756 = vst.msk [vmem:[%s2286_s1 + $0xad] sm:$0x20] %vm3_vm2, %v64_v12  }
  0x98   :  { %757 = vst.msk [vmem:[%s2286_s1 + $0xcc] sm:$0x40] %vm3_vm2, %v64_v12   ;;  %758 = vst.msk [vmem:[%s2286_s1 + $0xeb] sm:$0x80] %vm3_vm2, %v64_v12   ;;  %v333_v25 = vpop.permute.xlu0 %332  }
  0x99   :  { %759 = vst.msk [vmem:[%s2286_s1 + $0x1] sm:$0x1] %vm3_vm2, %v84_v13   ;;  %760 = vst.msk [vmem:[%s2286_s1 + $0x20] sm:$0x2] %vm3_vm2, %v84_v13   ;;  %v354_v26 = vpop.permute.xlu1 %353  }
  0x9a   :  { %761 = vst.msk [vmem:[%s2286_s1 + $0x3f] sm:$0x4] %vm3_vm2, %v84_v13   ;;  %762 = vst.msk [vmem:[%s2286_s1 + $0x5e] sm:$0x8] %vm3_vm2, %v84_v13  }
  0x9b   :  { %763 = vst.msk [vmem:[%s2286_s1 + $0x7d] sm:$0x10] %vm3_vm2, %v84_v13   ;;  %764 = vst.msk [vmem:[%s2286_s1 + $0x9c] sm:$0x20] %vm3_vm2, %v84_v13  }
  0x9c   :  { %765 = vst.msk [vmem:[%s2286_s1 + $0xbb] sm:$0x40] %vm3_vm2, %v84_v13   ;;  %766 = vst.msk [vmem:[%s2286_s1 + $0xda] sm:$0x80] %vm3_vm2, %v84_v13   ;;  %v375_v27 = vpop.permute.xlu0 %374  }
  0x9d   :  { %768 = vst.msk [vmem:[%s2286_s1 + $0x1b] sm:$0x1] %vm3_vm2, %v105_v14   ;;  %769 = vst.msk [vmem:[%s2286_s1 + $0x3a] sm:$0x2] %vm3_vm2, %v105_v14   ;;  %v396_v28 = vpop.permute.xlu1 %395  }
  0x9e   :  { %770 = vst.msk [vmem:[%s2286_s1 + $0x59] sm:$0x4] %vm3_vm2, %v105_v14   ;;  %771 = vst.msk [vmem:[%s2286_s1 + $0x78] sm:$0x8] %vm3_vm2, %v105_v14  }
  0x9f   :  { %772 = vst.msk [vmem:[%s2286_s1 + $0x97] sm:$0x10] %vm3_vm2, %v105_v14   ;;  %773 = vst.msk [vmem:[%s2286_s1 + $0xb6] sm:$0x20] %vm3_vm2, %v105_v14  }
  0xa0   :  { %774 = vst.msk [vmem:[%s2286_s1 + $0xd5] sm:$0x40] %vm3_vm2, %v105_v14   ;;  %775 = vst.msk [vmem:[%s2286_s1 + $0xf4] sm:$0x80] %vm3_vm2, %v105_v14   ;;  %v416_v29 = vpop.permute.xlu0 %415  }
  0xa1   :  { %777 = vst.msk [vmem:[%s2286_s1 + $0xa] sm:$0x1] %vm3_vm2, %v126_v15   ;;  %778 = vst.msk [vmem:[%s2286_s1 + $0x29] sm:$0x2] %vm3_vm2, %v126_v15   ;;  %v437_v30 = vpop.permute.xlu1 %436  }
  0xa2   :  { %779 = vst.msk [vmem:[%s2286_s1 + $0x48] sm:$0x4] %vm3_vm2, %v126_v15   ;;  %780 = vst.msk [vmem:[%s2286_s1 + $0x67] sm:$0x8] %vm3_vm2, %v126_v15  }
  0xa3   :  { %781 = vst.msk [vmem:[%s2286_s1 + $0x86] sm:$0x10] %vm3_vm2, %v126_v15   ;;  %782 = vst.msk [vmem:[%s2286_s1 + $0xa5] sm:$0x20] %vm3_vm2, %v126_v15  }
  0xa4   :  { %783 = vst.msk [vmem:[%s2286_s1 + $0xc4] sm:$0x40] %vm3_vm2, %v126_v15   ;;  %784 = vst.msk [vmem:[%s2286_s1 + $0xe3] sm:$0x80] %vm3_vm2, %v126_v15   ;;  %v458_v31 = vpop.permute.xlu0 %457  }
  0xa5   :  { %786 = vst.msk [vmem:[%s2286_s1 + $0x13] sm:$0x1] %vm3_vm2, %v147_v16   ;;  %787 = vst.msk [vmem:[%s2286_s1 + $0x32] sm:$0x2] %vm3_vm2, %v147_v16   ;;  %v479_v32 = vpop.permute.xlu1 %478  }
  0xa6   :  { %788 = vst.msk [vmem:[%s2286_s1 + $0x51] sm:$0x4] %vm3_vm2, %v147_v16   ;;  %789 = vst.msk [vmem:[%s2286_s1 + $0x70] sm:$0x8] %vm3_vm2, %v147_v16  }
  0xa7   :  { %790 = vst.msk [vmem:[%s2286_s1 + $0x8f] sm:$0x10] %vm3_vm2, %v147_v16   ;;  %791 = vst.msk [vmem:[%s2286_s1 + $0xae] sm:$0x20] %vm3_vm2, %v147_v16  }
  0xa8   :  { %792 = vst.msk [vmem:[%s2286_s1 + $0xcd] sm:$0x40] %vm3_vm2, %v147_v16   ;;  %793 = vst.msk [vmem:[%s2286_s1 + $0xec] sm:$0x80] %vm3_vm2, %v147_v16   ;;  %v499_v33 = vpop.permute.xlu0 %498  }
  0xa9   :  { %794 = vst.msk [vmem:[%s2286_s1 + $0x2] sm:$0x1] %vm3_vm2, %v167_v17   ;;  %795 = vst.msk [vmem:[%s2286_s1 + $0x21] sm:$0x2] %vm3_vm2, %v167_v17   ;;  %v520_v34 = vpop.permute.xlu1 %519  }
  0xaa   :  { %796 = vst.msk [vmem:[%s2286_s1 + $0x40] sm:$0x4] %vm3_vm2, %v167_v17   ;;  %797 = vst.msk [vmem:[%s2286_s1 + $0x5f] sm:$0x8] %vm3_vm2, %v167_v17  }
  0xab   :  { %798 = vst.msk [vmem:[%s2286_s1 + $0x7e] sm:$0x10] %vm3_vm2, %v167_v17   ;;  %799 = vst.msk [vmem:[%s2286_s1 + $0x9d] sm:$0x20] %vm3_vm2, %v167_v17  }
  0xac   :  { %800 = vst.msk [vmem:[%s2286_s1 + $0xbc] sm:$0x40] %vm3_vm2, %v167_v17   ;;  %801 = vst.msk [vmem:[%s2286_s1 + $0xdb] sm:$0x80] %vm3_vm2, %v167_v17   ;;  %v541_v35 = vpop.permute.xlu0 %540  }
  0xad   :  { %803 = vst.msk [vmem:[%s2286_s1 + $0x1c] sm:$0x1] %vm3_vm2, %v188_v18   ;;  %804 = vst.msk [vmem:[%s2286_s1 + $0x3b] sm:$0x2] %vm3_vm2, %v188_v18   ;;  %v561_v36 = vpop.permute.xlu1 %560  }
  0xae   :  { %805 = vst.msk [vmem:[%s2286_s1 + $0x5a] sm:$0x4] %vm3_vm2, %v188_v18   ;;  %806 = vst.msk [vmem:[%s2286_s1 + $0x79] sm:$0x8] %vm3_vm2, %v188_v18  }
  0xaf   :  { %807 = vst.msk [vmem:[%s2286_s1 + $0x98] sm:$0x10] %vm3_vm2, %v188_v18   ;;  %808 = vst.msk [vmem:[%s2286_s1 + $0xb7] sm:$0x20] %vm3_vm2, %v188_v18  }
  0xb0   :  { %809 = vst.msk [vmem:[%s2286_s1 + $0xd6] sm:$0x40] %vm3_vm2, %v188_v18   ;;  %810 = vst.msk [vmem:[%s2286_s1 + $0xf5] sm:$0x80] %vm3_vm2, %v188_v18   ;;  %v582_v37 = vpop.permute.xlu0 %581  }
  0xb1   :  { %812 = vst.msk [vmem:[%s2286_s1 + $0xb] sm:$0x1] %vm3_vm2, %v209_v19   ;;  %813 = vst.msk [vmem:[%s2286_s1 + $0x2a] sm:$0x2] %vm3_vm2, %v209_v19  }
  0xb2   :  { %814 = vst.msk [vmem:[%s2286_s1 + $0x49] sm:$0x4] %vm3_vm2, %v209_v19   ;;  %815 = vst.msk [vmem:[%s2286_s1 + $0x68] sm:$0x8] %vm3_vm2, %v209_v19  }
  0xb3   :  { %816 = vst.msk [vmem:[%s2286_s1 + $0x87] sm:$0x10] %vm3_vm2, %v209_v19   ;;  %817 = vst.msk [vmem:[%s2286_s1 + $0xa6] sm:$0x20] %vm3_vm2, %v209_v19  }
  0xb4   :  { %818 = vst.msk [vmem:[%s2286_s1 + $0xc5] sm:$0x40] %vm3_vm2, %v209_v19   ;;  %819 = vst.msk [vmem:[%s2286_s1 + $0xe4] sm:$0x80] %vm3_vm2, %v209_v19  }
  0xb5   :  { %821 = vst.msk [vmem:[%s2286_s1 + $0x14] sm:$0x1] %vm3_vm2, %v230_v20   ;;  %822 = vst.msk [vmem:[%s2286_s1 + $0x33] sm:$0x2] %vm3_vm2, %v230_v20  }
  0xb6   :  { %823 = vst.msk [vmem:[%s2286_s1 + $0x52] sm:$0x4] %vm3_vm2, %v230_v20   ;;  %824 = vst.msk [vmem:[%s2286_s1 + $0x71] sm:$0x8] %vm3_vm2, %v230_v20  }
  0xb7   :  { %825 = vst.msk [vmem:[%s2286_s1 + $0x90] sm:$0x10] %vm3_vm2, %v230_v20   ;;  %826 = vst.msk [vmem:[%s2286_s1 + $0xaf] sm:$0x20] %vm3_vm2, %v230_v20  }
  0xb8   :  { %827 = vst.msk [vmem:[%s2286_s1 + $0xce] sm:$0x40] %vm3_vm2, %v230_v20   ;;  %828 = vst.msk [vmem:[%s2286_s1 + $0xed] sm:$0x80] %vm3_vm2, %v230_v20  }
  0xb9   :  { %829 = vst.msk [vmem:[%s2286_s1 + $0x3] sm:$0x1] %vm3_vm2, %v250_v21   ;;  %830 = vst.msk [vmem:[%s2286_s1 + $0x22] sm:$0x2] %vm3_vm2, %v250_v21  }
  0xba   :  { %831 = vst.msk [vmem:[%s2286_s1 + $0x41] sm:$0x4] %vm3_vm2, %v250_v21   ;;  %832 = vst.msk [vmem:[%s2286_s1 + $0x60] sm:$0x8] %vm3_vm2, %v250_v21  }
  0xbb   :  { %833 = vst.msk [vmem:[%s2286_s1 + $0x7f] sm:$0x10] %vm3_vm2, %v250_v21   ;;  %834 = vst.msk [vmem:[%s2286_s1 + $0x9e] sm:$0x20] %vm3_vm2, %v250_v21  }
  0xbc   :  { %835 = vst.msk [vmem:[%s2286_s1 + $0xbd] sm:$0x40] %vm3_vm2, %v250_v21   ;;  %836 = vst.msk [vmem:[%s2286_s1 + $0xdc] sm:$0x80] %vm3_vm2, %v250_v21  }
  0xbd   :  { %838 = vst.msk [vmem:[%s2286_s1 + $0x1d] sm:$0x1] %vm3_vm2, %v271_v22   ;;  %839 = vst.msk [vmem:[%s2286_s1 + $0x3c] sm:$0x2] %vm3_vm2, %v271_v22  }
  0xbe   :  { %840 = vst.msk [vmem:[%s2286_s1 + $0x5b] sm:$0x4] %vm3_vm2, %v271_v22   ;;  %841 = vst.msk [vmem:[%s2286_s1 + $0x7a] sm:$0x8] %vm3_vm2, %v271_v22  }
  0xbf   :  { %842 = vst.msk [vmem:[%s2286_s1 + $0x99] sm:$0x10] %vm3_vm2, %v271_v22   ;;  %843 = vst.msk [vmem:[%s2286_s1 + $0xb8] sm:$0x20] %vm3_vm2, %v271_v22  }
  0xc0   :  { %844 = vst.msk [vmem:[%s2286_s1 + $0xd7] sm:$0x40] %vm3_vm2, %v271_v22   ;;  %845 = vst.msk [vmem:[%s2286_s1 + $0xf6] sm:$0x80] %vm3_vm2, %v271_v22  }
  0xc1   :  { %847 = vst.msk [vmem:[%s2286_s1 + $0xc] sm:$0x1] %vm3_vm2, %v292_v23   ;;  %848 = vst.msk [vmem:[%s2286_s1 + $0x2b] sm:$0x2] %vm3_vm2, %v292_v23  }
  0xc2   :  { %849 = vst.msk [vmem:[%s2286_s1 + $0x4a] sm:$0x4] %vm3_vm2, %v292_v23   ;;  %850 = vst.msk [vmem:[%s2286_s1 + $0x69] sm:$0x8] %vm3_vm2, %v292_v23  }
  0xc3   :  { %851 = vst.msk [vmem:[%s2286_s1 + $0x88] sm:$0x10] %vm3_vm2, %v292_v23   ;;  %852 = vst.msk [vmem:[%s2286_s1 + $0xa7] sm:$0x20] %vm3_vm2, %v292_v23  }
  0xc4   :  { %853 = vst.msk [vmem:[%s2286_s1 + $0xc6] sm:$0x40] %vm3_vm2, %v292_v23   ;;  %854 = vst.msk [vmem:[%s2286_s1 + $0xe5] sm:$0x80] %vm3_vm2, %v292_v23  }
  0xc5   :  { %856 = vst.msk [vmem:[%s2286_s1 + $0x15] sm:$0x1] %vm3_vm2, %v313_v24   ;;  %857 = vst.msk [vmem:[%s2286_s1 + $0x34] sm:$0x2] %vm3_vm2, %v313_v24  }
  0xc6   :  { %858 = vst.msk [vmem:[%s2286_s1 + $0x53] sm:$0x4] %vm3_vm2, %v313_v24   ;;  %859 = vst.msk [vmem:[%s2286_s1 + $0x72] sm:$0x8] %vm3_vm2, %v313_v24  }
  0xc7   :  { %860 = vst.msk [vmem:[%s2286_s1 + $0x91] sm:$0x10] %vm3_vm2, %v313_v24   ;;  %861 = vst.msk [vmem:[%s2286_s1 + $0xb0] sm:$0x20] %vm3_vm2, %v313_v24  }
  0xc8   :  { %862 = vst.msk [vmem:[%s2286_s1 + $0xcf] sm:$0x40] %vm3_vm2, %v313_v24   ;;  %863 = vst.msk [vmem:[%s2286_s1 + $0xee] sm:$0x80] %vm3_vm2, %v313_v24  }
  0xc9   :  { %864 = vst.msk [vmem:[%s2286_s1 + $0x4] sm:$0x1] %vm3_vm2, %v333_v25   ;;  %865 = vst.msk [vmem:[%s2286_s1 + $0x23] sm:$0x2] %vm3_vm2, %v333_v25  }
  0xca   :  { %866 = vst.msk [vmem:[%s2286_s1 + $0x42] sm:$0x4] %vm3_vm2, %v333_v25   ;;  %867 = vst.msk [vmem:[%s2286_s1 + $0x61] sm:$0x8] %vm3_vm2, %v333_v25  }
  0xcb   :  { %868 = vst.msk [vmem:[%s2286_s1 + $0x80] sm:$0x10] %vm3_vm2, %v333_v25   ;;  %869 = vst.msk [vmem:[%s2286_s1 + $0x9f] sm:$0x20] %vm3_vm2, %v333_v25  }
  0xcc   :  { %870 = vst.msk [vmem:[%s2286_s1 + $0xbe] sm:$0x40] %vm3_vm2, %v333_v25   ;;  %871 = vst.msk [vmem:[%s2286_s1 + $0xdd] sm:$0x80] %vm3_vm2, %v333_v25  }
  0xcd   :  { %873 = vst.msk [vmem:[%s2286_s1 + $0x1e] sm:$0x1] %vm3_vm2, %v354_v26   ;;  %874 = vst.msk [vmem:[%s2286_s1 + $0x3d] sm:$0x2] %vm3_vm2, %v354_v26  }
  0xce   :  { %875 = vst.msk [vmem:[%s2286_s1 + $0x5c] sm:$0x4] %vm3_vm2, %v354_v26   ;;  %876 = vst.msk [vmem:[%s2286_s1 + $0x7b] sm:$0x8] %vm3_vm2, %v354_v26  }
  0xcf   :  { %877 = vst.msk [vmem:[%s2286_s1 + $0x9a] sm:$0x10] %vm3_vm2, %v354_v26   ;;  %878 = vst.msk [vmem:[%s2286_s1 + $0xb9] sm:$0x20] %vm3_vm2, %v354_v26  }
  0xd0   :  { %879 = vst.msk [vmem:[%s2286_s1 + $0xd8] sm:$0x40] %vm3_vm2, %v354_v26   ;;  %880 = vst.msk [vmem:[%s2286_s1 + $0xf7] sm:$0x80] %vm3_vm2, %v354_v26  }
  0xd1   :  { %882 = vst.msk [vmem:[%s2286_s1 + $0xd] sm:$0x1] %vm3_vm2, %v375_v27   ;;  %883 = vst.msk [vmem:[%s2286_s1 + $0x2c] sm:$0x2] %vm3_vm2, %v375_v27  }
  0xd2   :  { %884 = vst.msk [vmem:[%s2286_s1 + $0x4b] sm:$0x4] %vm3_vm2, %v375_v27   ;;  %885 = vst.msk [vmem:[%s2286_s1 + $0x6a] sm:$0x8] %vm3_vm2, %v375_v27  }
  0xd3   :  { %886 = vst.msk [vmem:[%s2286_s1 + $0x89] sm:$0x10] %vm3_vm2, %v375_v27   ;;  %887 = vst.msk [vmem:[%s2286_s1 + $0xa8] sm:$0x20] %vm3_vm2, %v375_v27  }
  0xd4   :  { %888 = vst.msk [vmem:[%s2286_s1 + $0xc7] sm:$0x40] %vm3_vm2, %v375_v27   ;;  %889 = vst.msk [vmem:[%s2286_s1 + $0xe6] sm:$0x80] %vm3_vm2, %v375_v27  }
  0xd5   :  { %891 = vst.msk [vmem:[%s2286_s1 + $0x16] sm:$0x1] %vm3_vm2, %v396_v28   ;;  %892 = vst.msk [vmem:[%s2286_s1 + $0x35] sm:$0x2] %vm3_vm2, %v396_v28  }
  0xd6   :  { %893 = vst.msk [vmem:[%s2286_s1 + $0x54] sm:$0x4] %vm3_vm2, %v396_v28   ;;  %894 = vst.msk [vmem:[%s2286_s1 + $0x73] sm:$0x8] %vm3_vm2, %v396_v28  }
  0xd7   :  { %895 = vst.msk [vmem:[%s2286_s1 + $0x92] sm:$0x10] %vm3_vm2, %v396_v28   ;;  %896 = vst.msk [vmem:[%s2286_s1 + $0xb1] sm:$0x20] %vm3_vm2, %v396_v28  }
  0xd8   :  { %897 = vst.msk [vmem:[%s2286_s1 + $0xd0] sm:$0x40] %vm3_vm2, %v396_v28   ;;  %898 = vst.msk [vmem:[%s2286_s1 + $0xef] sm:$0x80] %vm3_vm2, %v396_v28  }
  0xd9   :  { %899 = vst.msk [vmem:[%s2286_s1 + $0x5] sm:$0x1] %vm3_vm2, %v416_v29   ;;  %900 = vst.msk [vmem:[%s2286_s1 + $0x24] sm:$0x2] %vm3_vm2, %v416_v29  }
  0xda   :  { %901 = vst.msk [vmem:[%s2286_s1 + $0x43] sm:$0x4] %vm3_vm2, %v416_v29   ;;  %902 = vst.msk [vmem:[%s2286_s1 + $0x62] sm:$0x8] %vm3_vm2, %v416_v29  }
  0xdb   :  { %903 = vst.msk [vmem:[%s2286_s1 + $0x81] sm:$0x10] %vm3_vm2, %v416_v29   ;;  %904 = vst.msk [vmem:[%s2286_s1 + $0xa0] sm:$0x20] %vm3_vm2, %v416_v29  }
  0xdc   :  { %905 = vst.msk [vmem:[%s2286_s1 + $0xbf] sm:$0x40] %vm3_vm2, %v416_v29   ;;  %906 = vst.msk [vmem:[%s2286_s1 + $0xde] sm:$0x80] %vm3_vm2, %v416_v29  }
  0xdd   :  { %908 = vst.msk [vmem:[%s2286_s1 + $0x1f] sm:$0x1] %vm3_vm2, %v437_v30   ;;  %909 = vst.msk [vmem:[%s2286_s1 + $0x3e] sm:$0x2] %vm3_vm2, %v437_v30  }
  0xde   :  { %910 = vst.msk [vmem:[%s2286_s1 + $0x5d] sm:$0x4] %vm3_vm2, %v437_v30   ;;  %911 = vst.msk [vmem:[%s2286_s1 + $0x7c] sm:$0x8] %vm3_vm2, %v437_v30  }
  0xdf   :  { %912 = vst.msk [vmem:[%s2286_s1 + $0x9b] sm:$0x10] %vm3_vm2, %v437_v30   ;;  %913 = vst.msk [vmem:[%s2286_s1 + $0xba] sm:$0x20] %vm3_vm2, %v437_v30  }
  0xe0   :  { %914 = vst.msk [vmem:[%s2286_s1 + $0xd9] sm:$0x40] %vm3_vm2, %v437_v30   ;;  %915 = vst.msk [vmem:[%s2286_s1 + $0xf8] sm:$0x80] %vm3_vm2, %v437_v30  }
  0xe1   :  { %917 = vst.msk [vmem:[%s2286_s1 + $0xe] sm:$0x1] %vm3_vm2, %v458_v31   ;;  %918 = vst.msk [vmem:[%s2286_s1 + $0x2d] sm:$0x2] %vm3_vm2, %v458_v31  }
  0xe2   :  { %919 = vst.msk [vmem:[%s2286_s1 + $0x4c] sm:$0x4] %vm3_vm2, %v458_v31   ;;  %920 = vst.msk [vmem:[%s2286_s1 + $0x6b] sm:$0x8] %vm3_vm2, %v458_v31  }
  0xe3   :  { %921 = vst.msk [vmem:[%s2286_s1 + $0x8a] sm:$0x10] %vm3_vm2, %v458_v31   ;;  %922 = vst.msk [vmem:[%s2286_s1 + $0xa9] sm:$0x20] %vm3_vm2, %v458_v31  }
  0xe4   :  { %923 = vst.msk [vmem:[%s2286_s1 + $0xc8] sm:$0x40] %vm3_vm2, %v458_v31   ;;  %924 = vst.msk [vmem:[%s2286_s1 + $0xe7] sm:$0x80] %vm3_vm2, %v458_v31  }
  0xe5   :  { %926 = vst.msk [vmem:[%s2286_s1 + $0x17] sm:$0x1] %vm3_vm2, %v479_v32   ;;  %927 = vst.msk [vmem:[%s2286_s1 + $0x36] sm:$0x2] %vm3_vm2, %v479_v32  }
  0xe6   :  { %928 = vst.msk [vmem:[%s2286_s1 + $0x55] sm:$0x4] %vm3_vm2, %v479_v32   ;;  %929 = vst.msk [vmem:[%s2286_s1 + $0x74] sm:$0x8] %vm3_vm2, %v479_v32  }
  0xe7   :  { %930 = vst.msk [vmem:[%s2286_s1 + $0x93] sm:$0x10] %vm3_vm2, %v479_v32   ;;  %931 = vst.msk [vmem:[%s2286_s1 + $0xb2] sm:$0x20] %vm3_vm2, %v479_v32  }
  0xe8   :  { %932 = vst.msk [vmem:[%s2286_s1 + $0xd1] sm:$0x40] %vm3_vm2, %v479_v32   ;;  %933 = vst.msk [vmem:[%s2286_s1 + $0xf0] sm:$0x80] %vm3_vm2, %v479_v32  }
  0xe9   :  { %934 = vst.msk [vmem:[%s2286_s1 + $0x6] sm:$0x1] %vm3_vm2, %v499_v33   ;;  %935 = vst.msk [vmem:[%s2286_s1 + $0x25] sm:$0x2] %vm3_vm2, %v499_v33  }
  0xea   :  { %936 = vst.msk [vmem:[%s2286_s1 + $0x44] sm:$0x4] %vm3_vm2, %v499_v33   ;;  %937 = vst.msk [vmem:[%s2286_s1 + $0x63] sm:$0x8] %vm3_vm2, %v499_v33  }
  0xeb   :  { %938 = vst.msk [vmem:[%s2286_s1 + $0x82] sm:$0x10] %vm3_vm2, %v499_v33   ;;  %939 = vst.msk [vmem:[%s2286_s1 + $0xa1] sm:$0x20] %vm3_vm2, %v499_v33  }
  0xec   :  { %940 = vst.msk [vmem:[%s2286_s1 + $0xc0] sm:$0x40] %vm3_vm2, %v499_v33   ;;  %941 = vst.msk [vmem:[%s2286_s1 + $0xdf] sm:$0x80] %vm3_vm2, %v499_v33  }
  0xed   :  { %943 = vst.msk [vmem:[%s2286_s1 + $0xf] sm:$0x1] %vm3_vm2, %v520_v34   ;;  %944 = vst.msk [vmem:[%s2286_s1 + $0x2e] sm:$0x2] %vm3_vm2, %v520_v34  }
  0xee   :  { %945 = vst.msk [vmem:[%s2286_s1 + $0x4d] sm:$0x4] %vm3_vm2, %v520_v34   ;;  %946 = vst.msk [vmem:[%s2286_s1 + $0x6c] sm:$0x8] %vm3_vm2, %v520_v34  }
  0xef   :  { %947 = vst.msk [vmem:[%s2286_s1 + $0x8b] sm:$0x10] %vm3_vm2, %v520_v34   ;;  %948 = vst.msk [vmem:[%s2286_s1 + $0xaa] sm:$0x20] %vm3_vm2, %v520_v34  }
  0xf0   :  { %949 = vst.msk [vmem:[%s2286_s1 + $0xc9] sm:$0x40] %vm3_vm2, %v520_v34   ;;  %950 = vst.msk [vmem:[%s2286_s1 + $0xe8] sm:$0x80] %vm3_vm2, %v520_v34  }
  0xf1   :  { %952 = vst.msk [vmem:[%s2286_s1 + $0x18] sm:$0x1] %vm3_vm2, %v541_v35   ;;  %953 = vst.msk [vmem:[%s2286_s1 + $0x37] sm:$0x2] %vm3_vm2, %v541_v35  }
  0xf2   :  { %954 = vst.msk [vmem:[%s2286_s1 + $0x56] sm:$0x4] %vm3_vm2, %v541_v35   ;;  %955 = vst.msk [vmem:[%s2286_s1 + $0x75] sm:$0x8] %vm3_vm2, %v541_v35  }
  0xf3   :  { %956 = vst.msk [vmem:[%s2286_s1 + $0x94] sm:$0x10] %vm3_vm2, %v541_v35   ;;  %957 = vst.msk [vmem:[%s2286_s1 + $0xb3] sm:$0x20] %vm3_vm2, %v541_v35  }
  0xf4   :  { %958 = vst.msk [vmem:[%s2286_s1 + $0xd2] sm:$0x40] %vm3_vm2, %v541_v35   ;;  %959 = vst.msk [vmem:[%s2286_s1 + $0xf1] sm:$0x80] %vm3_vm2, %v541_v35  }
  0xf5   :  { %960 = vst.msk [vmem:[%s2286_s1 + $0x7] sm:$0x1] %vm3_vm2, %v561_v36   ;;  %961 = vst.msk [vmem:[%s2286_s1 + $0x26] sm:$0x2] %vm3_vm2, %v561_v36  }
  0xf6   :  { %962 = vst.msk [vmem:[%s2286_s1 + $0x45] sm:$0x4] %vm3_vm2, %v561_v36   ;;  %963 = vst.msk [vmem:[%s2286_s1 + $0x64] sm:$0x8] %vm3_vm2, %v561_v36  }
  0xf7   :  { %964 = vst.msk [vmem:[%s2286_s1 + $0x83] sm:$0x10] %vm3_vm2, %v561_v36   ;;  %965 = vst.msk [vmem:[%s2286_s1 + $0xa2] sm:$0x20] %vm3_vm2, %v561_v36  }
  0xf8   :  { %966 = vst.msk [vmem:[%s2286_s1 + $0xc1] sm:$0x40] %vm3_vm2, %v561_v36   ;;  %967 = vst.msk [vmem:[%s2286_s1 + $0xe0] sm:$0x80] %vm3_vm2, %v561_v36  }
  0xf9   :  { %969 = vst.msk [vmem:[%s2286_s1 + $0x10] sm:$0x1] %vm3_vm2, %v582_v37   ;;  %970 = vst.msk [vmem:[%s2286_s1 + $0x2f] sm:$0x2] %vm3_vm2, %v582_v37  }
  0xfa   :  { %971 = vst.msk [vmem:[%s2286_s1 + $0x4e] sm:$0x4] %vm3_vm2, %v582_v37   ;;  %972 = vst.msk [vmem:[%s2286_s1 + $0x6d] sm:$0x8] %vm3_vm2, %v582_v37  }
  0xfb   :  { %973 = vst.msk [vmem:[%s2286_s1 + $0x8c] sm:$0x10] %vm3_vm2, %v582_v37   ;;  %974 = vst.msk [vmem:[%s2286_s1 + $0xab] sm:$0x20] %vm3_vm2, %v582_v37  }
  0xfc   :  { %975 = vst.msk [vmem:[%s2286_s1 + $0xca] sm:$0x40] %vm3_vm2, %v582_v37   ;;  %976 = vst.msk [vmem:[%s2286_s1 + $0xe9] sm:$0x80] %vm3_vm2, %v582_v37  }

// kernel: decoder_block_forward.1
= control target key start
LH: loop header
LB: loop body
LE: loop exit
PB: predicated region body
PF: predicated region fallthrough
CT: control target
= control target key end

     0   :  { %s975_s15 = smov 0   ;;  %s977_s16 = smov 0   ;;  %s1116_s0 = inlined_call_operand.vmem [shape: bf16[4,128,512], index: 0, kind: input, shape index: {}]   ;;  %s1117_s1 = inlined_call_operand.vmem [shape: bf16[4,8,128], index: 1, kind: input, shape index: {}]   ;;  %s1118_s2 = inlined_call_operand.vmem [shape: f32[8,1], index: 2, kind: input, shape index: {}]   ;;  %s1119_s3 = inlined_call_operand.vmem [shape: f32[8,1], index: 3, kind: input, shape index: {}]   ;;  %s1120_s4 = inlined_call_operand.vmem [shape: f32[4,8,512], index: 4, kind: output, shape index: {}]  }
   0x1   :  { %s979_s17 = smov 0   ;;  %s981_s18 = smov 0  }
   0x2   :  { %s983_s19 = smov 0  }
   0x3 LB: > { %s29_s20 = sadd.s32 1, %s936_s17  ;;  %s33_s21 = sadd.s32 1, %s940_s18  ;;  %s944_s19 = sphi %s983_s19, %s14_s19   ;;  %s940_s18 = sphi %s981_s18, %s1124_s18   ;;  %s936_s17 = sphi %s979_s17, %s1123_s17   ;;  %s932_s16 = sphi %s977_s16, %s1122_s16   ;;  %s928_s15 = sphi %s975_s15, %s1121_s15  }
   0x4   : > { %p31_p0 = scmp.ge.s32.totalorder %s29_s20, 4  ;;  %p764_p1 = scmp.ge.s32.totalorder %s944_s19, 1 }
   0x5   : > { %p203_p2 = scmp.lt.s32.totalorder %s944_s19, 9 }
   0x6   : > { %s1126_s20 = smov (%p31_p0, %s29_s20), 0  ;;  %s1128_s21 = smov (!%p31_p0, %s33_s21), %s940_s18 }
   0x7   : > { %p204_p3 = pnand %p764_p1, %p203_p2  ;;  %p35_p4 = scmp.ge.s32.totalorder %s1128_s21, 2 }
   0x8   : > { %p244_p5 = scmp.lt.s32.totalorder (!%p204_p3), %s928_s15, 3  ;;  %s257_s22 = smul.u32 (!%p204_p3), %s928_s15, %s932_s16 }
   0x9   : > { %s1130_s21 = smov (%p35_p4, %s1128_s21), 0  ;;  %207 = sbr.rel (%p204_p3) target bundleno = 859 (0x35b), region = 36 }
   0xa   : > { %p272_p6 = scmp.eq.s32.totalorder (!%p204_p3), %s928_s15, 0  ;;  %p260_p7 = scmp.lt.s32.totalorder (!%p204_p3), %s257_s22, 3 }
   0xb   : > { %p803_p8 = scmp.ne.s32.totalorder (!%p204_p3), %s932_s16, 0 }
   0xe   : > { %v946_v0 = vmov 0   ;;  %s1014_s23 = scalar_select %p244_p5, %s928_s15, 3 }
   0xf   : > { %501 = vmatprep.mubr.bf16.mxu0 %v946_v0  ;;  %542 = vmatprep.mubr.bf16.mxu1 %v946_v0  ;;  %s1132_s22 = smov (!%p260_p7, %s257_s22), 3 }
  0x10   : > { %s807_s24 = sshll.u32 %s1014_s23, 8  ;;  %s808_s28 = sshll.u32 %s1132_s22, 5 }
  0x11   : > { %s1020_s27 = scalar_lea.vmem %s1116_s0, %s807_s24  ;;  %s1029_s5 = scalar_lea.vmem %s1120_s4, %s808_s28 }
  0x12   : > { %v854_v1 = vld [vmem:[%s1020_s27 + $0xe4] ss:$16 sps:$4 sm:$0xff]   ;;  %v856_v2 = vld [vmem:[%s1020_s27 + $0xec] ss:$16 sps:$4 sm:$0xff]   ;;  %v858_v3 = vld [vmem:[%s1020_s27 + $0xe0] ss:$16 sps:$4 sm:$0xff]  }
  0x13   : > { %469 = vmatprep.subr.bf16.mxu0 %v854_v1  ;;  %v859_v4 = vld [vmem:[%s1020_s27 + $0xe8] ss:$16 sps:$4 sm:$0xff]   ;;  %510 = vmatprep.subr.bf16.mxu1 %v856_v2  ;;  %v860_v5 = vld [vmem:[%s1020_s27 + $0xc4] ss:$16 sps:$4 sm:$0xff]   ;;  %v862_v6 = vld [vmem:[%s1020_s27 + $0xcc] ss:$16 sps:$4 sm:$0xff]  }
  0x14   : > { %470 = vmatpush1.bf16.msra.mxu0 %v858_v3  ;;  %511 = vmatpush1.bf16.msra.mxu1 %v859_v4  ;;  %v864_v7 = vld [vmem:[%s1020_s27 + $0xc0] ss:$16 sps:$4 sm:$0xff]   ;;  %v865_v8 = vld [vmem:[%s1020_s27 + $0xc8] ss:$16 sps:$4 sm:$0xff]   ;;  %v866_v9 = vld [vmem:[%s1020_s27 + $0xa4] ss:$16 sps:$4 sm:$0xff]  }
  0x15   : > { %471 = vmatprep.subr.bf16.mxu0 %v860_v5  ;;  %512 = vmatprep.subr.bf16.mxu1 %v862_v6  ;;  %v868_v10 = vld [vmem:[%s1020_s27 + $0xac] ss:$16 sps:$4 sm:$0xff]   ;;  %v870_v11 = vld [vmem:[%s1020_s27 + $0xa0] ss:$16 sps:$4 sm:$0xff]   ;;  %v871_v12 = vld [vmem:[%s1020_s27 + $0xa8] ss:$16 sps:$4 sm:$0xff]  }
  0x16   : > { %v872_v13 = vld [vmem:[%s1020_s27 + $0x84] ss:$16 sps:$4 sm:$0xff]   ;;  %v874_v14 = vld [vmem:[%s1020_s27 + $0x8c] ss:$16 sps:$4 sm:$0xff]   ;;  %v876_v15 = vld [vmem:[%s1020_s27 + $0x80] ss:$16 sps:$4 sm:$0xff]  }
  0x17   : > { %v877_v16 = vld [vmem:[%s1020_s27 + $0x88] ss:$16 sps:$4 sm:$0xff]   ;;  %v878_v17 = vld [vmem:[%s1020_s27 + $0x64] ss:$16 sps:$4 sm:$0xff]   ;;  %v880_v18 = vld [vmem:[%s1020_s27 + $0x6c] ss:$16 sps:$4 sm:$0xff]  }
  0x18   : > { %472 = vmatpush1.bf16.msra.mxu0 %v864_v7  ;;  %513 = vmatpush1.bf16.msra.mxu1 %v865_v8  ;;  %v882_v19 = vld [vmem:[%s1020_s27 + $0x60] ss:$16 sps:$4 sm:$0xff]   ;;  %v883_v20 = vld [vmem:[%s1020_s27 + $0x68] ss:$16 sps:$4 sm:$0xff]   ;;  %v884_v21 = vld [vmem:[%s1020_s27 + $0x44] ss:$16 sps:$4 sm:$0xff]  }
  0x19   : > { %473 = vmatprep.subr.bf16.mxu0 %v866_v9  ;;  %514 = vmatprep.subr.bf16.mxu1 %v868_v10  ;;  %v886_v22 = vld [vmem:[%s1020_s27 + $0x4c] ss:$16 sps:$4 sm:$0xff]   ;;  %v888_v23 = vld [vmem:[%s1020_s27 + $0x40] ss:$16 sps:$4 sm:$0xff]   ;;  %v889_v24 = vld [vmem:[%s1020_s27 + $0x48] ss:$16 sps:$4 sm:$0xff]  }
  0x1a   : > { %v890_v25 = vld [vmem:[%s1020_s27 + $0x24] ss:$16 sps:$4 sm:$0xff]   ;;  %v892_v26 = vld [vmem:[%s1020_s27 + $0x2c] ss:$16 sps:$4 sm:$0xff]   ;;  %v894_v27 = vld [vmem:[%s1020_s27 + $0x20] ss:$16 sps:$4 sm:$0xff]  }
  0x1b   : > { %v895_v28 = vld [vmem:[%s1020_s27 + $0x28] ss:$16 sps:$4 sm:$0xff]   ;;  %v896_v29 = vld [vmem:[%s1020_s27 + $0x4] ss:$16 sps:$4 sm:$0xff]   ;;  %v898_v30 = vld [vmem:[%s1020_s27 + $0xc] ss:$16 sps:$4 sm:$0xff]  }
  0x1c   : > { %474 = vmatpush1.bf16.msra.mxu0 %v870_v11  ;;  %515 = vmatpush1.bf16.msra.mxu1 %v871_v12  ;;  %s767_s6 = sshll.u32 %s1014_s23, 2  ;;  %v900_v31 = vld [vmem:[%s1020_s27] ss:$16 sps:$4 sm:$0xff]   ;;  %v901_v32 = vld [vmem:[%s1020_s27 + $0x8] ss:$16 sps:$4 sm:$0xff]  }
  0x1d   : > { %475 = vmatprep.subr.bf16.mxu0 %v872_v13  ;;  %516 = vmatprep.subr.bf16.mxu1 %v874_v14  ;;  %s256_s9 = scalar_lea.vmem %s1117_s1, %s767_s6 }
  0x1e   : > { %v276_v33 = vld [vmem:[%s256_s9] sm:$0xf] }
  0x20   : > { %476 = vmatpush1.bf16.msra.mxu0 %v876_v15  ;;  %517 = vmatpush1.bf16.msra.mxu1 %v877_v16 }
  0x21   : > { %477 = vmatprep.subr.bf16.mxu0 %v878_v17  ;;  %518 = vmatprep.subr.bf16.mxu1 %v880_v18 }
  0x24   : > { %478 = vmatpush1.bf16.msra.mxu0 %v882_v19  ;;  %519 = vmatpush1.bf16.msra.mxu1 %v883_v20 }
  0x25   : > { %479 = vmatprep.subr.bf16.mxu0 %v884_v21  ;;  %520 = vmatprep.subr.bf16.mxu1 %v886_v22 }
  0x28   : > { %480 = vmatpush1.bf16.msra.mxu0 %v888_v23  ;;  %521 = vmatpush1.bf16.msra.mxu1 %v889_v24 }
  0x29   : > { %481 = vmatprep.subr.bf16.mxu0 %v890_v25  ;;  %522 = vmatprep.subr.bf16.mxu1 %v892_v26 }
  0x2c   : > { %482 = vmatpush1.bf16.msra.mxu0 %v894_v27  ;;  %523 = vmatpush1.bf16.msra.mxu1 %v895_v28 }
  0x2d   : > { %483 = vmatprep.subr.bf16.mxu0 %v896_v29  ;;  %524 = vmatprep.subr.bf16.mxu1 %v898_v30 }
  0x30   : > { %484 = vmatpush1.bf16.msra.mxu0 %v900_v31  ;;  %525 = vmatpush1.bf16.msra.mxu1 %v901_v32 }
  0x33   : > { %502 = vmatmul.mubr.bf16.vlgmr.msra.gmra.mxu0 %v276_v33  ;;  %543 = vmatmul.mubr.bf16.vlgmr.msra.gmra.mxu1 %v276_v33 }
  0xf3   : > { %v1063_v34 = vpop.f32.mrf.mxu0  ;;  %v1065_v35 = vpop.f32.mrf.mxu1 }
  0xf5   : > { %v1067_v36 = vpop.f32.mrf.mxu0  ;;  %v1069_v37 = vpop.f32.mrf.mxu1  ;;  %554 = sbr.rel (%p803_p8) target bundleno = 679 (0x2a7), region = 40 }
  0xf7   : > { %v507_v38 = vpop.f32.mrf.mxu0  ;;  %v548_v39 = vpop.f32.mrf.mxu1 }
  0xf9   : > { %v508_v40 = vpop.f32.mrf.mxu0  ;;  %v549_v41 = vpop.f32.mrf.mxu1 }
  0xfa   : > { %v555_v42 = vadd.f32 %v1067_v36, %v1063_v34  ;;  %vm563_vm0 = vcmask (%p272_p6), 7168   ;;  %v947_v47 = vmov (%p272_p6), 0.0  }
  0xfb   : > { %565 = vst.msk [vmem:[#allocation2] sm:$0xff] (%p272_p6), %vm563_vm0, %v947_v47  ;;  %566 = vst.msk [vmem:[#allocation3] sm:$0xff] (%p272_p6), %vm563_vm0, %v947_v47 }
  0xfc   : > { %v556_v43 = vadd.f32 %v555_v42, %v1065_v35 }
  0xfe   : > { %v557_v44 = vadd.f32 %v556_v43, %v1069_v37 }
 0x100   : > { %558 = vadd.xlane.f32.xlu0 %v557_v44 }
 0x185   : > { %561 = sbr.rel (!%p272_p6) target bundleno = 397 (0x18d), region = 44 }
 0x189   : > { %v559_v45 = vpop.xlane.xlu0 %558 }
 0x18a   : > { %v562_v46 = vmul.f32 0.001953125, %v559_v45 }
 0x18c   : > { %564 = vst.msk [vmem:[#allocation4] sm:$0xff] %vm563_vm0, %v562_v46 }
 0x18d PF: > { %v948_v49 = vmov 0   ;;  %v577_v50 = vld [vmem:[#allocation2] sm:$0xff]  ;;  %vm579_vm1 = vcmask 7168   ;;  %v581_v0 = vld [vmem:[#allocation3] sm:$0xff] }
 0x18e   : > { %902 = vset.pattern.permute.xlu0 %v948_v49  ;;  %v578_v51 = vadd.f32 %v577_v50, %v559_v45 }
 0x190   : > { %580 = vst.msk [vmem:[#allocation2] sm:$0xff] %vm579_vm1, %v578_v51 }
 0x193   : > { %v567_v48 = vld [vmem:[#allocation4] sm:$0xff] }
 0x194   : > { %570 = vperm.xlu0 %902, %v567_v48  }
 0x20f   : > { %v571_v52 = vpop.permute.xlu0 %570 }
 0x210   : > { %v573_v53 = vsub.f32 %v1063_v34, %v571_v52  ;;  %v574_v54 = vsub.f32 %v1067_v36, %v571_v52  ;;  %v575_v55 = vsub.f32 %v1065_v35, %v571_v52  ;;  %v576_v58 = vsub.f32 %v1069_v37, %v571_v52 }
 0x212   : > { %v582_v56 = vmul.f32 %v573_v53, %v573_v53  ;;  %v583_v57 = vmul.f32 %v574_v54, %v574_v54  ;;  %v584_v59 = vmul.f32 %v575_v55, %v575_v55  ;;  %v585_v61 = vmul.f32 %v576_v58, %v576_v58 }
 0x214   : > { %v586_v60 = vadd.f32 %v583_v57, %v582_v56 }
 0x216   : > { %v587_v62 = vadd.f32 %v586_v60, %v584_v59 }
 0x218   : > { %v588_v63 = vadd.f32 %v587_v62, %v585_v61 }
 0x21a   : > { %589 = vadd.xlane.f32.xlu0 %v588_v63 }
 0x2a3   : > { %v590_v1 = vpop.xlane.xlu0 %589 }
 0x2a4   : > { %v591_v2 = vadd.f32 %v590_v1, %v581_v0 }
 0x2a6   : > { %592 = vst.msk [vmem:[#allocation3] sm:$0xff] %vm579_vm1, %v591_v2 }
 0x2a7 PF: > { %p804_p9 = scmp.ne.s32.totalorder %s932_s16, 1 }
 0x2a9   : > { %596 = sbr.rel (%p804_p9) target bundleno = 859 (0x35b), region = 48 }
 0x2ae   : > { %598 = sbr.rel (!%p272_p6) target bundleno = 722 (0x2d2), region = 52  ;;  %v599_v3 = vld [vmem:[#allocation4] sm:$0xff] (%p272_p6)  ;;  %v600_v4 = vld [vmem:[#allocation2] sm:$0xff] (%p272_p6)  ;;  %v602_v7 = vld [vmem:[#allocation3] sm:$0xff] (%p272_p6)  ;;  %vm615_vm2 = vcmask (%p272_p6), 7168  }
 0x2af   : > { %v601_v5 = vmul.f32 (%p272_p6), 0.0005202914, %v600_v4  ;;  %v603_v6 = vmul.f32 (%p272_p6), %v599_v3, %v599_v3  ;;  %v611_v16 = vld [vmem:[%s1118_s2] sm:$0xff] (%p272_p6) }
 0x2b0   : > { %v617_v19 = vld [vmem:[%s1119_s3] sm:$0xff] (%p272_p6) }
 0x2b1   : > { %v604_v8 = vmul.f32 (%p272_p6), 126.0, %v603_v6  ;;  %v606_v9 = vsub.f32 (%p272_p6), %v601_v5, %v599_v3 }
 0x2b3   : > { %v605_v10 = vsub.f32 %v602_v7, %v604_v8  ;;  %v608_v11 = vmul.f32 %v606_v9, %v606_v9 }
 0x2b5   : > { %v607_v12 = vmul.f32 0.0005202914, %v605_v10 }
 0x2b7   : > { %v609_v13 = vsub.f32 %v607_v12, %v608_v11 }
 0x2b9   : > { %v610_v14 = vmax.f32 %v609_v13, 0.0 }
 0x2bb   : > { %v612_v15 = vadd.f32 1e-05, %v610_v14 }
 0x2bd   : > { %903 = vrsqrt.f32 %v612_v15 }
 0x2ca   : > { %v904_v17 = vpop.eup %903 }
 0x2cb   : > { %v614_v18 = vmul.f32 %v904_v17, %v611_v16 }
 0x2cd   : > { %616 = vst.msk [vmem:[#allocation5] sm:$0xff] %vm615_vm2, %v614_v18  ;;  %v618_v20 = vmul.f32 %v614_v18, %v601_v5 }
 0x2cf   : > { %v619_v21 = vsub.f32 %v617_v19, %v618_v20 }
 0x2d1   : > { %620 = vst.msk [vmem:[#allocation6] sm:$0xff] %vm615_vm2, %v619_v21 }
 0x2d2 PF: > { %v949_v23 = vmov 0  }
 0x2d3   : > { %905 = vset.pattern.permute.xlu0 %v949_v23 }
 0x2d4   : > { %v621_v22 = vld [vmem:[#allocation5] sm:$0xff] }
 0x2d5   : > { %624 = vperm.xlu0 %905, %v621_v22  }
 0x2d8   : > { %v631_v24 = vld [vmem:[#allocation6] sm:$0xff] }
 0x2d9   : > { %634 = vperm.xlu0 %905, %v631_v24  }
 0x350   : > { %v625_v25 = vpop.permute.xlu0 %624 }
 0x351   : > { %v627_v26 = vmul.f32 %v625_v25, %v1063_v34  ;;  %v628_v27 = vmul.f32 %v625_v25, %v1067_v36  ;;  %v629_v28 = vmul.f32 %v625_v25, %v1065_v35  ;;  %v630_v29 = vmul.f32 %v625_v25, %v1069_v37 }
 0x354   : > { %v635_v30 = vpop.permute.xlu0 %634 }
 0x355   : > { %v637_v31 = vadd.f32 %v635_v30, %v627_v26  ;;  %v638_v32 = vadd.f32 %v635_v30, %v628_v27  ;;  %v639_v33 = vadd.f32 %v635_v30, %v629_v28  ;;  %v640_v38 = vadd.f32 %v635_v30, %v630_v29 }
 0x357   : > { %v641_v39 = vmax.f32 %v637_v31, 0.0  ;;  %v642_v40 = vmax.f32 %v638_v32, 0.0  ;;  %v643_v41 = vmax.f32 %v639_v33, 0.0  ;;  %v644_v42 = vmax.f32 %v640_v38, 0.0 }
 0x359   : > { %645 = vst [vmem:[%s1029_s5] sm:$0xff] %v641_v39  ;;  %646 = vst [vmem:[%s1029_s5 + $0x8] sm:$0xff] %v642_v40 }
 0x35a   : > { %647 = vst [vmem:[%s1029_s5 + $0x10] sm:$0xff] %v643_v41  ;;  %648 = vst [vmem:[%s1029_s5 + $0x18] sm:$0xff] %v644_v42 }
 0x35b PF: > { %s14_s19 = sadd.s32 1, %s944_s19   ;;  %s1121_s15 = smov %s936_s17 }
 0x35c   : > { %p11_p10 = scmp.ge.s32.totalorder %s14_s19, 10   ;;  %s1122_s16 = smov %s940_s18 }
 0x35d   : > { %s1123_s17 = smov %s1126_s20  ;;  %s1124_s18 = smov %s1130_s21 }
 0x35e   :  { %13 = sbr.rel (!%p11_p10) target bundleno = 3 (0x3), region = 85 }

// kernel: squeeze.56
= control target key start
LH: loop header
LB: loop body
LE: loop exit
PB: predicated region body
PF: predicated region fallthrough
CT: control target
= control target key end

     0   :  { %vm79_vm0 = vcmask 1047556   ;;  %s719_s14 = smov 112   ;;  %s720_s10 = smov 96   ;;  %vm414_vm1 = vcmask 1045507   ;;  %vm436_vm2 = vcmask 1047557   ;;  %vm419_vm3 = vcmask 1047558   ;;  %s1487_s0 = inlined_call_operand.vmem [shape: f32[1,8,480], index: 0, kind: input, shape index: {}]   ;;  %s1488_s1 = inlined_call_operand.vmem [shape: f32[8,2,15,16], index: 1, kind: output, shape index: {}]  }
   0x1   :  { %v570_v0 = vld [vmem:[%s1487_s0 + $0x4] ss:$8 sm:$0xf]   ;;  %v571_v1 = vld [vmem:[%s1487_s0 - $0x1b] ss:$8 sm:$0xf0]  }
   0x2   :  { %v114_v2 = vsel %vm79_vm0, %v571_v1, %v570_v0  ;;  %v76_v3 = vld [vmem:[%s1487_s0] ss:$8 sm:$0xf]   ;;  %v559_v4 = vld [vmem:[%s1487_s0 - $0x1f] ss:$8 sm:$0xf0]  }
   0x3   :  { %115 = vrot.lane.b32.xlu1 %v114_v2, %s719_s14  ;;  %v80_v5 = vsel %vm79_vm0, %v559_v4, %v76_v3  ;;  %v576_v6 = vld [vmem:[%s1487_s0 + $0x6] ss:$8 sm:$0xf]   ;;  %v577_v7 = vld [vmem:[%s1487_s0 - $0x19] ss:$8 sm:$0xf0]  }
   0x4   :  { %81 = vrot.lane.b32.xlu0 %v80_v5, %s719_s14  ;;  %v131_v8 = vsel %vm79_vm0, %v577_v7, %v576_v6  ;;  %v564_v9 = vld [vmem:[%s1487_s0 + $0x2] ss:$8 sm:$0xf]   ;;  %v565_v10 = vld [vmem:[%s1487_s0 - $0x1d] ss:$8 sm:$0xf0]  }
   0x5   :  { %v97_v11 = vsel %vm79_vm0, %v565_v10, %v564_v9  ;;  %v587_v12 = vld [vmem:[%s1487_s0 + $0x2] ss:$8 sm:$0xf]   ;;  %v588_v13 = vld [vmem:[%s1487_s0 - $0x1d] ss:$8 sm:$0xf0]  }
   0x6   :  { %v143_v14 = vld [vmem:[%s1487_s0] ss:$8 sm:$0xf]   ;;  %v582_v15 = vld [vmem:[%s1487_s0 - $0x1f] ss:$8 sm:$0xf0]   ;;  %v164_v16 = vsel %vm79_vm0, %v588_v13, %v587_v12 }
   0x7   :  { %132 = vrot.lane.b32.xlu1 %v131_v8, %s719_s14  ;;  %v147_v17 = vsel %vm79_vm0, %v582_v15, %v143_v14  ;;  %v599_v18 = vld [vmem:[%s1487_s0 + $0x6] ss:$8 sm:$0xf]   ;;  %v600_v19 = vld [vmem:[%s1487_s0 - $0x19] ss:$8 sm:$0xf0]  }
   0x8   :  { %98 = vrot.lane.b32.xlu0 %v97_v11, %s719_s14  ;;  %v593_v20 = vld [vmem:[%s1487_s0 + $0x4] ss:$8 sm:$0xf]   ;;  %v594_v21 = vld [vmem:[%s1487_s0 - $0x1b] ss:$8 sm:$0xf0]   ;;  %v198_v22 = vsel %vm79_vm0, %v600_v19, %v599_v18 }
   0x9   :  { %v181_v23 = vsel %vm79_vm0, %v594_v21, %v593_v20  ;;  %v610_v24 = vld [vmem:[%s1487_s0 + $0x2] ss:$8 sm:$0xf]   ;;  %v611_v25 = vld [vmem:[%s1487_s0 - $0x1d] ss:$8 sm:$0xf0]  }
   0xa   :  { %v210_v26 = vld [vmem:[%s1487_s0] ss:$8 sm:$0xf]   ;;  %v605_v27 = vld [vmem:[%s1487_s0 - $0x1f] ss:$8 sm:$0xf0]   ;;  %v231_v28 = vsel %vm79_vm0, %v611_v25, %v610_v24 }
   0xb   :  { %165 = vrot.lane.b32.xlu1 %v164_v16, %s720_s10  ;;  %v214_v29 = vsel %vm79_vm0, %v605_v27, %v210_v26  ;;  %v622_v30 = vld [vmem:[%s1487_s0 + $0x6] ss:$8 sm:$0xf]   ;;  %v623_v31 = vld [vmem:[%s1487_s0 - $0x19] ss:$8 sm:$0xf0]  }
   0xc   :  { %148 = vrot.lane.b32.xlu0 %v147_v17, %s720_s10  ;;  %v616_v32 = vld [vmem:[%s1487_s0 + $0x4] ss:$8 sm:$0xf]   ;;  %v617_v33 = vld [vmem:[%s1487_s0 - $0x1b] ss:$8 sm:$0xf0]   ;;  %v265_v34 = vsel %vm79_vm0, %v623_v31, %v622_v30 }
   0xd   :  { %s721_s27 = smov 80   ;;  %v248_v35 = vsel %vm79_vm0, %v617_v33, %v616_v32  ;;  %v633_v36 = vld [vmem:[%s1487_s0 + $0x2] ss:$8 sm:$0xf]   ;;  %s722_s15 = smov 64   ;;  %vm3_vm4 = vcmask 130048  }
   0xe   :  { %v634_v37 = vld [vmem:[%s1487_s0 - $0x1d] ss:$8 sm:$0xf0]   ;;  %v277_v38 = vld [vmem:[%s1487_s0] ss:$8 sm:$0xf]  }
   0xf   :  { %199 = vrot.lane.b32.xlu1 %v198_v22, %s720_s10  ;;  %v628_v39 = vld [vmem:[%s1487_s0 - $0x1f] ss:$8 sm:$0xf0]   ;;  %v298_v40 = vsel %vm79_vm0, %v634_v37, %v633_v36  ;;  %v645_v42 = vld [vmem:[%s1487_s0 + $0x6] ss:$8 sm:$0xf]  }
  0x10   :  { %182 = vrot.lane.b32.xlu0 %v181_v23, %s720_s10  ;;  %v281_v41 = vsel %vm79_vm0, %v628_v39, %v277_v38  ;;  %v646_v43 = vld [vmem:[%s1487_s0 - $0x19] ss:$8 sm:$0xf0]   ;;  %v639_v44 = vld [vmem:[%s1487_s0 + $0x4] ss:$8 sm:$0xf]  }
  0x11   :  { %v640_v45 = vld [vmem:[%s1487_s0 - $0x1b] ss:$8 sm:$0xf0]   ;;  %v332_v46 = vsel %vm79_vm0, %v646_v43, %v645_v42  ;;  %v656_v48 = vld [vmem:[%s1487_s0 + $0x2] ss:$8 sm:$0xf]  }
  0x12   :  { %v315_v47 = vsel %vm79_vm0, %v640_v45, %v639_v44  ;;  %v657_v49 = vld [vmem:[%s1487_s0 - $0x1d] ss:$8 sm:$0xf0]   ;;  %v344_v50 = vld [vmem:[%s1487_s0] ss:$8 sm:$0xf]  }
  0x13   :  { %232 = vrot.lane.b32.xlu1 %v231_v28, %s721_s27  ;;  %v651_v51 = vld [vmem:[%s1487_s0 - $0x1f] ss:$8 sm:$0xf0]   ;;  %v365_v52 = vsel %vm79_vm0, %v657_v49, %v656_v48  ;;  %v668_v53 = vld [vmem:[%s1487_s0 + $0x6] ss:$8 sm:$0xf]  }
  0x14   :  { %215 = vrot.lane.b32.xlu0 %v214_v29, %s721_s27  ;;  %v348_v54 = vsel %vm79_vm0, %v651_v51, %v344_v50  ;;  %v669_v55 = vld [vmem:[%s1487_s0 - $0x19] ss:$8 sm:$0xf0]   ;;  %v662_v56 = vld [vmem:[%s1487_s0 + $0x4] ss:$8 sm:$0xf]  }
  0x15   :  { %v663_v57 = vld [vmem:[%s1487_s0 - $0x1b] ss:$8 sm:$0xf0]   ;;  %s417_s3 = smov 192  ;;  %s723_s4 = smov 48   ;;  %v399_v61 = vsel %vm79_vm0, %v669_v55, %v668_v53 }
  0x16   :  { %v680_v58 = vld.sshfl [vmem:[%s1487_s0 + $0x3] sm:$0xff pattern:$0x99991f80]   ;;  %v411_v59 = vld [vmem:[%s1487_s0] ss:$8 sm:$0x7]   ;;  %v382_v0 = vsel %vm79_vm0, %v663_v57, %v662_v56 }
  0x17   :  { %266 = vrot.lane.b32.xlu1 %v265_v34, %s721_s27  ;;  %v674_v60 = vld [vmem:[%s1487_s0 - $0x17] ss:$8 sm:$0x38]   ;;  %v681_v62 = vld.sshfl [vmem:[%s1487_s0 + $0x5] sm:$0xff pattern:$0x80eeeeee]  }
  0x18   :  { %249 = vrot.lane.b32.xlu0 %v248_v35, %s721_s27  ;;  %v468_v63 = vld [vmem:[%s1487_s0] ss:$8 sm:$0x7]   ;;  %v675_v1 = vld [vmem:[%s1487_s0 - $0x2e] ss:$8 sm:%s417_s3]   ;;  %v415_v3 = vsel %vm414_vm1, %v674_v60, %v411_v59  ;;  %s900_s19 = smov 192  ;;  %v437_v8 = vsel %vm436_vm2, %v681_v62, %v680_v58 }
  0x19   :  { %v693_v2 = vld [vmem:[%s1487_s0 - $0x17] ss:$8 sm:$0x38]   ;;  %v550_v7 = vld [vmem:[%s1487_s0 + $0x18] sm:$0xff]   ;;  %v420_v9 = vsel %vm419_vm3, %v675_v1, %v415_v3  ;;  %v687_v13 = vld [vmem:[%s1487_s0 + $0x10] sm:$0xc0]  }
  0x1a   :  { %v2_v4 = vld [vmem:[%s1487_s0] sm:$0xff]   ;;  %v532_v5 = vld [vmem:[%s1487_s0 + $0x8] sm:$0xff]   ;;  %v541_v6 = vld [vmem:[%s1487_s0 + $0x10] sm:$0xff]   ;;  %551 = vst.msk [vmem:[%s1488_s1 + $0x19] sm:$0x1] %vm3_vm4, %v550_v7   ;;  %v472_v10 = vsel %vm414_vm1, %v693_v2, %v468_v63  ;;  %s724_s14 = smov 32  }
  0x1b   :  { %299 = vrot.lane.b32.xlu1 %v298_v40, %s722_s15  ;;  %4 = vst.msk [vmem:[%s1488_s1] sm:$0x1] %vm3_vm4, %v2_v4   ;;  %525 = vst.msk [vmem:[%s1488_s1 + $0x1f] sm:$0x2] %vm3_vm4, %v2_v4   ;;  %v706_v16 = vld [vmem:[%s1487_s0 + $0x10] sm:$0xc0]  }
  0x1c   :  { %282 = vrot.lane.b32.xlu0 %v281_v41, %s722_s15  ;;  %526 = vst.msk [vmem:[%s1488_s1 + $0x3e] sm:$0x4] %vm3_vm4, %v2_v4   ;;  %527 = vst.msk [vmem:[%s1488_s1 + $0x5d] sm:$0x8] %vm3_vm4, %v2_v4  }
  0x1d   :  { %528 = vst.msk [vmem:[%s1488_s1 + $0x7c] sm:$0x10] %vm3_vm4, %v2_v4   ;;  %529 = vst.msk [vmem:[%s1488_s1 + $0x9b] sm:$0x20] %vm3_vm4, %v2_v4   ;;  %v694_v11 = vld [vmem:[%s1487_s0 - $0x2e] ss:$8 sm:%s900_s19]  }
  0x1e   :  { %530 = vst.msk [vmem:[%s1488_s1 + $0xba] sm:$0x40] %vm3_vm4, %v2_v4   ;;  %531 = vst.msk [vmem:[%s1488_s1 + $0xd9] sm:$0x80] %vm3_vm4, %v2_v4   ;;  %v477_v14 = vsel %vm419_vm3, %v694_v11, %v472_v10 }
  0x1f   :  { %333 = vrot.lane.b32.xlu1 %v332_v46, %s722_s15  ;;  %533 = vst.msk [vmem:[%s1488_s1 + $0x8] sm:$0x1] %vm3_vm4, %v532_v5   ;;  %534 = vst.msk [vmem:[%s1488_s1 + $0x27] sm:$0x2] %vm3_vm4, %v532_v5  }
  0x20   :  { %316 = vrot.lane.b32.xlu0 %v315_v47, %s722_s15  ;;  %535 = vst.msk [vmem:[%s1488_s1 + $0x46] sm:$0x4] %vm3_vm4, %v532_v5   ;;  %536 = vst.msk [vmem:[%s1488_s1 + $0x65] sm:$0x8] %vm3_vm4, %v532_v5  }
  0x21   :  { %537 = vst.msk [vmem:[%s1488_s1 + $0x84] sm:$0x10] %vm3_vm4, %v532_v5   ;;  %538 = vst.msk [vmem:[%s1488_s1 + $0xa3] sm:$0x20] %vm3_vm4, %v532_v5  }
  0x22   :  { %539 = vst.msk [vmem:[%s1488_s1 + $0xc2] sm:$0x40] %vm3_vm4, %v532_v5   ;;  %540 = vst.msk [vmem:[%s1488_s1 + $0xe1] sm:$0x80] %vm3_vm4, %v532_v5  }
  0x23   :  { %366 = vrot.lane.b32.xlu1 %v365_v52, %s723_s4  ;;  %542 = vst.msk [vmem:[%s1488_s1 + $0x11] sm:$0x1] %vm3_vm4, %v541_v6   ;;  %543 = vst.msk [vmem:[%s1488_s1 + $0x30] sm:$0x2] %vm3_vm4, %v541_v6  }
  0x24   :  { %349 = vrot.lane.b32.xlu0 %v348_v54, %s723_s4  ;;  %544 = vst.msk [vmem:[%s1488_s1 + $0x4f] sm:$0x4] %vm3_vm4, %v541_v6   ;;  %545 = vst.msk [vmem:[%s1488_s1 + $0x6e] sm:$0x8] %vm3_vm4, %v541_v6  }
  0x25   :  { %546 = vst.msk [vmem:[%s1488_s1 + $0x8d] sm:$0x10] %vm3_vm4, %v541_v6   ;;  %547 = vst.msk [vmem:[%s1488_s1 + $0xac] sm:$0x20] %vm3_vm4, %v541_v6  }
  0x26   :  { %548 = vst.msk [vmem:[%s1488_s1 + $0xcb] sm:$0x40] %vm3_vm4, %v541_v6   ;;  %549 = vst.msk [vmem:[%s1488_s1 + $0xea] sm:$0x80] %vm3_vm4, %v541_v6  }
  0x27   :  { %400 = vrot.lane.b32.xlu1 %v399_v61, %s723_s4  ;;  %552 = vst.msk [vmem:[%s1488_s1 + $0x38] sm:$0x2] %vm3_vm4, %v550_v7   ;;  %553 = vst.msk [vmem:[%s1488_s1 + $0x57] sm:$0x4] %vm3_vm4, %v550_v7  }
  0x28   :  { %383 = vrot.lane.b32.xlu0 %v382_v0, %s723_s4  ;;  %554 = vst.msk [vmem:[%s1488_s1 + $0x76] sm:$0x8] %vm3_vm4, %v550_v7   ;;  %555 = vst.msk [vmem:[%s1488_s1 + $0x95] sm:$0x10] %vm3_vm4, %v550_v7  }
  0x29   :  { %556 = vst.msk [vmem:[%s1488_s1 + $0xb4] sm:$0x20] %vm3_vm4, %v550_v7   ;;  %557 = vst.msk [vmem:[%s1488_s1 + $0xd3] sm:$0x40] %vm3_vm4, %v550_v7  }
  0x2a   :  { %558 = vst.msk [vmem:[%s1488_s1 + $0xf2] sm:$0x80] %vm3_vm4, %v550_v7   ;;  %v686_v12 = vld.sshfl [vmem:[%s1487_s0 + $0x6] sm:$0xff pattern:$0xfff91e80]   ;;  %s725_s0 = smov 16  }
  0x2b   :  { %438 = vrot.lane.b32.xlu1 %v437_v8, %s724_s14  ;;  %v454_v15 = vsel %vm419_vm3, %v687_v13, %v686_v12  ;;  %v511_v17 = vsel %vm419_vm3, %v706_v16, %v686_v12 }
  0x2c   :  { %421 = vrot.lane.b32.xlu0 %v420_v9, %s724_s14 }
  0x2f   :  { %478 = vrot.lane.b32.xlu1 %v477_v14, %s725_s0 }
  0x30   :  { %455 = vrot.lane.b32.xlu0 %v454_v15, %s724_s14 }
  0x33   :  { %512 = vrot.lane.b32.xlu1 %v511_v17, %s725_s0 }
  0x34   :  { %495 = vrot.lane.b32.xlu0 %v437_v8, %s725_s0 }
  0x75   :  { %v116_v18 = vpop.permute.xlu1 %115  }
  0x76   :  { %572 = vst.msk [vmem:[%s1488_s1 + $0x81] ss:$8 sm:$0x3] %vm3_vm4, %v116_v18   ;;  %573 = vst.msk [vmem:[%s1488_s1 + $0x82] ss:$8 sm:$0xc] %vm3_vm4, %v116_v18   ;;  %v82_v19 = vpop.permute.xlu0 %81  }
  0x77   :  { %574 = vst.msk [vmem:[%s1488_s1 + $0x81] ss:$8 sm:$0x30] %vm3_vm4, %v116_v18   ;;  %575 = vst.msk [vmem:[%s1488_s1 + $0x82] ss:$8 sm:$0xc0] %vm3_vm4, %v116_v18  }
  0x78   :  { %560 = vst.msk [vmem:[%s1488_s1 + $0x1] ss:$8 sm:$0x3] %vm3_vm4, %v82_v19   ;;  %561 = vst.msk [vmem:[%s1488_s1 + $0x2] ss:$8 sm:$0xc] %vm3_vm4, %v82_v19  }
  0x79   :  { %562 = vst.msk [vmem:[%s1488_s1 + $0x1] ss:$8 sm:$0x30] %vm3_vm4, %v82_v19   ;;  %563 = vst.msk [vmem:[%s1488_s1 + $0x2] ss:$8 sm:$0xc0] %vm3_vm4, %v82_v19   ;;  %v133_v20 = vpop.permute.xlu1 %132  }
  0x7a   :  { %578 = vst.msk [vmem:[%s1488_s1 + $0xc1] ss:$8 sm:$0x3] %vm3_vm4, %v133_v20   ;;  %579 = vst.msk [vmem:[%s1488_s1 + $0xc2] ss:$8 sm:$0xc] %vm3_vm4, %v133_v20   ;;  %v99_v21 = vpop.permute.xlu0 %98  }
  0x7b   :  { %580 = vst.msk [vmem:[%s1488_s1 + $0xc1] ss:$8 sm:$0x30] %vm3_vm4, %v133_v20   ;;  %581 = vst.msk [vmem:[%s1488_s1 + $0xc2] ss:$8 sm:$0xc0] %vm3_vm4, %v133_v20  }
  0x7c   :  { %566 = vst.msk [vmem:[%s1488_s1 + $0x41] ss:$8 sm:$0x3] %vm3_vm4, %v99_v21   ;;  %567 = vst.msk [vmem:[%s1488_s1 + $0x42] ss:$8 sm:$0xc] %vm3_vm4, %v99_v21  }
  0x7d   :  { %568 = vst.msk [vmem:[%s1488_s1 + $0x41] ss:$8 sm:$0x30] %vm3_vm4, %v99_v21   ;;  %569 = vst.msk [vmem:[%s1488_s1 + $0x42] ss:$8 sm:$0xc0] %vm3_vm4, %v99_v21   ;;  %v166_v22 = vpop.permute.xlu1 %165  }
  0x7e   :  { %589 = vst.msk [vmem:[%s1488_s1 + $0x42] ss:$8 sm:$0x3] %vm3_vm4, %v166_v22   ;;  %590 = vst.msk [vmem:[%s1488_s1 + $0x43] ss:$8 sm:$0xc] %vm3_vm4, %v166_v22   ;;  %v149_v23 = vpop.permute.xlu0 %148  }
  0x7f   :  { %591 = vst.msk [vmem:[%s1488_s1 + $0x42] ss:$8 sm:$0x30] %vm3_vm4, %v166_v22   ;;  %592 = vst.msk [vmem:[%s1488_s1 + $0x43] ss:$8 sm:$0xc0] %vm3_vm4, %v166_v22  }
  0x80   :  { %583 = vst.msk [vmem:[%s1488_s1 + $0x2] ss:$8 sm:$0x3] %vm3_vm4, %v149_v23   ;;  %584 = vst.msk [vmem:[%s1488_s1 + $0x3] ss:$8 sm:$0xc] %vm3_vm4, %v149_v23  }
  0x81   :  { %585 = vst.msk [vmem:[%s1488_s1 + $0x2] ss:$8 sm:$0x30] %vm3_vm4, %v149_v23   ;;  %586 = vst.msk [vmem:[%s1488_s1 + $0x3] ss:$8 sm:$0xc0] %vm3_vm4, %v149_v23   ;;  %v200_v24 = vpop.permute.xlu1 %199  }
  0x82   :  { %601 = vst.msk [vmem:[%s1488_s1 + $0xc2] ss:$8 sm:$0x3] %vm3_vm4, %v200_v24   ;;  %602 = vst.msk [vmem:[%s1488_s1 + $0xc3] ss:$8 sm:$0xc] %vm3_vm4, %v200_v24   ;;  %v183_v25 = vpop.permute.xlu0 %182  }
  0x83   :  { %603 = vst.msk [vmem:[%s1488_s1 + $0xc2] ss:$8 sm:$0x30] %vm3_vm4, %v200_v24   ;;  %604 = vst.msk [vmem:[%s1488_s1 + $0xc3] ss:$8 sm:$0xc0] %vm3_vm4, %v200_v24  }
  0x84   :  { %595 = vst.msk [vmem:[%s1488_s1 + $0x82] ss:$8 sm:$0x3] %vm3_vm4, %v183_v25   ;;  %596 = vst.msk [vmem:[%s1488_s1 + $0x83] ss:$8 sm:$0xc] %vm3_vm4, %v183_v25  }
  0x85   :  { %597 = vst.msk [vmem:[%s1488_s1 + $0x82] ss:$8 sm:$0x30] %vm3_vm4, %v183_v25   ;;  %598 = vst.msk [vmem:[%s1488_s1 + $0x83] ss:$8 sm:$0xc0] %vm3_vm4, %v183_v25   ;;  %v233_v26 = vpop.permute.xlu1 %232  }
  0x86   :  { %612 = vst.msk [vmem:[%s1488_s1 + $0x43] ss:$8 sm:$0x3] %vm3_vm4, %v233_v26   ;;  %613 = vst.msk [vmem:[%s1488_s1 + $0x44] ss:$8 sm:$0xc] %vm3_vm4, %v233_v26   ;;  %v216_v27 = vpop.permute.xlu0 %215  }
  0x87   :  { %614 = vst.msk [vmem:[%s1488_s1 + $0x43] ss:$8 sm:$0x30] %vm3_vm4, %v233_v26   ;;  %615 = vst.msk [vmem:[%s1488_s1 + $0x44] ss:$8 sm:$0xc0] %vm3_vm4, %v233_v26  }
  0x88   :  { %606 = vst.msk [vmem:[%s1488_s1 + $0x3] ss:$8 sm:$0x3] %vm3_vm4, %v216_v27   ;;  %607 = vst.msk [vmem:[%s1488_s1 + $0x4] ss:$8 sm:$0xc] %vm3_vm4, %v216_v27  }
  0x89   :  { %608 = vst.msk [vmem:[%s1488_s1 + $0x3] ss:$8 sm:$0x30] %vm3_vm4, %v216_v27   ;;  %609 = vst.msk [vmem:[%s1488_s1 + $0x4] ss:$8 sm:$0xc0] %vm3_vm4, %v216_v27   ;;  %v267_v28 = vpop.permute.xlu1 %266  }
  0x8a   :  { %624 = vst.msk [vmem:[%s1488_s1 + $0xc3] ss:$8 sm:$0x3] %vm3_vm4, %v267_v28   ;;  %625 = vst.msk [vmem:[%s1488_s1 + $0xc4] ss:$8 sm:$0xc] %vm3_vm4, %v267_v28   ;;  %v250_v29 = vpop.permute.xlu0 %249  }
  0x8b   :  { %626 = vst.msk [vmem:[%s1488_s1 + $0xc3] ss:$8 sm:$0x30] %vm3_vm4, %v267_v28   ;;  %627 = vst.msk [vmem:[%s1488_s1 + $0xc4] ss:$8 sm:$0xc0] %vm3_vm4, %v267_v28  }
  0x8c   :  { %618 = vst.msk [vmem:[%s1488_s1 + $0x83] ss:$8 sm:$0x3] %vm3_vm4, %v250_v29   ;;  %619 = vst.msk [vmem:[%s1488_s1 + $0x84] ss:$8 sm:$0xc] %vm3_vm4, %v250_v29  }
  0x8d   :  { %620 = vst.msk [vmem:[%s1488_s1 + $0x83] ss:$8 sm:$0x30] %vm3_vm4, %v250_v29   ;;  %621 = vst.msk [vmem:[%s1488_s1 + $0x84] ss:$8 sm:$0xc0] %vm3_vm4, %v250_v29   ;;  %v300_v30 = vpop.permute.xlu1 %299  }
  0x8e   :  { %635 = vst.msk [vmem:[%s1488_s1 + $0x44] ss:$8 sm:$0x3] %vm3_vm4, %v300_v30   ;;  %636 = vst.msk [vmem:[%s1488_s1 + $0x45] ss:$8 sm:$0xc] %vm3_vm4, %v300_v30   ;;  %v283_v31 = vpop.permute.xlu0 %282  }
  0x8f   :  { %637 = vst.msk [vmem:[%s1488_s1 + $0x44] ss:$8 sm:$0x30] %vm3_vm4, %v300_v30   ;;  %638 = vst.msk [vmem:[%s1488_s1 + $0x45] ss:$8 sm:$0xc0] %vm3_vm4, %v300_v30  }
  0x90   :  { %629 = vst.msk [vmem:[%s1488_s1 + $0x4] ss:$8 sm:$0x3] %vm3_vm4, %v283_v31   ;;  %630 = vst.msk [vmem:[%s1488_s1 + $0x5] ss:$8 sm:$0xc] %vm3_vm4, %v283_v31  }
  0x91   :  { %631 = vst.msk [vmem:[%s1488_s1 + $0x4] ss:$8 sm:$0x30] %vm3_vm4, %v283_v31   ;;  %632 = vst.msk [vmem:[%s1488_s1 + $0x5] ss:$8 sm:$0xc0] %vm3_vm4, %v283_v31   ;;  %v334_v32 = vpop.permute.xlu1 %333  }
  0x92   :  { %647 = vst.msk [vmem:[%s1488_s1 + $0xc4] ss:$8 sm:$0x3] %vm3_vm4, %v334_v32   ;;  %648 = vst.msk [vmem:[%s1488_s1 + $0xc5] ss:$8 sm:$0xc] %vm3_vm4, %v334_v32   ;;  %v317_v33 = vpop.permute.xlu0 %316  }
  0x93   :  { %649 = vst.msk [vmem:[%s1488_s1 + $0xc4] ss:$8 sm:$0x30] %vm3_vm4, %v334_v32   ;;  %650 = vst.msk [vmem:[%s1488_s1 + $0xc5] ss:$8 sm:$0xc0] %vm3_vm4, %v334_v32  }
  0x94   :  { %641 = vst.msk [vmem:[%s1488_s1 + $0x84] ss:$8 sm:$0x3] %vm3_vm4, %v317_v33   ;;  %642 = vst.msk [vmem:[%s1488_s1 + $0x85] ss:$8 sm:$0xc] %vm3_vm4, %v317_v33  }
  0x95   :  { %643 = vst.msk [vmem:[%s1488_s1 + $0x84] ss:$8 sm:$0x30] %vm3_vm4, %v317_v33   ;;  %644 = vst.msk [vmem:[%s1488_s1 + $0x85] ss:$8 sm:$0xc0] %vm3_vm4, %v317_v33   ;;  %v367_v34 = vpop.permute.xlu1 %366  }
  0x96   :  { %658 = vst.msk [vmem:[%s1488_s1 + $0x45] ss:$8 sm:$0x3] %vm3_vm4, %v367_v34   ;;  %659 = vst.msk [vmem:[%s1488_s1 + $0x46] ss:$8 sm:$0xc] %vm3_vm4, %v367_v34   ;;  %v350_v35 = vpop.permute.xlu0 %349  }
  0x97   :  { %660 = vst.msk [vmem:[%s1488_s1 + $0x45] ss:$8 sm:$0x30] %vm3_vm4, %v367_v34   ;;  %661 = vst.msk [vmem:[%s1488_s1 + $0x46] ss:$8 sm:$0xc0] %vm3_vm4, %v367_v34  }
  0x98   :  { %652 = vst.msk [vmem:[%s1488_s1 + $0x5] ss:$8 sm:$0x3] %vm3_vm4, %v350_v35   ;;  %653 = vst.msk [vmem:[%s1488_s1 + $0x6] ss:$8 sm:$0xc] %vm3_vm4, %v350_v35  }
  0x99   :  { %654 = vst.msk [vmem:[%s1488_s1 + $0x5] ss:$8 sm:$0x30] %vm3_vm4, %v350_v35   ;;  %655 = vst.msk [vmem:[%s1488_s1 + $0x6] ss:$8 sm:$0xc0] %vm3_vm4, %v350_v35   ;;  %v401_v36 = vpop.permute.xlu1 %400  }
  0x9a   :  { %670 = vst.msk [vmem:[%s1488_s1 + $0xc5] ss:$8 sm:$0x3] %vm3_vm4, %v401_v36   ;;  %671 = vst.msk [vmem:[%s1488_s1 + $0xc6] ss:$8 sm:$0xc] %vm3_vm4, %v401_v36   ;;  %v384_v37 = vpop.permute.xlu0 %383  }
  0x9b   :  { %672 = vst.msk [vmem:[%s1488_s1 + $0xc5] ss:$8 sm:$0x30] %vm3_vm4, %v401_v36   ;;  %673 = vst.msk [vmem:[%s1488_s1 + $0xc6] ss:$8 sm:$0xc0] %vm3_vm4, %v401_v36  }
  0x9c   :  { %664 = vst.msk [vmem:[%s1488_s1 + $0x85] ss:$8 sm:$0x3] %vm3_vm4, %v384_v37   ;;  %665 = vst.msk [vmem:[%s1488_s1 + $0x86] ss:$8 sm:$0xc] %vm3_vm4, %v384_v37  }
  0x9d   :  { %666 = vst.msk [vmem:[%s1488_s1 + $0x85] ss:$8 sm:$0x30] %vm3_vm4, %v384_v37   ;;  %667 = vst.msk [vmem:[%s1488_s1 + $0x86] ss:$8 sm:$0xc0] %vm3_vm4, %v384_v37   ;;  %v439_v38 = vpop.permute.xlu1 %438  }
  0x9e   :  { %682 = vst.msk [vmem:[%s1488_s1 + $0x66] ss:$8 sm:$0x3] %vm3_vm4, %v439_v38   ;;  %683 = vst.msk [vmem:[%s1488_s1 - $0x7] ss:$47 sm:$0xc] %vm3_vm4, %v439_v38   ;;  %v422_v39 = vpop.permute.xlu0 %421  }
  0x9f   :  { %684 = vst.msk [vmem:[%s1488_s1 + $0xea] ss:$-23 sm:$0x30] %vm3_vm4, %v439_v38   ;;  %685 = vst.msk [vmem:[%s1488_s1 + $0x76] ss:$8 sm:$0xc0] %vm3_vm4, %v439_v38  }
  0xa0   :  { %676 = vst.msk [vmem:[%s1488_s1 + $0x6] ss:$8 sm:$0x3] %vm3_vm4, %v422_v39   ;;  %677 = vst.msk [vmem:[%s1488_s1 - $0x7] ss:$15 sm:$0xc] %vm3_vm4, %v422_v39  }
  0xa1   :  { %678 = vst.msk [vmem:[%s1488_s1 + $0xa] ss:$9 sm:$0x30] %vm3_vm4, %v422_v39   ;;  %679 = vst.msk [vmem:[%s1488_s1 + $0x16] ss:$8 sm:$0xc0] %vm3_vm4, %v422_v39   ;;  %v479_v40 = vpop.permute.xlu1 %478  }
  0xa2   :  { %695 = vst.msk [vmem:[%s1488_s1 + $0x7] ss:$9 sm:$0x3] %vm3_vm4, %v479_v40   ;;  %696 = vst.msk [vmem:[%s1488_s1 - $0x6] ss:$15 sm:$0xc] %vm3_vm4, %v479_v40   ;;  %v456_v41 = vpop.permute.xlu0 %455  }
  0xa3   :  { %697 = vst.msk [vmem:[%s1488_s1 + $0x10] ss:$8 sm:$0x30] %vm3_vm4, %v479_v40   ;;  %698 = vst.msk [vmem:[%s1488_s1 + $0x11] ss:$9 sm:$0xc0] %vm3_vm4, %v479_v40  }
  0xa4   :  { %688 = vst.msk [vmem:[%s1488_s1 + $0xc6] ss:$8 sm:$0x3] %vm3_vm4, %v456_v41   ;;  %689 = vst.msk [vmem:[%s1488_s1 - $0x7] ss:$79 sm:$0xc] %vm3_vm4, %v456_v41  }
  0xa5   :  { %690 = vst.msk [vmem:[%s1488_s1 + $0x1ca] ss:$-55 sm:$0x30] %vm3_vm4, %v456_v41   ;;  %691 = vst.msk [vmem:[%s1488_s1 + $0xd1] sm:$0x40] %vm3_vm4, %v456_v41   ;;  %v513_v42 = vpop.permute.xlu1 %512  }
  0xa6   :  { %692 = vst.msk [vmem:[%s1488_s1 + $0xf0] sm:$0x80] %vm3_vm4, %v456_v41   ;;  %707 = vst.msk [vmem:[%s1488_s1 + $0xc7] ss:$9 sm:$0x3] %vm3_vm4, %v513_v42   ;;  %v496_v43 = vpop.permute.xlu0 %495  }
  0xa7   :  { %708 = vst.msk [vmem:[%s1488_s1 - $0x6] ss:$79 sm:$0xc] %vm3_vm4, %v513_v42   ;;  %709 = vst.msk [vmem:[%s1488_s1 + $0x1d0] ss:$-56 sm:$0x30] %vm3_vm4, %v513_v42  }
  0xa8   :  { %710 = vst.msk [vmem:[%s1488_s1 + $0xd2] sm:$0x40] %vm3_vm4, %v513_v42   ;;  %711 = vst.msk [vmem:[%s1488_s1 + $0xf1] sm:$0x80] %vm3_vm4, %v513_v42  }
  0xa9   :  { %701 = vst.msk [vmem:[%s1488_s1 + $0x67] ss:$9 sm:$0x3] %vm3_vm4, %v496_v43   ;;  %702 = vst.msk [vmem:[%s1488_s1 - $0x6] ss:$47 sm:$0xc] %vm3_vm4, %v496_v43  }
  0xaa   :  { %703 = vst.msk [vmem:[%s1488_s1 + $0xf0] ss:$-24 sm:$0x30] %vm3_vm4, %v496_v43   ;;  %704 = vst.msk [vmem:[%s1488_s1 + $0x71] ss:$9 sm:$0xc0] %vm3_vm4, %v496_v43  }

// kernel: squeeze.57
= control target key start
LH: loop header
LB: loop body
LE: loop exit
PB: predicated region body
PF: predicated region fallthrough
CT: control target
= control target key end

     0   :  { %vm562_vm0 = vcmask 973824   ;;  %vm645_vm1 = vcmask 1039360   ;;  %vm603_vm2 = vcmask 982016   ;;  %s1000_s14 = smov 1   ;;  %vm3_vm3 = vcmask 121856   ;;  %s1001_s2 = smov 8   ;;  %s2131_s0 = inlined_call_operand.vmem [shape: f32[1,8,450], index: 0, kind: input, shape index: {}]   ;;  %s2132_s1 = inlined_call_operand.vmem [shape: f32[8,2,15,15], index: 1, kind: output, shape index: {}]  }
   0x1   :  { %v1041_v0 = vld [vmem:[%s2131_s0 + $0x10] sm:$0xff]   ;;  %v918_v1 = vld [vmem:[%s2131_s0 + $0x18] sm:$0xff]   ;;  %v1049_v2 = vld [vmem:[%s2131_s0 + $0x8] sm:$0xff]   ;;  %s1002_s3 = smov 122   ;;  %s1003_s4 = smov 121   ;;  %vm566_vm4 = vcmask 72704  }
   0x2   :  { %v563_v3 = vsel %vm562_vm0, %v918_v1, %v1041_v0  ;;  %v646_v4 = vsel %vm645_vm1, %v1041_v0, %v1049_v2  ;;  %v1057_v5 = vld [vmem:[%s2131_s0] sm:$0xff]   ;;  %s999_s0 = smov 9   ;;  %s1004_s5 = smov 114   ;;  %vm649_vm5 = vcmask 7168   ;;  %vm583_vm6 = vcmask 121928  }
   0x3   :  { %564 = vrot.lane.b32.xlu0 %v563_v3, %s999_s0  ;;  %647 = vrot.lane.b32.xlu1 %v646_v4, %s1000_s14  ;;  %v604_v6 = vsel %vm603_vm2, %v1049_v2, %v1057_v5  ;;  %4 = vst.msk [vmem:[%s2132_s1] sm:$0x1] %vm3_vm3, %v1057_v5   ;;  %683 = vst.msk [vmem:[%s2132_s1 + $0x1f] sm:$0x2] %vm3_vm3, %v1057_v5   ;;  %s1005_s6 = smov 113   ;;  %s1006_s7 = smov 107  }
   0x4   :  { %684 = vst.msk [vmem:[%s2132_s1 + $0x3e] sm:$0x4] %vm3_vm3, %v1057_v5   ;;  %685 = vst.msk [vmem:[%s2132_s1 + $0x5d] sm:$0x8] %vm3_vm3, %v1057_v5   ;;  %s1007_s8 = smov 106   ;;  %s1008_s9 = smov 99  }
   0x5   :  { %686 = vst.msk [vmem:[%s2132_s1 + $0x7c] sm:$0x10] %vm3_vm3, %v1057_v5   ;;  %687 = vst.msk [vmem:[%s2132_s1 + $0x9b] sm:$0x20] %vm3_vm3, %v1057_v5   ;;  %s1009_s10 = smov 98   ;;  %s1010_s11 = smov 92  }
   0x6   :  { %688 = vst.msk [vmem:[%s2132_s1 + $0xba] sm:$0x40] %vm3_vm3, %v1057_v5   ;;  %689 = vst.msk [vmem:[%s2132_s1 + $0xd9] sm:$0x80] %vm3_vm3, %v1057_v5   ;;  %s1011_s12 = smov 91   ;;  %s1012_s13 = smov 84  }
   0x7   :  { %605 = vrot.lane.b32.xlu0 %v604_v6, %s1001_s2  ;;  %21 = vrot.lane.b32.xlu1 %v918_v1, %s1002_s3  ;;  %s1013_s0 = smov 83   ;;  %s1014_s14 = smov 77   ;;  %vm666_vm7 = vcmask 121864   ;;  %vm607_vm8 = vcmask 64512   ;;  %vm624_vm9 = vcmask 121920  }
   0x8   :  { %s1015_s15 = smov 76   ;;  %s1016_s16 = smov 69  }
   0x9   :  { %s1017_s17 = smov 68   ;;  %s1018_s18 = smov 61  }
   0xa   :  { %s1019_s19 = smov 54   ;;  %s1020_s20 = smov 53  }
   0xb   :  { %42 = vrot.lane.b32.xlu0 %v1049_v2, %s1003_s4  ;;  %63 = vrot.lane.b32.xlu1 %v1041_v0, %s1004_s5  ;;  %s1021_s21 = smov 46   ;;  %s1022_s22 = smov 39  }
   0xc   :  { %s1023_s23 = smov 38   ;;  %s1024_s24 = smov 31  }
   0xd   :  { %s1025_s25 = smov 24   ;;  %s1026_s26 = smov 23  }
   0xe   :  { %s1027_s27 = smov 16  }
   0xf   :  { %83 = vrot.lane.b32.xlu0 %v1057_v5, %s1005_s6  ;;  %104 = vrot.lane.b32.xlu1 %v918_v1, %s1006_s7 }
  0x13   :  { %125 = vrot.lane.b32.xlu0 %v1049_v2, %s1007_s8  ;;  %146 = vrot.lane.b32.xlu1 %v1041_v0, %s1008_s9 }
  0x17   :  { %166 = vrot.lane.b32.xlu0 %v1057_v5, %s1009_s10  ;;  %187 = vrot.lane.b32.xlu1 %v918_v1, %s1010_s11 }
  0x1b   :  { %208 = vrot.lane.b32.xlu0 %v1049_v2, %s1011_s12  ;;  %229 = vrot.lane.b32.xlu1 %v1041_v0, %s1012_s13 }
  0x1f   :  { %249 = vrot.lane.b32.xlu0 %v1057_v5, %s1013_s0  ;;  %270 = vrot.lane.b32.xlu1 %v918_v1, %s1014_s14 }
  0x23   :  { %291 = vrot.lane.b32.xlu0 %v1049_v2, %s1015_s15  ;;  %312 = vrot.lane.b32.xlu1 %v1041_v0, %s1016_s16 }
  0x27   :  { %332 = vrot.lane.b32.xlu0 %v1057_v5, %s1017_s17  ;;  %353 = vrot.lane.b32.xlu1 %v1049_v2, %s1018_s18 }
  0x2b   :  { %374 = vrot.lane.b32.xlu0 %v1041_v0, %s1019_s19  ;;  %394 = vrot.lane.b32.xlu1 %v1057_v5, %s1020_s20 }
  0x2f   :  { %415 = vrot.lane.b32.xlu0 %v1049_v2, %s1021_s21  ;;  %436 = vrot.lane.b32.xlu1 %v1041_v0, %s1022_s22 }
  0x33   :  { %456 = vrot.lane.b32.xlu0 %v1057_v5, %s1023_s23  ;;  %477 = vrot.lane.b32.xlu1 %v1049_v2, %s1024_s24 }
  0x37   :  { %498 = vrot.lane.b32.xlu0 %v1041_v0, %s1025_s25  ;;  %518 = vrot.lane.b32.xlu1 %v1057_v5, %s1026_s26 }
  0x3b   :  { %539 = vrot.lane.b32.xlu0 %v1049_v2, %s1027_s27 }
  0x75   :  { %v565_v7 = vpop.permute.xlu0 %564   ;;  %v648_v8 = vpop.permute.xlu1 %647  }
  0x76   :  { %919 = vst.msk [vmem:[%s2132_s1 + $0x1a] sm:$0x1] %vm566_vm4, %v565_v7   ;;  %920 = vst.msk [vmem:[%s2132_s1 + $0x39] sm:$0x2] %vm566_vm4, %v565_v7  }
  0x77   :  { %921 = vst.msk [vmem:[%s2132_s1 + $0x58] sm:$0x4] %vm566_vm4, %v565_v7   ;;  %922 = vst.msk [vmem:[%s2132_s1 + $0x77] sm:$0x8] %vm566_vm4, %v565_v7  }
  0x78   :  { %923 = vst.msk [vmem:[%s2132_s1 + $0x96] sm:$0x10] %vm566_vm4, %v565_v7   ;;  %924 = vst.msk [vmem:[%s2132_s1 + $0xb5] sm:$0x20] %vm566_vm4, %v565_v7  }
  0x79   :  { %925 = vst.msk [vmem:[%s2132_s1 + $0xd4] sm:$0x40] %vm566_vm4, %v565_v7   ;;  %926 = vst.msk [vmem:[%s2132_s1 + $0xf3] sm:$0x80] %vm566_vm4, %v565_v7   ;;  %v606_v9 = vpop.permute.xlu0 %605   ;;  %v22_v10 = vpop.permute.xlu1 %21  }
  0x7a   :  { %954 = vst.msk [vmem:[%s2132_s1 + $0x12] sm:$0x1] %vm649_vm5, %v648_v8   ;;  %955 = vst.msk [vmem:[%s2132_s1 + $0x31] sm:$0x2] %vm649_vm5, %v648_v8  }
  0x7b   :  { %956 = vst.msk [vmem:[%s2132_s1 + $0x50] sm:$0x4] %vm649_vm5, %v648_v8   ;;  %957 = vst.msk [vmem:[%s2132_s1 + $0x6f] sm:$0x8] %vm649_vm5, %v648_v8  }
  0x7c   :  { %958 = vst.msk [vmem:[%s2132_s1 + $0x8e] sm:$0x10] %vm649_vm5, %v648_v8   ;;  %959 = vst.msk [vmem:[%s2132_s1 + $0xad] sm:$0x20] %vm649_vm5, %v648_v8  }
  0x7d   :  { %960 = vst.msk [vmem:[%s2132_s1 + $0xcc] sm:$0x40] %vm649_vm5, %v648_v8   ;;  %961 = vst.msk [vmem:[%s2132_s1 + $0xeb] sm:$0x80] %vm649_vm5, %v648_v8   ;;  %v43_v11 = vpop.permute.xlu0 %42   ;;  %v64_v12 = vpop.permute.xlu1 %63  }
  0x7e   :  { %927 = vst.msk [vmem:[%s2132_s1 + $0x1a] sm:$0x1] %vm583_vm6, %v565_v7   ;;  %928 = vst.msk [vmem:[%s2132_s1 + $0x39] sm:$0x2] %vm583_vm6, %v565_v7  }
  0x7f   :  { %929 = vst.msk [vmem:[%s2132_s1 + $0x58] sm:$0x4] %vm583_vm6, %v565_v7   ;;  %930 = vst.msk [vmem:[%s2132_s1 + $0x77] sm:$0x8] %vm583_vm6, %v565_v7  }
  0x80   :  { %931 = vst.msk [vmem:[%s2132_s1 + $0x96] sm:$0x10] %vm583_vm6, %v565_v7   ;;  %932 = vst.msk [vmem:[%s2132_s1 + $0xb5] sm:$0x20] %vm583_vm6, %v565_v7  }
  0x81   :  { %933 = vst.msk [vmem:[%s2132_s1 + $0xd4] sm:$0x40] %vm583_vm6, %v565_v7   ;;  %934 = vst.msk [vmem:[%s2132_s1 + $0xf3] sm:$0x80] %vm583_vm6, %v565_v7   ;;  %v84_v13 = vpop.permute.xlu0 %83   ;;  %v105_v14 = vpop.permute.xlu1 %104  }
  0x82   :  { %962 = vst.msk [vmem:[%s2132_s1 + $0x12] sm:$0x1] %vm666_vm7, %v648_v8   ;;  %963 = vst.msk [vmem:[%s2132_s1 + $0x31] sm:$0x2] %vm666_vm7, %v648_v8  }
  0x83   :  { %964 = vst.msk [vmem:[%s2132_s1 + $0x50] sm:$0x4] %vm666_vm7, %v648_v8   ;;  %965 = vst.msk [vmem:[%s2132_s1 + $0x6f] sm:$0x8] %vm666_vm7, %v648_v8  }
  0x84   :  { %966 = vst.msk [vmem:[%s2132_s1 + $0x8e] sm:$0x10] %vm666_vm7, %v648_v8   ;;  %967 = vst.msk [vmem:[%s2132_s1 + $0xad] sm:$0x20] %vm666_vm7, %v648_v8  }
  0x85   :  { %968 = vst.msk [vmem:[%s2132_s1 + $0xcc] sm:$0x40] %vm666_vm7, %v648_v8   ;;  %969 = vst.msk [vmem:[%s2132_s1 + $0xeb] sm:$0x80] %vm666_vm7, %v648_v8   ;;  %v126_v15 = vpop.permute.xlu0 %125   ;;  %v147_v16 = vpop.permute.xlu1 %146  }
  0x86   :  { %936 = vst.msk [vmem:[%s2132_s1 + $0x8] sm:$0x1] %vm607_vm8, %v606_v9   ;;  %937 = vst.msk [vmem:[%s2132_s1 + $0x27] sm:$0x2] %vm607_vm8, %v606_v9  }
  0x87   :  { %938 = vst.msk [vmem:[%s2132_s1 + $0x46] sm:$0x4] %vm607_vm8, %v606_v9   ;;  %939 = vst.msk [vmem:[%s2132_s1 + $0x65] sm:$0x8] %vm607_vm8, %v606_v9  }
  0x88   :  { %940 = vst.msk [vmem:[%s2132_s1 + $0x84] sm:$0x10] %vm607_vm8, %v606_v9   ;;  %941 = vst.msk [vmem:[%s2132_s1 + $0xa3] sm:$0x20] %vm607_vm8, %v606_v9  }
  0x89   :  { %942 = vst.msk [vmem:[%s2132_s1 + $0xc2] sm:$0x40] %vm607_vm8, %v606_v9   ;;  %943 = vst.msk [vmem:[%s2132_s1 + $0xe1] sm:$0x80] %vm607_vm8, %v606_v9   ;;  %v167_v17 = vpop.permute.xlu0 %166   ;;  %v188_v18 = vpop.permute.xlu1 %187  }
  0x8a   :  { %691 = vst.msk [vmem:[%s2132_s1 + $0x1b] sm:$0x1] %vm3_vm3, %v22_v10   ;;  %692 = vst.msk [vmem:[%s2132_s1 + $0x3a] sm:$0x2] %vm3_vm3, %v22_v10  }
  0x8b   :  { %693 = vst.msk [vmem:[%s2132_s1 + $0x59] sm:$0x4] %vm3_vm3, %v22_v10   ;;  %694 = vst.msk [vmem:[%s2132_s1 + $0x78] sm:$0x8] %vm3_vm3, %v22_v10  }
  0x8c   :  { %695 = vst.msk [vmem:[%s2132_s1 + $0x97] sm:$0x10] %vm3_vm3, %v22_v10   ;;  %696 = vst.msk [vmem:[%s2132_s1 + $0xb6] sm:$0x20] %vm3_vm3, %v22_v10  }
  0x8d   :  { %697 = vst.msk [vmem:[%s2132_s1 + $0xd5] sm:$0x40] %vm3_vm3, %v22_v10   ;;  %698 = vst.msk [vmem:[%s2132_s1 + $0xf4] sm:$0x80] %vm3_vm3, %v22_v10   ;;  %v209_v19 = vpop.permute.xlu0 %208   ;;  %v230_v20 = vpop.permute.xlu1 %229  }
  0x8e   :  { %944 = vst.msk [vmem:[%s2132_s1 + $0x8] sm:$0x1] %vm624_vm9, %v606_v9   ;;  %945 = vst.msk [vmem:[%s2132_s1 + $0x27] sm:$0x2] %vm624_vm9, %v606_v9  }
  0x8f   :  { %946 = vst.msk [vmem:[%s2132_s1 + $0x46] sm:$0x4] %vm624_vm9, %v606_v9   ;;  %947 = vst.msk [vmem:[%s2132_s1 + $0x65] sm:$0x8] %vm624_vm9, %v606_v9  }
  0x90   :  { %948 = vst.msk [vmem:[%s2132_s1 + $0x84] sm:$0x10] %vm624_vm9, %v606_v9   ;;  %949 = vst.msk [vmem:[%s2132_s1 + $0xa3] sm:$0x20] %vm624_vm9, %v606_v9  }
  0x91   :  { %950 = vst.msk [vmem:[%s2132_s1 + $0xc2] sm:$0x40] %vm624_vm9, %v606_v9   ;;  %951 = vst.msk [vmem:[%s2132_s1 + $0xe1] sm:$0x80] %vm624_vm9, %v606_v9   ;;  %v250_v21 = vpop.permute.xlu0 %249   ;;  %v271_v22 = vpop.permute.xlu1 %270  }
  0x92   :  { %700 = vst.msk [vmem:[%s2132_s1 + $0x9] sm:$0x1] %vm3_vm3, %v43_v11   ;;  %701 = vst.msk [vmem:[%s2132_s1 + $0x28] sm:$0x2] %vm3_vm3, %v43_v11  }
  0x93   :  { %702 = vst.msk [vmem:[%s2132_s1 + $0x47] sm:$0x4] %vm3_vm3, %v43_v11   ;;  %703 = vst.msk [vmem:[%s2132_s1 + $0x66] sm:$0x8] %vm3_vm3, %v43_v11  }
  0x94   :  { %704 = vst.msk [vmem:[%s2132_s1 + $0x85] sm:$0x10] %vm3_vm3, %v43_v11   ;;  %705 = vst.msk [vmem:[%s2132_s1 + $0xa4] sm:$0x20] %vm3_vm3, %v43_v11  }
  0x95   :  { %706 = vst.msk [vmem:[%s2132_s1 + $0xc3] sm:$0x40] %vm3_vm3, %v43_v11   ;;  %707 = vst.msk [vmem:[%s2132_s1 + $0xe2] sm:$0x80] %vm3_vm3, %v43_v11   ;;  %v292_v23 = vpop.permute.xlu0 %291   ;;  %v313_v24 = vpop.permute.xlu1 %312  }
  0x96   :  { %709 = vst.msk [vmem:[%s2132_s1 + $0x13] sm:$0x1] %vm3_vm3, %v64_v12   ;;  %710 = vst.msk [vmem:[%s2132_s1 + $0x32] sm:$0x2] %vm3_vm3, %v64_v12  }
  0x97   :  { %711 = vst.msk [vmem:[%s2132_s1 + $0x51] sm:$0x4] %vm3_vm3, %v64_v12   ;;  %712 = vst.msk [vmem:[%s2132_s1 + $0x70] sm:$0x8] %vm3_vm3, %v64_v12  }
  0x98   :  { %713 = vst.msk [vmem:[%s2132_s1 + $0x8f] sm:$0x10] %vm3_vm3, %v64_v12   ;;  %714 = vst.msk [vmem:[%s2132_s1 + $0xae] sm:$0x20] %vm3_vm3, %v64_v12  }
  0x99   :  { %715 = vst.msk [vmem:[%s2132_s1 + $0xcd] sm:$0x40] %vm3_vm3, %v64_v12   ;;  %716 = vst.msk [vmem:[%s2132_s1 + $0xec] sm:$0x80] %vm3_vm3, %v64_v12   ;;  %v333_v25 = vpop.permute.xlu0 %332   ;;  %v354_v26 = vpop.permute.xlu1 %353  }
  0x9a   :  { %717 = vst.msk [vmem:[%s2132_s1 + $0x1] sm:$0x1] %vm3_vm3, %v84_v13   ;;  %718 = vst.msk [vmem:[%s2132_s1 + $0x20] sm:$0x2] %vm3_vm3, %v84_v13  }
  0x9b   :  { %719 = vst.msk [vmem:[%s2132_s1 + $0x3f] sm:$0x4] %vm3_vm3, %v84_v13   ;;  %720 = vst.msk [vmem:[%s2132_s1 + $0x5e] sm:$0x8] %vm3_vm3, %v84_v13  }
  0x9c   :  { %721 = vst.msk [vmem:[%s2132_s1 + $0x7d] sm:$0x10] %vm3_vm3, %v84_v13   ;;  %722 = vst.msk [vmem:[%s2132_s1 + $0x9c] sm:$0x20] %vm3_vm3, %v84_v13  }
  0x9d   :  { %723 = vst.msk [vmem:[%s2132_s1 + $0xbb] sm:$0x40] %vm3_vm3, %v84_v13   ;;  %724 = vst.msk [vmem:[%s2132_s1 + $0xda] sm:$0x80] %vm3_vm3, %v84_v13   ;;  %v375_v27 = vpop.permute.xlu0 %374   ;;  %v395_v28 = vpop.permute.xlu1 %394  }
  0x9e   :  { %726 = vst.msk [vmem:[%s2132_s1 + $0x1c] sm:$0x1] %vm3_vm3, %v105_v14   ;;  %727 = vst.msk [vmem:[%s2132_s1 + $0x3b] sm:$0x2] %vm3_vm3, %v105_v14  }
  0x9f   :  { %728 = vst.msk [vmem:[%s2132_s1 + $0x5a] sm:$0x4] %vm3_vm3, %v105_v14   ;;  %729 = vst.msk [vmem:[%s2132_s1 + $0x79] sm:$0x8] %vm3_vm3, %v105_v14  }
  0xa0   :  { %730 = vst.msk [vmem:[%s2132_s1 + $0x98] sm:$0x10] %vm3_vm3, %v105_v14   ;;  %731 = vst.msk [vmem:[%s2132_s1 + $0xb7] sm:$0x20] %vm3_vm3, %v105_v14  }
  0xa1   :  { %732 = vst.msk [vmem:[%s2132_s1 + $0xd6] sm:$0x40] %vm3_vm3, %v105_v14   ;;  %733 = vst.msk [vmem:[%s2132_s1 + $0xf5] sm:$0x80] %vm3_vm3, %v105_v14   ;;  %v416_v29 = vpop.permute.xlu0 %415   ;;  %v437_v30 = vpop.permute.xlu1 %436  }
  0xa2   :  { %735 = vst.msk [vmem:[%s2132_s1 + $0xa] sm:$0x1] %vm3_vm3, %v126_v15   ;;  %736 = vst.msk [vmem:[%s2132_s1 + $0x29] sm:$0x2] %vm3_vm3, %v126_v15  }
  0xa3   :  { %737 = vst.msk [vmem:[%s2132_s1 + $0x48] sm:$0x4] %vm3_vm3, %v126_v15   ;;  %738 = vst.msk [vmem:[%s2132_s1 + $0x67] sm:$0x8] %vm3_vm3, %v126_v15  }
  0xa4   :  { %739 = vst.msk [vmem:[%s2132_s1 + $0x86] sm:$0x10] %vm3_vm3, %v126_v15   ;;  %740 = vst.msk [vmem:[%s2132_s1 + $0xa5] sm:$0x20] %vm3_vm3, %v126_v15  }
  0xa5   :  { %741 = vst.msk [vmem:[%s2132_s1 + $0xc4] sm:$0x40] %vm3_vm3, %v126_v15   ;;  %742 = vst.msk [vmem:[%s2132_s1 + $0xe3] sm:$0x80] %vm3_vm3, %v126_v15   ;;  %v457_v31 = vpop.permute.xlu0 %456   ;;  %v478_v32 = vpop.permute.xlu1 %477  }
  0xa6   :  { %744 = vst.msk [vmem:[%s2132_s1 + $0x14] sm:$0x1] %vm3_vm3, %v147_v16   ;;  %745 = vst.msk [vmem:[%s2132_s1 + $0x33] sm:$0x2] %vm3_vm3, %v147_v16  }
  0xa7   :  { %746 = vst.msk [vmem:[%s2132_s1 + $0x52] sm:$0x4] %vm3_vm3, %v147_v16   ;;  %747 = vst.msk [vmem:[%s2132_s1 + $0x71] sm:$0x8] %vm3_vm3, %v147_v16  }
  0xa8   :  { %748 = vst.msk [vmem:[%s2132_s1 + $0x90] sm:$0x10] %vm3_vm3, %v147_v16   ;;  %749 = vst.msk [vmem:[%s2132_s1 + $0xaf] sm:$0x20] %vm3_vm3, %v147_v16  }
  0xa9   :  { %750 = vst.msk [vmem:[%s2132_s1 + $0xce] sm:$0x40] %vm3_vm3, %v147_v16   ;;  %751 = vst.msk [vmem:[%s2132_s1 + $0xed] sm:$0x80] %vm3_vm3, %v147_v16   ;;  %v499_v33 = vpop.permute.xlu0 %498   ;;  %v519_v34 = vpop.permute.xlu1 %518  }
  0xaa   :  { %752 = vst.msk [vmem:[%s2132_s1 + $0x2] sm:$0x1] %vm3_vm3, %v167_v17   ;;  %753 = vst.msk [vmem:[%s2132_s1 + $0x21] sm:$0x2] %vm3_vm3, %v167_v17  }
  0xab   :  { %754 = vst.msk [vmem:[%s2132_s1 + $0x40] sm:$0x4] %vm3_vm3, %v167_v17   ;;  %755 = vst.msk [vmem:[%s2132_s1 + $0x5f] sm:$0x8] %vm3_vm3, %v167_v17  }
  0xac   :  { %756 = vst.msk [vmem:[%s2132_s1 + $0x7e] sm:$0x10] %vm3_vm3, %v167_v17   ;;  %757 = vst.msk [vmem:[%s2132_s1 + $0x9d] sm:$0x20] %vm3_vm3, %v167_v17  }
  0xad   :  { %758 = vst.msk [vmem:[%s2132_s1 + $0xbc] sm:$0x40] %vm3_vm3, %v167_v17   ;;  %759 = vst.msk [vmem:[%s2132_s1 + $0xdb] sm:$0x80] %vm3_vm3, %v167_v17   ;;  %v540_v35 = vpop.permute.xlu0 %539  }
  0xae   :  { %761 = vst.msk [vmem:[%s2132_s1 + $0x1d] sm:$0x1] %vm3_vm3, %v188_v18   ;;  %762 = vst.msk [vmem:[%s2132_s1 + $0x3c] sm:$0x2] %vm3_vm3, %v188_v18  }
  0xaf   :  { %763 = vst.msk [vmem:[%s2132_s1 + $0x5b] sm:$0x4] %vm3_vm3, %v188_v18   ;;  %764 = vst.msk [vmem:[%s2132_s1 + $0x7a] sm:$0x8] %vm3_vm3, %v188_v18  }
  0xb0   :  { %765 = vst.msk [vmem:[%s2132_s1 + $0x99] sm:$0x10] %vm3_vm3, %v188_v18   ;;  %766 = vst.msk [vmem:[%s2132_s1 + $0xb8] sm:$0x20] %vm3_vm3, %v188_v18  }
  0xb1   :  { %767 = vst.msk [vmem:[%s2132_s1 + $0xd7] sm:$0x40] %vm3_vm3, %v188_v18   ;;  %768 = vst.msk [vmem:[%s2132_s1 + $0xf6] sm:$0x80] %vm3_vm3, %v188_v18  }
  0xb2   :  { %770 = vst.msk [vmem:[%s2132_s1 + $0xb] sm:$0x1] %vm3_vm3, %v209_v19   ;;  %771 = vst.msk [vmem:[%s2132_s1 + $0x2a] sm:$0x2] %vm3_vm3, %v209_v19  }
  0xb3   :  { %772 = vst.msk [vmem:[%s2132_s1 + $0x49] sm:$0x4] %vm3_vm3, %v209_v19   ;;  %773 = vst.msk [vmem:[%s2132_s1 + $0x68] sm:$0x8] %vm3_vm3, %v209_v19  }
  0xb4   :  { %774 = vst.msk [vmem:[%s2132_s1 + $0x87] sm:$0x10] %vm3_vm3, %v209_v19   ;;  %775 = vst.msk [vmem:[%s2132_s1 + $0xa6] sm:$0x20] %vm3_vm3, %v209_v19  }
  0xb5   :  { %776 = vst.msk [vmem:[%s2132_s1 + $0xc5] sm:$0x40] %vm3_vm3, %v209_v19   ;;  %777 = vst.msk [vmem:[%s2132_s1 + $0xe4] sm:$0x80] %vm3_vm3, %v209_v19  }
  0xb6   :  { %779 = vst.msk [vmem:[%s2132_s1 + $0x15] sm:$0x1] %vm3_vm3, %v230_v20   ;;  %780 = vst.msk [vmem:[%s2132_s1 + $0x34] sm:$0x2] %vm3_vm3, %v230_v20  }
  0xb7   :  { %781 = vst.msk [vmem:[%s2132_s1 + $0x53] sm:$0x4] %vm3_vm3, %v230_v20   ;;  %782 = vst.msk [vmem:[%s2132_s1 + $0x72] sm:$0x8] %vm3_vm3, %v230_v20  }
  0xb8   :  { %783 = vst.msk [vmem:[%s2132_s1 + $0x91] sm:$0x10] %vm3_vm3, %v230_v20   ;;  %784 = vst.msk [vmem:[%s2132_s1 + $0xb0] sm:$0x20] %vm3_vm3, %v230_v20  }
  0xb9   :  { %785 = vst.msk [vmem:[%s2132_s1 + $0xcf] sm:$0x40] %vm3_vm3, %v230_v20   ;;  %786 = vst.msk [vmem:[%s2132_s1 + $0xee] sm:$0x80] %vm3_vm3, %v230_v20  }
  0xba   :  { %787 = vst.msk [vmem:[%s2132_s1 + $0x3] sm:$0x1] %vm3_vm3, %v250_v21   ;;  %788 = vst.msk [vmem:[%s2132_s1 + $0x22] sm:$0x2] %vm3_vm3, %v250_v21  }
  0xbb   :  { %789 = vst.msk [vmem:[%s2132_s1 + $0x41] sm:$0x4] %vm3_vm3, %v250_v21   ;;  %790 = vst.msk [vmem:[%s2132_s1 + $0x60] sm:$0x8] %vm3_vm3, %v250_v21  }
  0xbc   :  { %791 = vst.msk [vmem:[%s2132_s1 + $0x7f] sm:$0x10] %vm3_vm3, %v250_v21   ;;  %792 = vst.msk [vmem:[%s2132_s1 + $0x9e] sm:$0x20] %vm3_vm3, %v250_v21  }
  0xbd   :  { %793 = vst.msk [vmem:[%s2132_s1 + $0xbd] sm:$0x40] %vm3_vm3, %v250_v21   ;;  %794 = vst.msk [vmem:[%s2132_s1 + $0xdc] sm:$0x80] %vm3_vm3, %v250_v21  }
  0xbe   :  { %796 = vst.msk [vmem:[%s2132_s1 + $0x1e] sm:$0x1] %vm3_vm3, %v271_v22   ;;  %797 = vst.msk [vmem:[%s2132_s1 + $0x3d] sm:$0x2] %vm3_vm3, %v271_v22  }
  0xbf   :  { %798 = vst.msk [vmem:[%s2132_s1 + $0x5c] sm:$0x4] %vm3_vm3, %v271_v22   ;;  %799 = vst.msk [vmem:[%s2132_s1 + $0x7b] sm:$0x8] %vm3_vm3, %v271_v22  }
  0xc0   :  { %800 = vst.msk [vmem:[%s2132_s1 + $0x9a] sm:$0x10] %vm3_vm3, %v271_v22   ;;  %801 = vst.msk [vmem:[%s2132_s1 + $0xb9] sm:$0x20] %vm3_vm3, %v271_v22  }
  0xc1   :  { %802 = vst.msk [vmem:[%s2132_s1 + $0xd8] sm:$0x40] %vm3_vm3, %v271_v22   ;;  %803 = vst.msk [vmem:[%s2132_s1 + $0xf7] sm:$0x80] %vm3_vm3, %v271_v22  }
  0xc2   :  { %805 = vst.msk [vmem:[%s2132_s1 + $0xc] sm:$0x1] %vm3_vm3, %v292_v23   ;;  %806 = vst.msk [vmem:[%s2132_s1 + $0x2b] sm:$0x2] %vm3_vm3, %v292_v23  }
  0xc3   :  { %807 = vst.msk [vmem:[%s2132_s1 + $0x4a] sm:$0x4] %vm3_vm3, %v292_v23   ;;  %808 = vst.msk [vmem:[%s2132_s1 + $0x69] sm:$0x8] %vm3_vm3, %v292_v23  }
  0xc4   :  { %809 = vst.msk [vmem:[%s2132_s1 + $0x88] sm:$0x10] %vm3_vm3, %v292_v23   ;;  %810 = vst.msk [vmem:[%s2132_s1 + $0xa7] sm:$0x20] %vm3_vm3, %v292_v23  }
  0xc5   :  { %811 = vst.msk [vmem:[%s2132_s1 + $0xc6] sm:$0x40] %vm3_vm3, %v292_v23   ;;  %812 = vst.msk [vmem:[%s2132_s1 + $0xe5] sm:$0x80] %vm3_vm3, %v292_v23  }
  0xc6   :  { %814 = vst.msk [vmem:[%s2132_s1 + $0x16] sm:$0x1] %vm3_vm3, %v313_v24   ;;  %815 = vst.msk [vmem:[%s2132_s1 + $0x35] sm:$0x2] %vm3_vm3, %v313_v24  }
  0xc7   :  { %816 = vst.msk [vmem:[%s2132_s1 + $0x54] sm:$0x4] %vm3_vm3, %v313_v24   ;;  %817 = vst.msk [vmem:[%s2132_s1 + $0x73] sm:$0x8] %vm3_vm3, %v313_v24  }
  0xc8   :  { %818 = vst.msk [vmem:[%s2132_s1 + $0x92] sm:$0x10] %vm3_vm3, %v313_v24   ;;  %819 = vst.msk [vmem:[%s2132_s1 + $0xb1] sm:$0x20] %vm3_vm3, %v313_v24  }
  0xc9   :  { %820 = vst.msk [vmem:[%s2132_s1 + $0xd0] sm:$0x40] %vm3_vm3, %v313_v24   ;;  %821 = vst.msk [vmem:[%s2132_s1 + $0xef] sm:$0x80] %vm3_vm3, %v313_v24  }
  0xca   :  { %822 = vst.msk [vmem:[%s2132_s1 + $0x4] sm:$0x1] %vm3_vm3, %v333_v25   ;;  %823 = vst.msk [vmem:[%s2132_s1 + $0x23] sm:$0x2] %vm3_vm3, %v333_v25  }
  0xcb   :  { %824 = vst.msk [vmem:[%s2132_s1 + $0x42] sm:$0x4] %vm3_vm3, %v333_v25   ;;  %825 = vst.msk [vmem:[%s2132_s1 + $0x61] sm:$0x8] %vm3_vm3, %v333_v25  }
  0xcc   :  { %826 = vst.msk [vmem:[%s2132_s1 + $0x80] sm:$0x10] %vm3_vm3, %v333_v25   ;;  %827 = vst.msk [vmem:[%s2132_s1 + $0x9f] sm:$0x20] %vm3_vm3, %v333_v25  }
  0xcd   :  { %828 = vst.msk [vmem:[%s2132_s1 + $0xbe] sm:$0x40] %vm3_vm3, %v333_v25   ;;  %829 = vst.msk [vmem:[%s2132_s1 + $0xdd] sm:$0x80] %vm3_vm3, %v333_v25  }
  0xce   :  { %831 = vst.msk [vmem:[%s2132_s1 + $0xd] sm:$0x1] %vm3_vm3, %v354_v26   ;;  %832 = vst.msk [vmem:[%s2132_s1 + $0x2c] sm:$0x2] %vm3_vm3, %v354_v26  }
  0xcf   :  { %833 = vst.msk [vmem:[%s2132_s1 + $0x4b] sm:$0x4] %vm3_vm3, %v354_v26   ;;  %834 = vst.msk [vmem:[%s2132_s1 + $0x6a] sm:$0x8] %vm3_vm3, %v354_v26  }
  0xd0   :  { %835 = vst.msk [vmem:[%s2132_s1 + $0x89] sm:$0x10] %vm3_vm3, %v354_v26   ;;  %836 = vst.msk [vmem:[%s2132_s1 + $0xa8] sm:$0x20] %vm3_vm3, %v354_v26  }
  0xd1   :  { %837 = vst.msk [vmem:[%s2132_s1 + $0xc7] sm:$0x40] %vm3_vm3, %v354_v26   ;;  %838 = vst.msk [vmem:[%s2132_s1 + $0xe6] sm:$0x80] %vm3_vm3, %v354_v26  }
  0xd2   :  { %840 = vst.msk [vmem:[%s2132_s1 + $0x17] sm:$0x1] %vm3_vm3, %v375_v27   ;;  %841 = vst.msk [vmem:[%s2132_s1 + $0x36] sm:$0x2] %vm3_vm3, %v375_v27  }
  0xd3   :  { %842 = vst.msk [vmem:[%s2132_s1 + $0x55] sm:$0x4] %vm3_vm3, %v375_v27   ;;  %843 = vst.msk [vmem:[%s2132_s1 + $0x74] sm:$0x8] %vm3_vm3, %v375_v27  }
  0xd4   :  { %844 = vst.msk [vmem:[%s2132_s1 + $0x93] sm:$0x10] %vm3_vm3, %v375_v27   ;;  %845 = vst.msk [vmem:[%s2132_s1 + $0xb2] sm:$0x20] %vm3_vm3, %v375_v27  }
  0xd5   :  { %846 = vst.msk [vmem:[%s2132_s1 + $0xd1] sm:$0x40] %vm3_vm3, %v375_v27   ;;  %847 = vst.msk [vmem:[%s2132_s1 + $0xf0] sm:$0x80] %vm3_vm3, %v375_v27  }
  0xd6   :  { %848 = vst.msk [vmem:[%s2132_s1 + $0x5] sm:$0x1] %vm3_vm3, %v395_v28   ;;  %849 = vst.msk [vmem:[%s2132_s1 + $0x24] sm:$0x2] %vm3_vm3, %v395_v28  }
  0xd7   :  { %850 = vst.msk [vmem:[%s2132_s1 + $0x43] sm:$0x4] %vm3_vm3, %v395_v28   ;;  %851 = vst.msk [vmem:[%s2132_s1 + $0x62] sm:$0x8] %vm3_vm3, %v395_v28  }
  0xd8   :  { %852 = vst.msk [vmem:[%s2132_s1 + $0x81] sm:$0x10] %vm3_vm3, %v395_v28   ;;  %853 = vst.msk [vmem:[%s2132_s1 + $0xa0] sm:$0x20] %vm3_vm3, %v395_v28  }
  0xd9   :  { %854 = vst.msk [vmem:[%s2132_s1 + $0xbf] sm:$0x40] %vm3_vm3, %v395_v28   ;;  %855 = vst.msk [vmem:[%s2132_s1 + $0xde] sm:$0x80] %vm3_vm3, %v395_v28  }
  0xda   :  { %857 = vst.msk [vmem:[%s2132_s1 + $0xe] sm:$0x1] %vm3_vm3, %v416_v29   ;;  %858 = vst.msk [vmem:[%s2132_s1 + $0x2d] sm:$0x2] %vm3_vm3, %v416_v29  }
  0xdb   :  { %859 = vst.msk [vmem:[%s2132_s1 + $0x4c] sm:$0x4] %vm3_vm3, %v416_v29   ;;  %860 = vst.msk [vmem:[%s2132_s1 + $0x6b] sm:$0x8] %vm3_vm3, %v416_v29  }
  0xdc   :  { %861 = vst.msk [vmem:[%s2132_s1 + $0x8a] sm:$0x10] %vm3_vm3, %v416_v29   ;;  %862 = vst.msk [vmem:[%s2132_s1 + $0xa9] sm:$0x20] %vm3_vm3, %v416_v29  }
  0xdd   :  { %863 = vst.msk [vmem:[%s2132_s1 + $0xc8] sm:$0x40] %vm3_vm3, %v416_v29   ;;  %864 = vst.msk [vmem:[%s2132_s1 + $0xe7] sm:$0x80] %vm3_vm3, %v416_v29  }
  0xde   :  { %866 = vst.msk [vmem:[%s2132_s1 + $0x18] sm:$0x1] %vm3_vm3, %v437_v30   ;;  %867 = vst.msk [vmem:[%s2132_s1 + $0x37] sm:$0x2] %vm3_vm3, %v437_v30  }
  0xdf   :  { %868 = vst.msk [vmem:[%s2132_s1 + $0x56] sm:$0x4] %vm3_vm3, %v437_v30   ;;  %869 = vst.msk [vmem:[%s2132_s1 + $0x75] sm:$0x8] %vm3_vm3, %v437_v30  }
  0xe0   :  { %870 = vst.msk [vmem:[%s2132_s1 + $0x94] sm:$0x10] %vm3_vm3, %v437_v30   ;;  %871 = vst.msk [vmem:[%s2132_s1 + $0xb3] sm:$0x20] %vm3_vm3, %v437_v30  }
  0xe1   :  { %872 = vst.msk [vmem:[%s2132_s1 + $0xd2] sm:$0x40] %vm3_vm3, %v437_v30   ;;  %873 = vst.msk [vmem:[%s2132_s1 + $0xf1] sm:$0x80] %vm3_vm3, %v437_v30  }
  0xe2   :  { %874 = vst.msk [vmem:[%s2132_s1 + $0x6] sm:$0x1] %vm3_vm3, %v457_v31   ;;  %875 = vst.msk [vmem:[%s2132_s1 + $0x25] sm:$0x2] %vm3_vm3, %v457_v31  }
  0xe3   :  { %876 = vst.msk [vmem:[%s2132_s1 + $0x44] sm:$0x4] %vm3_vm3, %v457_v31   ;;  %877 = vst.msk [vmem:[%s2132_s1 + $0x63] sm:$0x8] %vm3_vm3, %v457_v31  }
  0xe4   :  { %878 = vst.msk [vmem:[%s2132_s1 + $0x82] sm:$0x10] %vm3_vm3, %v457_v31   ;;  %879 = vst.msk [vmem:[%s2132_s1 + $0xa1] sm:$0x20] %vm3_vm3, %v457_v31  }
  0xe5   :  { %880 = vst.msk [vmem:[%s2132_s1 + $0xc0] sm:$0x40] %vm3_vm3, %v457_v31   ;;  %881 = vst.msk [vmem:[%s2132_s1 + $0xdf] sm:$0x80] %vm3_vm3, %v457_v31  }
  0xe6   :  { %883 = vst.msk [vmem:[%s2132_s1 + $0x10] sm:$0x1] %vm3_vm3, %v478_v32   ;;  %884 = vst.msk [vmem:[%s2132_s1 + $0x2f] sm:$0x2] %vm3_vm3, %v478_v32  }
  0xe7   :  { %885 = vst.msk [vmem:[%s2132_s1 + $0x4e] sm:$0x4] %vm3_vm3, %v478_v32   ;;  %886 = vst.msk [vmem:[%s2132_s1 + $0x6d] sm:$0x8] %vm3_vm3, %v478_v32  }
  0xe8   :  { %887 = vst.msk [vmem:[%s2132_s1 + $0x8c] sm:$0x10] %vm3_vm3, %v478_v32   ;;  %888 = vst.msk [vmem:[%s2132_s1 + $0xab] sm:$0x20] %vm3_vm3, %v478_v32  }
  0xe9   :  { %889 = vst.msk [vmem:[%s2132_s1 + $0xca] sm:$0x40] %vm3_vm3, %v478_v32   ;;  %890 = vst.msk [vmem:[%s2132_s1 + $0xe9] sm:$0x80] %vm3_vm3, %v478_v32  }
  0xea   :  { %892 = vst.msk [vmem:[%s2132_s1 + $0x19] sm:$0x1] %vm3_vm3, %v499_v33   ;;  %893 = vst.msk [vmem:[%s2132_s1 + $0x38] sm:$0x2] %vm3_vm3, %v499_v33  }
  0xeb   :  { %894 = vst.msk [vmem:[%s2132_s1 + $0x57] sm:$0x4] %vm3_vm3, %v499_v33   ;;  %895 = vst.msk [vmem:[%s2132_s1 + $0x76] sm:$0x8] %vm3_vm3, %v499_v33  }
  0xec   :  { %896 = vst.msk [vmem:[%s2132_s1 + $0x95] sm:$0x10] %vm3_vm3, %v499_v33   ;;  %897 = vst.msk [vmem:[%s2132_s1 + $0xb4] sm:$0x20] %vm3_vm3, %v499_v33  }
  0xed   :  { %898 = vst.msk [vmem:[%s2132_s1 + $0xd3] sm:$0x40] %vm3_vm3, %v499_v33   ;;  %899 = vst.msk [vmem:[%s2132_s1 + $0xf2] sm:$0x80] %vm3_vm3, %v499_v33  }
  0xee   :  { %900 = vst.msk [vmem:[%s2132_s1 + $0x7] sm:$0x1] %vm3_vm3, %v519_v34   ;;  %901 = vst.msk [vmem:[%s2132_s1 + $0x26] sm:$0x2] %vm3_vm3, %v519_v34  }
  0xef   :  { %902 = vst.msk [vmem:[%s2132_s1 + $0x45] sm:$0x4] %vm3_vm3, %v519_v34   ;;  %903 = vst.msk [vmem:[%s2132_s1 + $0x64] sm:$0x8] %vm3_vm3, %v519_v34  }
  0xf0   :  { %904 = vst.msk [vmem:[%s2132_s1 + $0x83] sm:$0x10] %vm3_vm3, %v519_v34   ;;  %905 = vst.msk [vmem:[%s2132_s1 + $0xa2] sm:$0x20] %vm3_vm3, %v519_v34  }
  0xf1   :  { %906 = vst.msk [vmem:[%s2132_s1 + $0xc1] sm:$0x40] %vm3_vm3, %v519_v34   ;;  %907 = vst.msk [vmem:[%s2132_s1 + $0xe0] sm:$0x80] %vm3_vm3, %v519_v34  }
  0xf2   :  { %909 = vst.msk [vmem:[%s2132_s1 + $0x11] sm:$0x1] %vm3_vm3, %v540_v35   ;;  %910 = vst.msk [vmem:[%s2132_s1 + $0x30] sm:$0x2] %vm3_vm3, %v540_v35  }
  0xf3   :  { %911 = vst.msk [vmem:[%s2132_s1 + $0x4f] sm:$0x4] %vm3_vm3, %v540_v35   ;;  %912 = vst.msk [vmem:[%s2132_s1 + $0x6e] sm:$0x8] %vm3_vm3, %v540_v35  }
  0xf4   :  { %913 = vst.msk [vmem:[%s2132_s1 + $0x8d] sm:$0x10] %vm3_vm3, %v540_v35   ;;  %914 = vst.msk [vmem:[%s2132_s1 + $0xac] sm:$0x20] %vm3_vm3, %v540_v35  }
  0xf5   :  { %915 = vst.msk [vmem:[%s2132_s1 + $0xcb] sm:$0x40] %vm3_vm3, %v540_v35   ;;  %916 = vst.msk [vmem:[%s2132_s1 + $0xea] sm:$0x80] %vm3_vm3, %v540_v35  }

</bundles_post_ra>
